<compile_context>
chip_gen: v7x
topology: tpu7x:2x2x1
jax: 0.10.0
libtpu: 0.0.40
codegen_flags: <defaults>
</compile_context>

<pallas_src>
import functools

import jax
import jax.numpy as jnp
from jax import lax
from jax.experimental import pallas as pl
from jax.experimental.pallas import tpu as pltpu

BN_EPS = 1e-5
LANE = 128
VMEM_LIMIT = 64 * 1024 * 1024


def _round_up(x, m):
    return (x + m - 1) // m * m


# --------------------------- pass 1: conv + BN stats --------------------------

def _conv_stats_kernel(xp_ref, w_ref, g_ref, beta_ref, y_ref, ss_ref, acc_ref,
                       *, H, W, total_rows):
    """Per grid step: 3x3 conv on one image (9 shifted-window bf16 matmuls,
    f32 accumulate), write conv output tile, accumulate per-channel sum /
    sum-of-squares. On the last step, fold the stats + gamma/beta into a fused
    per-channel (scale, shift) pair stored in ss_ref.

    xp_ref  : (H+2, W+2, Cin_pad)   bf16, spatially + channel padded input
    w_ref   : (9, Cin_pad, Cout_pad) bf16, tap-major conv weights
    g_ref   : (1, Cout_pad)          f32, BN gamma (zero in padded channels)
    beta_ref: (1, Cout_pad)          f32, BN beta  (zero in padded channels)
    y_ref   : (H*W, Cout_pad)        f32, conv output rows for this image
    ss_ref  : (2, Cout_pad)          f32, resident accumulator -> (scale, shift)
    acc_ref : (H*W, Cout_pad)        f32 VMEM scratch
    """
    b = pl.program_id(0)

    @pl.when(b == 0)
    def _():
        ss_ref[...] = jnp.zeros_like(ss_ref)

    cin_pad = xp_ref.shape[-1]
    acc_ref[...] = jnp.zeros_like(acc_ref)
    # 9 taps, statically unrolled: tap t = dy*3 + dx reads the (dy, dx)-shifted
    # (H, W) window of the padded input (cross-correlation, matching Conv2d).
    for t in range(9):
        dy, dx = divmod(t, 3)
        win = xp_ref[dy:dy + H, dx:dx + W, :].reshape(H * W, cin_pad)
        acc_ref[...] += jnp.dot(win, w_ref[t],
                                preferred_element_type=jnp.float32)

    acc = acc_ref[...]
    y_ref[...] = acc.astype(y_ref.dtype)

    # Per-channel partial batch statistics (f32).
    ss_ref[0:1, :] += jnp.sum(acc, axis=0, keepdims=True)
    ss_ref[1:2, :] += jnp.sum(acc * acc, axis=0, keepdims=True)

    @pl.when(b == pl.num_programs(0) - 1)
    def _():
        inv_m = 1.0 / float(total_rows)
        mean = ss_ref[0:1, :] * inv_m
        var = jnp.maximum(ss_ref[1:2, :] * inv_m - mean * mean, 0.0)
        scale = g_ref[...] * lax.rsqrt(var + BN_EPS)
        shift = beta_ref[...] - mean * scale
        ss_ref[0:1, :] = scale
        ss_ref[1:2, :] = shift


# ------------------------ pass 2: normalize + ReLU ----------------------------

def _bn_relu_kernel(y_ref, ss_ref, o_ref):
    """y * scale + shift, ReLU. Lane-dense (TILE_M, Cout_pad) tiles."""
    scale = ss_ref[0:1, :]
    shift = ss_ref[1:2, :]
    o_ref[...] = jnp.maximum(y_ref[...] * scale + shift, 0.0).astype(o_ref.dtype)


# ------------------------------- block wrapper --------------------------------

def _conv_bn_relu_block(x_pad, w_tap, gamma_pad, beta_pad, out_dtype):
    """One fused Conv3x3(+pad=1) -> BN(batch stats) -> ReLU block.

    x_pad    : (B, H+2, W+2, Cin_pad)  bf16
    w_tap    : (9, Cin_pad, Cout_pad)  bf16
    gamma_pad: (1, Cout_pad)           f32
    beta_pad : (1, Cout_pad)           f32
    returns  : (B*H*W, Cout_pad) in out_dtype
    """
    B = x_pad.shape[0]
    H = x_pad.shape[1] - 2
    W = x_pad.shape[2] - 2
    cin_pad = x_pad.shape[-1]
    cout_pad = w_tap.shape[-1]
    rows_per_img = H * W          # multiple of 8 for these shapes (W % 8 == 0)
    M = B * rows_per_img

    kern = functools.partial(_conv_stats_kernel, H=H, W=W, total_rows=M)

    # Pass 1: conv + stats. The (2, Cout_pad) stats output is resident across
    # the whole grid (constant index_map) -> the grid axis must be "arbitrary".
    # TODO(synk): for v7x megacore, split the M axis per-core with per-core
    # partial sums combined in a finalize step instead of a single accumulator.
    y, ss = pl.pallas_call(
        kern,
        out_shape=(
            jax.ShapeDtypeStruct((M, cout_pad), jnp.float32),
            jax.ShapeDtypeStruct((2, cout_pad), jnp.float32),
        ),
        grid=(B,),
        in_specs=[
            pl.BlockSpec((None, H + 2, W + 2, cin_pad),
                         lambda b: (b, 0, 0, 0)),
            pl.BlockSpec((9, cin_pad, cout_pad), lambda b: (0, 0, 0)),
            pl.BlockSpec((1, cout_pad), lambda b: (0, 0)),
            pl.BlockSpec((1, cout_pad), lambda b: (0, 0)),
        ],
        out_specs=(
            pl.BlockSpec((rows_per_img, cout_pad), lambda b: (b, 0)),
            pl.BlockSpec((2, cout_pad), lambda b: (0, 0)),
        ),
        scratch_shapes=[pltpu.VMEM((rows_per_img, cout_pad), jnp.float32)],
        compiler_params=pltpu.CompilerParams(
            dimension_semantics=("arbitrary",),
            vmem_limit_bytes=VMEM_LIMIT),
    )(x_pad, w_tap, gamma_pad, beta_pad)

    # Pass 2: normalize + affine + ReLU. Independent row tiles -> "parallel"
    # (uses both TensorCores on v7x), lane-dense output stores.
    tile_m = rows_per_img
    out = pl.pallas_call(
        _bn_relu_kernel,
        out_shape=jax.ShapeDtypeStruct((M, cout_pad), out_dtype),
        grid=(M // tile_m,),
        in_specs=[
            pl.BlockSpec((tile_m, cout_pad), lambda i: (i, 0)),
            pl.BlockSpec((2, cout_pad), lambda i: (0, 0)),
        ],
        out_specs=pl.BlockSpec((tile_m, cout_pad), lambda i: (i, 0)),
        compiler_params=pltpu.CompilerParams(
            dimension_semantics=("parallel",),
            vmem_limit_bytes=VMEM_LIMIT),
    )(y, ss)
    return out


# ------------------------------ parameter packing ------------------------------

def _pack_weights(w_oihw, cin_pad, cout_pad):
    """(Cout, Cin, 3, 3) -> (9, Cin_pad, Cout_pad) bf16, tap index = ky*3+kx."""
    cout, cin = w_oihw.shape[0], w_oihw.shape[1]
    w = jnp.transpose(w_oihw, (2, 3, 1, 0)).reshape(9, cin, cout)
    w = jnp.pad(w, ((0, 0), (0, cin_pad - cin), (0, cout_pad - cout)))
    return w.astype(jnp.bfloat16)


def _pad_vec(v, cpad):
    c = v.shape[0]
    return jnp.pad(v, (0, cpad - c)).reshape(1, cpad).astype(jnp.float32)


# ----------------------------------- forward ----------------------------------

def double_conv_forward(x_nchw, params):
    """Forward of DoubleConv. Input/output in PyTorch NCHW layout (f32)."""
    B, cin, H, W = x_nchw.shape
    cout = params["w1"].shape[0]
    cin_pad = _round_up(cin, LANE)
    cout_pad = _round_up(cout, LANE)

    # NCHW -> NHWC, spatial pad=1 halo + channel pad to 128 lanes, bf16 for MXU.
    x = jnp.transpose(x_nchw, (0, 2, 3, 1))
    xp = jnp.pad(x, ((0, 0), (1, 1), (1, 1), (0, cin_pad - cin)))
    xp = xp.astype(jnp.bfloat16)

    w1 = _pack_weights(params["w1"], cin_pad, cout_pad)
    g1 = _pad_vec(params["gamma1"], cout_pad)
    be1 = _pad_vec(params["beta1"], cout_pad)
    # Conv biases (params["b1"], params["b2"]) are intentionally not applied:
    # training-mode BN subtracts the per-channel batch mean, which cancels them.

    a1 = _conv_bn_relu_block(xp, w1, g1, be1, jnp.bfloat16)      # (B*H*W, Cp)
    a1 = a1.reshape(B, H, W, cout_pad)
    a1p = jnp.pad(a1, ((0, 0), (1, 1), (1, 1), (0, 0)))          # halo, bf16

    w2 = _pack_weights(params["w2"], cout_pad, cout_pad)
    g2 = _pad_vec(params["gamma2"], cout_pad)
    be2 = _pad_vec(params["beta2"], cout_pad)

    a2 = _conv_bn_relu_block(a1p, w2, g2, be2, jnp.float32)      # (B*H*W, Cp)
    out = a2.reshape(B, H, W, cout_pad)[:, :, :, :cout]
    return jnp.transpose(out, (0, 3, 1, 2))                      # NHWC -> NCHW


# ----------------------------- reference (plain JAX) ---------------------------

def _ref_block(x_nhwc, w_oihw, bias, gamma, beta):
    w_hwio = jnp.transpose(w_oihw, (2, 3, 1, 0))
    y = jax.lax.conv_general_dilated(
        x_nhwc, w_hwio, window_strides=(1, 1), padding="SAME",
        dimension_numbers=("NHWC", "HWIO", "NHWC"))
    y = y + bias[None, None, None, :]
    mean = jnp.mean(y, axis=(0, 1, 2), keepdims=True)
    var = jnp.mean((y - mean) ** 2, axis=(0, 1, 2), keepdims=True)
    y = (y - mean) * jax.lax.rsqrt(var + BN_EPS)
    y = y * gamma[None, None, None, :] + beta[None, None, None, :]
    return jnp.maximum(y, 0.0)


def double_conv_reference(x_nchw, params):
    x = jnp.transpose(x_nchw, (0, 2, 3, 1))
    x = _ref_block(x, params["w1"], params["b1"], params["gamma1"], params["beta1"])
    x = _ref_block(x, params["w2"], params["b2"], params["gamma2"], params["beta2"])
    return jnp.transpose(x, (0, 3, 1, 2))


# ----------------------------------- main --------------------------------------

if __name__ == "__main__":
    B, Cin, Cout, H, W = 2, 4, 8, 16, 16

    key = jax.random.PRNGKey(0)
    k_x, k_w1, k_b1, k_w2, k_b2 = jax.random.split(key, 5)

    x = jax.random.normal(k_x, (B, Cin, H, W), dtype=jnp.float32)

    params = {
        "w1": jax.random.normal(k_w1, (Cout, Cin, 3, 3), jnp.float32) * 0.1,
        "b1": jax.random.normal(k_b1, (Cout,), jnp.float32) * 0.1,
        "gamma1": jnp.ones((Cout,), jnp.float32),
        "beta1": jnp.zeros((Cout,), jnp.float32),
        "w2": jax.random.normal(k_w2, (Cout, Cout, 3, 3), jnp.float32) * 0.1,
        "b2": jax.random.normal(k_b2, (Cout,), jnp.float32) * 0.1,
        "gamma2": jnp.ones((Cout,), jnp.float32),
        "beta2": jnp.zeros((Cout,), jnp.float32),
    }

    out = jax.jit(double_conv_forward)(x, params)
    out = jax.block_until_ready(out)

    ref = jax.block_until_ready(double_conv_reference(x, params))
    assert out.shape == (B, Cout, H, W), out.shape
    # bf16 MXU path (f32 accumulation / BN math) -> loosened tolerance vs f32 ref.
    max_err = float(jnp.max(jnp.abs(out - ref)))
    assert jnp.allclose(out, ref, atol=1e-1, rtol=1e-1), max_err

    print("KERNEL_OK")
</pallas_src>

<mosaic_0001>
module attributes {stable_mosaic.version = 11 : i64} {
  func.func @_bn_relu_kernel(%arg0: i32, %arg1: memref<256x128xf32, #tpu.memory_space<vmem>>, %arg2: memref<2x128xf32, #tpu.memory_space<vmem>>, %arg3: memref<256x128xbf16, #tpu.memory_space<vmem>>) attributes {dimension_semantics = [#tpu.dimension_semantics<parallel>], iteration_bounds = array<i64: 2>, scalar_prefetch = 0 : i64, scratch_operands = 0 : i64, tpu.core_type = #tpu.core_type<tc>, window_params = [{transform_indices = @transform_0, window_bounds = array<i64: 256, 128>}, {pipeline_mode = #tpu.pipeline_mode<synchronous>, transform_indices = @transform_1, window_bounds = array<i64: 2, 128>}, {transform_indices = @transform_2, window_bounds = array<i64: 256, 128>}]} {
    %c0 = arith.constant 0 : index
    %c0_0 = arith.constant 0 : index
    %0 = vector.load %arg2[%c0, %c0_0] : memref<2x128xf32, #tpu.memory_space<vmem>>, vector<1x128xf32>
    %c1 = arith.constant 1 : index
    %c0_1 = arith.constant 0 : index
    %1 = vector.load %arg2[%c1, %c0_1] : memref<2x128xf32, #tpu.memory_space<vmem>>, vector<1x128xf32>
    %c0_2 = arith.constant 0 : index
    %c0_3 = arith.constant 0 : index
    %2 = vector.load %arg1[%c0_2, %c0_3] : memref<256x128xf32, #tpu.memory_space<vmem>>, vector<256x128xf32>
    %3 = vector.broadcast %0 : vector<1x128xf32> to vector<256x128xf32>
    %4 = arith.mulf %2, %3 : vector<256x128xf32>
    %5 = vector.broadcast %1 : vector<1x128xf32> to vector<256x128xf32>
    %6 = arith.addf %4, %5 : vector<256x128xf32>
    %cst = arith.constant 0.000000e+00 : f32
    %7 = vector.broadcast %cst : f32 to vector<256x128xf32>
    %8 = arith.maximumf %6, %7 : vector<256x128xf32>
    %9 = arith.truncf %8 : vector<256x128xf32> to vector<256x128xbf16>
    %c0_4 = arith.constant 0 : index
    %c0_5 = arith.constant 0 : index
    %10 = vector.load %arg3[%c0_4, %c0_5] : memref<256x128xbf16, #tpu.memory_space<vmem>>, vector<256x128xbf16>
    tpu.vector_store %arg3[%c0_4, %c0_5], %9 {strides = array<i32>} : memref<256x128xbf16, #tpu.memory_space<vmem>>, vector<256x128xbf16>,
    return
  }
  func.func @transform_0(%arg0: i32) -> (i32, i32) {
    %c0_i32 = arith.constant 0 : i32
    %c0_i32_0 = arith.constant 0 : i32
    return %arg0, %c0_i32 : i32, i32
  }
  func.func @transform_1(%arg0: i32) -> (i32, i32) {
    %c0_i32 = arith.constant 0 : i32
    %c0_i32_0 = arith.constant 0 : i32
    %c0_i32_1 = arith.constant 0 : i32
    return %c0_i32, %c0_i32_0 : i32, i32
  }
  func.func @transform_2(%arg0: i32) -> (i32, i32) {
    %c0_i32 = arith.constant 0 : i32
    %c0_i32_0 = arith.constant 0 : i32
    return %arg0, %c0_i32 : i32, i32
  }
}

module attributes {stable_mosaic.version = 11 : i64} {
  func.func @_conv_stats_kernel(%arg0: i32, %arg1: memref<1x18x18x128xbf16, #tpu.memory_space<vmem>>, %arg2: memref<9x128x128xbf16, #tpu.memory_space<vmem>>, %arg3: memref<1x128xf32, #tpu.memory_space<vmem>>, %arg4: memref<1x128xf32, #tpu.memory_space<vmem>>, %arg5: memref<256x128xf32, #tpu.memory_space<vmem>>, %arg6: memref<2x128xf32, #tpu.memory_space<vmem>>, %arg7: memref<256x128xf32, #tpu.memory_space<vmem>>) attributes {dimension_semantics = [#tpu.dimension_semantics<arbitrary>], iteration_bounds = array<i64: 2>, scalar_prefetch = 0 : i64, scratch_operands = 1 : i64, tpu.core_type = #tpu.core_type<tc>, window_params = [{transform_indices = @transform_0, window_bounds = array<i64: 1, 18, 18, 128>}, {pipeline_mode = #tpu.pipeline_mode<synchronous>, transform_indices = @transform_1, window_bounds = array<i64: 9, 128, 128>}, {pipeline_mode = #tpu.pipeline_mode<synchronous>, transform_indices = @transform_2, window_bounds = array<i64: 1, 128>}, {pipeline_mode = #tpu.pipeline_mode<synchronous>, transform_indices = @transform_3, window_bounds = array<i64: 1, 128>}, {transform_indices = @transform_4, window_bounds = array<i64: 256, 128>}, {pipeline_mode = #tpu.pipeline_mode<synchronous>, transform_indices = @transform_5, window_bounds = array<i64: 2, 128>}]} {
    %c0_i32 = arith.constant 0 : i32
    %0 = arith.cmpi eq, %arg0, %c0_i32 : i32
    %1 = arith.extui %0 : i1 to i32
    %c0_i32_0 = arith.constant 0 : i32
    %2 = arith.cmpi ne, %1, %c0_i32_0 : i32
    scf.if %2 {
      %cst_117 = arith.constant 0.000000e+00 : f32
      %102 = vector.broadcast %cst_117 : f32 to vector<2x128xf32>
      %c0_118 = arith.constant 0 : index
      %c0_119 = arith.constant 0 : index
      %103 = vector.load %arg6[%c0_118, %c0_119] : memref<2x128xf32, #tpu.memory_space<vmem>>, vector<2x128xf32>
      tpu.vector_store %arg6[%c0_118, %c0_119], %102 {strides = array<i32>} : memref<2x128xf32, #tpu.memory_space<vmem>>, vector<2x128xf32>,
    } else {
    }
    %cst = arith.constant 0.000000e+00 : f32
    %3 = vector.broadcast %cst : f32 to vector<256x128xf32>
    %c0 = arith.constant 0 : index
    %c0_1 = arith.constant 0 : index
    %4 = vector.load %arg7[%c0, %c0_1] : memref<256x128xf32, #tpu.memory_space<vmem>>, vector<256x128xf32>
    tpu.vector_store %arg7[%c0, %c0_1], %3 {strides = array<i32>} : memref<256x128xf32, #tpu.memory_space<vmem>>, vector<256x128xf32>,
    %c0_2 = arith.constant 0 : index
    %c0_3 = arith.constant 0 : index
    %c0_4 = arith.constant 0 : index
    %c0_5 = arith.constant 0 : index
    %5 = vector.load %arg1[%c0_2, %c0_3, %c0_4, %c0_5] : memref<1x18x18x128xbf16, #tpu.memory_space<vmem>>, vector<1x16x16x128xbf16>
    %6 = vector.shape_cast %5 : vector<1x16x16x128xbf16> to vector<16x16x128xbf16>
    %7 = vector.shape_cast %6 : vector<16x16x128xbf16> to vector<256x128xbf16>
    %c0_6 = arith.constant 0 : index
    %c0_7 = arith.constant 0 : index
    %8 = vector.load %arg7[%c0_6, %c0_7] : memref<256x128xf32, #tpu.memory_space<vmem>>, vector<256x128xf32>
    %c0_8 = arith.constant 0 : index
    %c0_9 = arith.constant 0 : index
    %c0_10 = arith.constant 0 : index
    %9 = vector.load %arg2[%c0_8, %c0_9, %c0_10] : memref<9x128x128xbf16, #tpu.memory_space<vmem>>, vector<1x128x128xbf16>
    %10 = vector.shape_cast %9 : vector<1x128x128xbf16> to vector<128x128xbf16>
    %cst_11 = arith.constant dense<0.000000e+00> : vector<256x128xf32>
    %11 = tpu.matmul %7, %10, %cst_11 {dimension_numbers = #tpu.dot_dimension_numbers<[1], [0], [0], [1], [0, 0, 1, 1], [], []>} : vector<256x128xbf16>, vector<128x128xbf16>, vector<256x128xf32> -> vector<256x128xf32>
    %12 = arith.addf %8, %11 : vector<256x128xf32>
    %c0_12 = arith.constant 0 : index
    %c0_13 = arith.constant 0 : index
    %13 = vector.load %arg7[%c0_12, %c0_13] : memref<256x128xf32, #tpu.memory_space<vmem>>, vector<256x128xf32>
    tpu.vector_store %arg7[%c0_12, %c0_13], %12 {strides = array<i32>} : memref<256x128xf32, #tpu.memory_space<vmem>>, vector<256x128xf32>,
    %c0_14 = arith.constant 0 : index
    %c0_15 = arith.constant 0 : index
    %c1 = arith.constant 1 : index
    %c0_16 = arith.constant 0 : index
    %14 = vector.load %arg1[%c0_14, %c0_15, %c1, %c0_16] : memref<1x18x18x128xbf16, #tpu.memory_space<vmem>>, vector<1x16x16x128xbf16>
    %15 = vector.shape_cast %14 : vector<1x16x16x128xbf16> to vector<16x16x128xbf16>
    %16 = vector.shape_cast %15 : vector<16x16x128xbf16> to vector<256x128xbf16>
    %c0_17 = arith.constant 0 : index
    %c0_18 = arith.constant 0 : index
    %17 = vector.load %arg7[%c0_17, %c0_18] : memref<256x128xf32, #tpu.memory_space<vmem>>, vector<256x128xf32>
    %c1_19 = arith.constant 1 : index
    %c0_20 = arith.constant 0 : index
    %c0_21 = arith.constant 0 : index
    %18 = vector.load %arg2[%c1_19, %c0_20, %c0_21] : memref<9x128x128xbf16, #tpu.memory_space<vmem>>, vector<1x128x128xbf16>
    %19 = vector.shape_cast %18 : vector<1x128x128xbf16> to vector<128x128xbf16>
    %cst_22 = arith.constant dense<0.000000e+00> : vector<256x128xf32>
    %20 = tpu.matmul %16, %19, %cst_22 {dimension_numbers = #tpu.dot_dimension_numbers<[1], [0], [0], [1], [0, 0, 1, 1], [], []>} : vector<256x128xbf16>, vector<128x128xbf16>, vector<256x128xf32> -> vector<256x128xf32>
    %21 = arith.addf %17, %20 : vector<256x128xf32>
    %c0_23 = arith.constant 0 : index
    %c0_24 = arith.constant 0 : index
    %22 = vector.load %arg7[%c0_23, %c0_24] : memref<256x128xf32, #tpu.memory_space<vmem>>, vector<256x128xf32>
    tpu.vector_store %arg7[%c0_23, %c0_24], %21 {strides = array<i32>} : memref<256x128xf32, #tpu.memory_space<vmem>>, vector<256x128xf32>,
    %c0_25 = arith.constant 0 : index
    %c0_26 = arith.constant 0 : index
    %c2 = arith.constant 2 : index
    %c0_27 = arith.constant 0 : index
    %23 = vector.load %arg1[%c0_25, %c0_26, %c2, %c0_27] : memref<1x18x18x128xbf16, #tpu.memory_space<vmem>>, vector<1x16x16x128xbf16>
    %24 = vector.shape_cast %23 : vector<1x16x16x128xbf16> to vector<16x16x128xbf16>
    %25 = vector.shape_cast %24 : vector<16x16x128xbf16> to vector<256x128xbf16>
    %c0_28 = arith.constant 0 : index
    %c0_29 = arith.constant 0 : index
    %26 = vector.load %arg7[%c0_28, %c0_29] : memref<256x128xf32, #tpu.memory_space<vmem>>, vector<256x128xf32>
    %c2_30 = arith.constant 2 : index
    %c0_31 = arith.constant 0 : index
    %c0_32 = arith.constant 0 : index
    %27 = vector.load %arg2[%c2_30, %c0_31, %c0_32] : memref<9x128x128xbf16, #tpu.memory_space<vmem>>, vector<1x128x128xbf16>
    %28 = vector.shape_cast %27 : vector<1x128x128xbf16> to vector<128x128xbf16>
    %cst_33 = arith.constant dense<0.000000e+00> : vector<256x128xf32>
    %29 = tpu.matmul %25, %28, %cst_33 {dimension_numbers = #tpu.dot_dimension_numbers<[1], [0], [0], [1], [0, 0, 1, 1], [], []>} : vector<256x128xbf16>, vector<128x128xbf16>, vector<256x128xf32> -> vector<256x128xf32>
    %30 = arith.addf %26, %29 : vector<256x128xf32>
    %c0_34 = arith.constant 0 : index
    %c0_35 = arith.constant 0 : index
    %31 = vector.load %arg7[%c0_34, %c0_35] : memref<256x128xf32, #tpu.memory_space<vmem>>, vector<256x128xf32>
    tpu.vector_store %arg7[%c0_34, %c0_35], %30 {strides = array<i32>} : memref<256x128xf32, #tpu.memory_space<vmem>>, vector<256x128xf32>,
    %c0_36 = arith.constant 0 : index
    %c1_37 = arith.constant 1 : index
    %c0_38 = arith.constant 0 : index
    %c0_39 = arith.constant 0 : index
    %32 = vector.load %arg1[%c0_36, %c1_37, %c0_38, %c0_39] : memref<1x18x18x128xbf16, #tpu.memory_space<vmem>>, vector<1x16x16x128xbf16>
    %33 = vector.shape_cast %32 : vector<1x16x16x128xbf16> to vector<16x16x128xbf16>
    %34 = vector.shape_cast %33 : vector<16x16x128xbf16> to vector<256x128xbf16>
    %c0_40 = arith.constant 0 : index
    %c0_41 = arith.constant 0 : index
    %35 = vector.load %arg7[%c0_40, %c0_41] : memref<256x128xf32, #tpu.memory_space<vmem>>, vector<256x128xf32>
    %c3 = arith.constant 3 : index
    %c0_42 = arith.constant 0 : index
    %c0_43 = arith.constant 0 : index
    %36 = vector.load %arg2[%c3, %c0_42, %c0_43] : memref<9x128x128xbf16, #tpu.memory_space<vmem>>, vector<1x128x128xbf16>
    %37 = vector.shape_cast %36 : vector<1x128x128xbf16> to vector<128x128xbf16>
    %cst_44 = arith.constant dense<0.000000e+00> : vector<256x128xf32>
    %38 = tpu.matmul %34, %37, %cst_44 {dimension_numbers = #tpu.dot_dimension_numbers<[1], [0], [0], [1], [0, 0, 1, 1], [], []>} : vector<256x128xbf16>, vector<128x128xbf16>, vector<256x128xf32> -> vector<256x128xf32>
    %39 = arith.addf %35, %38 : vector<256x128xf32>
    %c0_45 = arith.constant 0 : index
    %c0_46 = arith.constant 0 : index
    %40 = vector.load %arg7[%c0_45, %c0_46] : memref<256x128xf32, #tpu.memory_space<vmem>>, vector<256x128xf32>
    tpu.vector_store %arg7[%c0_45, %c0_46], %39 {strides = array<i32>} : memref<256x128xf32, #tpu.memory_space<vmem>>, vector<256x128xf32>,
    %c0_47 = arith.constant 0 : index
    %c1_48 = arith.constant 1 : index
    %c1_49 = arith.constant 1 : index
    %c0_50 = arith.constant 0 : index
    %41 = vector.load %arg1[%c0_47, %c1_48, %c1_49, %c0_50] : memref<1x18x18x128xbf16, #tpu.memory_space<vmem>>, vector<1x16x16x128xbf16>
    %42 = vector.shape_cast %41 : vector<1x16x16x128xbf16> to vector<16x16x128xbf16>
    %43 = vector.shape_cast %42 : vector<16x16x128xbf16> to vector<256x128xbf16>
    %c0_51 = arith.constant 0 : index
    %c0_52 = arith.constant 0 : index
    %44 = vector.load %arg7[%c0_51, %c0_52] : memref<256x128xf32, #tpu.memory_space<vmem>>, vector<256x128xf32>
    %c4 = arith.constant 4 : index
    %c0_53 = arith.constant 0 : index
    %c0_54 = arith.constant 0 : index
    %45 = vector.load %arg2[%c4, %c0_53, %c0_54] : memref<9x128x128xbf16, #tpu.memory_space<vmem>>, vector<1x128x128xbf16>
    %46 = vector.shape_cast %45 : vector<1x128x128xbf16> to vector<128x128xbf16>
    %cst_55 = arith.constant dense<0.000000e+00> : vector<256x128xf32>
    %47 = tpu.matmul %43, %46, %cst_55 {dimension_numbers = #tpu.dot_dimension_numbers<[1], [0], [0], [1], [0, 0, 1, 1], [], []>} : vector<256x128xbf16>, vector<128x128xbf16>, vector<256x128xf32> -> vector<256x128xf32>
    %48 = arith.addf %44, %47 : vector<256x128xf32>
    %c0_56 = arith.constant 0 : index
    %c0_57 = arith.constant 0 : index
    %49 = vector.load %arg7[%c0_56, %c0_57] : memref<256x128xf32, #tpu.memory_space<vmem>>, vector<256x128xf32>
    tpu.vector_store %arg7[%c0_56, %c0_57], %48 {strides = array<i32>} : memref<256x128xf32, #tpu.memory_space<vmem>>, vector<256x128xf32>,
    %c0_58 = arith.constant 0 : index
    %c1_59 = arith.constant 1 : index
    %c2_60 = arith.constant 2 : index
    %c0_61 = arith.constant 0 : index
    %50 = vector.load %arg1[%c0_58, %c1_59, %c2_60, %c0_61] : memref<1x18x18x128xbf16, #tpu.memory_space<vmem>>, vector<1x16x16x128xbf16>
    %51 = vector.shape_cast %50 : vector<1x16x16x128xbf16> to vector<16x16x128xbf16>
    %52 = vector.shape_cast %51 : vector<16x16x128xbf16> to vector<256x128xbf16>
    %c0_62 = arith.constant 0 : index
    %c0_63 = arith.constant 0 : index
    %53 = vector.load %arg7[%c0_62, %c0_63] : memref<256x128xf32, #tpu.memory_space<vmem>>, vector<256x128xf32>
    %c5 = arith.constant 5 : index
    %c0_64 = arith.constant 0 : index
    %c0_65 = arith.constant 0 : index
    %54 = vector.load %arg2[%c5, %c0_64, %c0_65] : memref<9x128x128xbf16, #tpu.memory_space<vmem>>, vector<1x128x128xbf16>
    %55 = vector.shape_cast %54 : vector<1x128x128xbf16> to vector<128x128xbf16>
    %cst_66 = arith.constant dense<0.000000e+00> : vector<256x128xf32>
    %56 = tpu.matmul %52, %55, %cst_66 {dimension_numbers = #tpu.dot_dimension_numbers<[1], [0], [0], [1], [0, 0, 1, 1], [], []>} : vector<256x128xbf16>, vector<128x128xbf16>, vector<256x128xf32> -> vector<256x128xf32>
    %57 = arith.addf %53, %56 : vector<256x128xf32>
    %c0_67 = arith.constant 0 : index
    %c0_68 = arith.constant 0 : index
    %58 = vector.load %arg7[%c0_67, %c0_68] : memref<256x128xf32, #tpu.memory_space<vmem>>, vector<256x128xf32>
    tpu.vector_store %arg7[%c0_67, %c0_68], %57 {strides = array<i32>} : memref<256x128xf32, #tpu.memory_space<vmem>>, vector<256x128xf32>,
    %c0_69 = arith.constant 0 : index
    %c2_70 = arith.constant 2 : index
    %c0_71 = arith.constant 0 : index
    %c0_72 = arith.constant 0 : index
    %59 = vector.load %arg1[%c0_69, %c2_70, %c0_71, %c0_72] : memref<1x18x18x128xbf16, #tpu.memory_space<vmem>>, vector<1x16x16x128xbf16>
    %60 = vector.shape_cast %59 : vector<1x16x16x128xbf16> to vector<16x16x128xbf16>
    %61 = vector.shape_cast %60 : vector<16x16x128xbf16> to vector<256x128xbf16>
    %c0_73 = arith.constant 0 : index
    %c0_74 = arith.constant 0 : index
    %62 = vector.load %arg7[%c0_73, %c0_74] : memref<256x128xf32, #tpu.memory_space<vmem>>, vector<256x128xf32>
    %c6 = arith.constant 6 : index
    %c0_75 = arith.constant 0 : index
    %c0_76 = arith.constant 0 : index
    %63 = vector.load %arg2[%c6, %c0_75, %c0_76] : memref<9x128x128xbf16, #tpu.memory_space<vmem>>, vector<1x128x128xbf16>
    %64 = vector.shape_cast %63 : vector<1x128x128xbf16> to vector<128x128xbf16>
    %cst_77 = arith.constant dense<0.000000e+00> : vector<256x128xf32>
    %65 = tpu.matmul %61, %64, %cst_77 {dimension_numbers = #tpu.dot_dimension_numbers<[1], [0], [0], [1], [0, 0, 1, 1], [], []>} : vector<256x128xbf16>, vector<128x128xbf16>, vector<256x128xf32> -> vector<256x128xf32>
    %66 = arith.addf %62, %65 : vector<256x128xf32>
    %c0_78 = arith.constant 0 : index
    %c0_79 = arith.constant 0 : index
    %67 = vector.load %arg7[%c0_78, %c0_79] : memref<256x128xf32, #tpu.memory_space<vmem>>, vector<256x128xf32>
    tpu.vector_store %arg7[%c0_78, %c0_79], %66 {strides = array<i32>} : memref<256x128xf32, #tpu.memory_space<vmem>>, vector<256x128xf32>,
    %c0_80 = arith.constant 0 : index
    %c2_81 = arith.constant 2 : index
    %c1_82 = arith.constant 1 : index
    %c0_83 = arith.constant 0 : index
    %68 = vector.load %arg1[%c0_80, %c2_81, %c1_82, %c0_83] : memref<1x18x18x128xbf16, #tpu.memory_space<vmem>>, vector<1x16x16x128xbf16>
    %69 = vector.shape_cast %68 : vector<1x16x16x128xbf16> to vector<16x16x128xbf16>
    %70 = vector.shape_cast %69 : vector<16x16x128xbf16> to vector<256x128xbf16>
    %c0_84 = arith.constant 0 : index
    %c0_85 = arith.constant 0 : index
    %71 = vector.load %arg7[%c0_84, %c0_85] : memref<256x128xf32, #tpu.memory_space<vmem>>, vector<256x128xf32>
    %c7 = arith.constant 7 : index
    %c0_86 = arith.constant 0 : index
    %c0_87 = arith.constant 0 : index
    %72 = vector.load %arg2[%c7, %c0_86, %c0_87] : memref<9x128x128xbf16, #tpu.memory_space<vmem>>, vector<1x128x128xbf16>
    %73 = vector.shape_cast %72 : vector<1x128x128xbf16> to vector<128x128xbf16>
    %cst_88 = arith.constant dense<0.000000e+00> : vector<256x128xf32>
    %74 = tpu.matmul %70, %73, %cst_88 {dimension_numbers = #tpu.dot_dimension_numbers<[1], [0], [0], [1], [0, 0, 1, 1], [], []>} : vector<256x128xbf16>, vector<128x128xbf16>, vector<256x128xf32> -> vector<256x128xf32>
    %75 = arith.addf %71, %74 : vector<256x128xf32>
    %c0_89 = arith.constant 0 : index
    %c0_90 = arith.constant 0 : index
    %76 = vector.load %arg7[%c0_89, %c0_90] : memref<256x128xf32, #tpu.memory_space<vmem>>, vector<256x128xf32>
    tpu.vector_store %arg7[%c0_89, %c0_90], %75 {strides = array<i32>} : memref<256x128xf32, #tpu.memory_space<vmem>>, vector<256x128xf32>,
    %c0_91 = arith.constant 0 : index
    %c2_92 = arith.constant 2 : index
    %c2_93 = arith.constant 2 : index
    %c0_94 = arith.constant 0 : index
    %77 = vector.load %arg1[%c0_91, %c2_92, %c2_93, %c0_94] : memref<1x18x18x128xbf16, #tpu.memory_space<vmem>>, vector<1x16x16x128xbf16>
    %78 = vector.shape_cast %77 : vector<1x16x16x128xbf16> to vector<16x16x128xbf16>
    %79 = vector.shape_cast %78 : vector<16x16x128xbf16> to vector<256x128xbf16>
    %c0_95 = arith.constant 0 : index
    %c0_96 = arith.constant 0 : index
    %80 = vector.load %arg7[%c0_95, %c0_96] : memref<256x128xf32, #tpu.memory_space<vmem>>, vector<256x128xf32>
    %c8 = arith.constant 8 : index
    %c0_97 = arith.constant 0 : index
    %c0_98 = arith.constant 0 : index
    %81 = vector.load %arg2[%c8, %c0_97, %c0_98] : memref<9x128x128xbf16, #tpu.memory_space<vmem>>, vector<1x128x128xbf16>
    %82 = vector.shape_cast %81 : vector<1x128x128xbf16> to vector<128x128xbf16>
    %cst_99 = arith.constant dense<0.000000e+00> : vector<256x128xf32>
    %83 = tpu.matmul %79, %82, %cst_99 {dimension_numbers = #tpu.dot_dimension_numbers<[1], [0], [0], [1], [0, 0, 1, 1], [], []>} : vector<256x128xbf16>, vector<128x128xbf16>, vector<256x128xf32> -> vector<256x128xf32>
    %84 = arith.addf %80, %83 : vector<256x128xf32>
    %c0_100 = arith.constant 0 : index
    %c0_101 = arith.constant 0 : index
    %85 = vector.load %arg7[%c0_100, %c0_101] : memref<256x128xf32, #tpu.memory_space<vmem>>, vector<256x128xf32>
    tpu.vector_store %arg7[%c0_100, %c0_101], %84 {strides = array<i32>} : memref<256x128xf32, #tpu.memory_space<vmem>>, vector<256x128xf32>,
    %c0_102 = arith.constant 0 : index
    %c0_103 = arith.constant 0 : index
    %86 = vector.load %arg7[%c0_102, %c0_103] : memref<256x128xf32, #tpu.memory_space<vmem>>, vector<256x128xf32>
    %c0_104 = arith.constant 0 : index
    %c0_105 = arith.constant 0 : index
    %87 = vector.load %arg5[%c0_104, %c0_105] : memref<256x128xf32, #tpu.memory_space<vmem>>, vector<256x128xf32>
    tpu.vector_store %arg5[%c0_104, %c0_105], %86 {strides = array<i32>} : memref<256x128xf32, #tpu.memory_space<vmem>>, vector<256x128xf32>,
    %c0_106 = arith.constant 0 : index
    %c0_107 = arith.constant 0 : index
    %88 = vector.load %arg6[%c0_106, %c0_107] : memref<2x128xf32, #tpu.memory_space<vmem>>, vector<1x128xf32>
    %cst_108 = arith.constant dense<0.000000e+00> : vector<128xf32>
    %89 = vector.multi_reduction <add>, %86, %cst_108 [0] : vector<256x128xf32> to vector<128xf32>
    %90 = vector.shape_cast %89 : vector<128xf32> to vector<1x128xf32>
    %91 = arith.addf %88, %90 : vector<1x128xf32>
    %c0_109 = arith.constant 0 : index
    %c0_110 = arith.constant 0 : index
    %92 = vector.load %arg6[%c0_109, %c0_110] : memref<2x128xf32, #tpu.memory_space<vmem>>, vector<1x128xf32>
    tpu.vector_store %arg6[%c0_109, %c0_110], %91 {strides = array<i32>} : memref<2x128xf32, #tpu.memory_space<vmem>>, vector<1x128xf32>,
    %c1_111 = arith.constant 1 : index
    %c0_112 = arith.constant 0 : index
    %93 = vector.load %arg6[%c1_111, %c0_112] : memref<2x128xf32, #tpu.memory_space<vmem>>, vector<1x128xf32>
    %94 = arith.mulf %86, %86 : vector<256x128xf32>
    %cst_113 = arith.constant dense<0.000000e+00> : vector<128xf32>
    %95 = vector.multi_reduction <add>, %94, %cst_113 [0] : vector<256x128xf32> to vector<128xf32>
    %96 = vector.shape_cast %95 : vector<128xf32> to vector<1x128xf32>
    %97 = arith.addf %93, %96 : vector<1x128xf32>
    %c1_114 = arith.constant 1 : index
    %c0_115 = arith.constant 0 : index
    %98 = vector.load %arg6[%c1_114, %c0_115] : memref<2x128xf32, #tpu.memory_space<vmem>>, vector<1x128xf32>
    tpu.vector_store %arg6[%c1_114, %c0_115], %97 {strides = array<i32>} : memref<2x128xf32, #tpu.memory_space<vmem>>, vector<1x128xf32>,
    %c1_i32 = arith.constant 1 : i32
    %99 = arith.cmpi eq, %arg0, %c1_i32 : i32
    %100 = arith.extui %99 : i1 to i32
    %c0_i32_116 = arith.constant 0 : i32
    %101 = arith.cmpi ne, %100, %c0_i32_116 : i32
    scf.if %101 {
      %c0_117 = arith.constant 0 : index
      %c0_118 = arith.constant 0 : index
      %102 = vector.load %arg6[%c0_117, %c0_118] : memref<2x128xf32, #tpu.memory_space<vmem>>, vector<1x128xf32>
      %cst_119 = arith.constant 0.001953125 : f32
      %103 = vector.broadcast %cst_119 : f32 to vector<1x128xf32>
      %104 = arith.mulf %102, %103 : vector<1x128xf32>
      %c1_120 = arith.constant 1 : index
      %c0_121 = arith.constant 0 : index
      %105 = vector.load %arg6[%c1_120, %c0_121] : memref<2x128xf32, #tpu.memory_space<vmem>>, vector<1x128xf32>
      %cst_122 = arith.constant 0.001953125 : f32
      %106 = vector.broadcast %cst_122 : f32 to vector<1x128xf32>
      %107 = arith.mulf %105, %106 : vector<1x128xf32>
      %108 = arith.mulf %104, %104 : vector<1x128xf32>
      %109 = arith.subf %107, %108 : vector<1x128xf32>
      %cst_123 = arith.constant 0.000000e+00 : f32
      %110 = vector.broadcast %cst_123 : f32 to vector<1x128xf32>
      %111 = arith.maximumf %109, %110 : vector<1x128xf32>
      %c0_124 = arith.constant 0 : index
      %c0_125 = arith.constant 0 : index
      %112 = vector.load %arg3[%c0_124, %c0_125] : memref<1x128xf32, #tpu.memory_space<vmem>>, vector<1x128xf32>
      %cst_126 = arith.constant 9.99999974E-6 : f32
      %113 = vector.broadcast %cst_126 : f32 to vector<1x128xf32>
      %114 = arith.addf %111, %113 : vector<1x128xf32>
      %115 = math.rsqrt %114 : vector<1x128xf32>
      %116 = arith.mulf %112, %115 : vector<1x128xf32>
      %c0_127 = arith.constant 0 : index
      %c0_128 = arith.constant 0 : index
      %117 = vector.load %arg4[%c0_127, %c0_128] : memref<1x128xf32, #tpu.memory_space<vmem>>, vector<1x128xf32>
      %118 = arith.mulf %104, %116 : vector<1x128xf32>
      %119 = arith.subf %117, %118 : vector<1x128xf32>
      %c0_129 = arith.constant 0 : index
      %c0_130 = arith.constant 0 : index
      %120 = vector.load %arg6[%c0_129, %c0_130] : memref<2x128xf32, #tpu.memory_space<vmem>>, vector<1x128xf32>
      tpu.vector_store %arg6[%c0_129, %c0_130], %116 {strides = array<i32>} : memref<2x128xf32, #tpu.memory_space<vmem>>, vector<1x128xf32>,
      %c1_131 = arith.constant 1 : index
      %c0_132 = arith.constant 0 : index
      %121 = vector.load %arg6[%c1_131, %c0_132] : memref<2x128xf32, #tpu.memory_space<vmem>>, vector<1x128xf32>
      tpu.vector_store %arg6[%c1_131, %c0_132], %119 {strides = array<i32>} : memref<2x128xf32, #tpu.memory_space<vmem>>, vector<1x128xf32>,
    } else {
    }
    return
  }
  func.func @transform_0(%arg0: i32) -> (i32, i32, i32, i32) {
    %c0_i32 = arith.constant 0 : i32
    %c0_i32_0 = arith.constant 0 : i32
    %c0_i32_1 = arith.constant 0 : i32
    %c0_i32_2 = arith.constant 0 : i32
    return %arg0, %c0_i32, %c0_i32_0, %c0_i32_1 : i32, i32, i32, i32
  }
  func.func @transform_1(%arg0: i32) -> (i32, i32, i32) {
    %c0_i32 = arith.constant 0 : i32
    %c0_i32_0 = arith.constant 0 : i32
    %c0_i32_1 = arith.constant 0 : i32
    %c0_i32_2 = arith.constant 0 : i32
    return %c0_i32, %c0_i32_0, %c0_i32_1 : i32, i32, i32
  }
  func.func @transform_2(%arg0: i32) -> (i32, i32) {
    %c0_i32 = arith.constant 0 : i32
    %c0_i32_0 = arith.constant 0 : i32
    %c0_i32_1 = arith.constant 0 : i32
    return %c0_i32, %c0_i32_0 : i32, i32
  }
  func.func @transform_3(%arg0: i32) -> (i32, i32) {
    %c0_i32 = arith.constant 0 : i32
    %c0_i32_0 = arith.constant 0 : i32
    %c0_i32_1 = arith.constant 0 : i32
    return %c0_i32, %c0_i32_0 : i32, i32
  }
  func.func @transform_4(%arg0: i32) -> (i32, i32) {
    %c0_i32 = arith.constant 0 : i32
    %c0_i32_0 = arith.constant 0 : i32
    return %arg0, %c0_i32 : i32, i32
  }
  func.func @transform_5(%arg0: i32) -> (i32, i32) {
    %c0_i32 = arith.constant 0 : i32
    %c0_i32_0 = arith.constant 0 : i32
    %c0_i32_1 = arith.constant 0 : i32
    return %c0_i32, %c0_i32_0 : i32, i32
  }
}

module attributes {stable_mosaic.version = 11 : i64} {
  func.func @_bn_relu_kernel(%arg0: i32, %arg1: memref<256x128xf32, #tpu.memory_space<vmem>>, %arg2: memref<2x128xf32, #tpu.memory_space<vmem>>, %arg3: memref<256x128xf32, #tpu.memory_space<vmem>>) attributes {dimension_semantics = [#tpu.dimension_semantics<parallel>], iteration_bounds = array<i64: 2>, scalar_prefetch = 0 : i64, scratch_operands = 0 : i64, tpu.core_type = #tpu.core_type<tc>, window_params = [{transform_indices = @transform_0, window_bounds = array<i64: 256, 128>}, {pipeline_mode = #tpu.pipeline_mode<synchronous>, transform_indices = @transform_1, window_bounds = array<i64: 2, 128>}, {transform_indices = @transform_2, window_bounds = array<i64: 256, 128>}]} {
    %c0 = arith.constant 0 : index
    %c0_0 = arith.constant 0 : index
    %0 = vector.load %arg2[%c0, %c0_0] : memref<2x128xf32, #tpu.memory_space<vmem>>, vector<1x128xf32>
    %c1 = arith.constant 1 : index
    %c0_1 = arith.constant 0 : index
    %1 = vector.load %arg2[%c1, %c0_1] : memref<2x128xf32, #tpu.memory_space<vmem>>, vector<1x128xf32>
    %c0_2 = arith.constant 0 : index
    %c0_3 = arith.constant 0 : index
    %2 = vector.load %arg1[%c0_2, %c0_3] : memref<256x128xf32, #tpu.memory_space<vmem>>, vector<256x128xf32>
    %3 = vector.broadcast %0 : vector<1x128xf32> to vector<256x128xf32>
    %4 = arith.mulf %2, %3 : vector<256x128xf32>
    %5 = vector.broadcast %1 : vector<1x128xf32> to vector<256x128xf32>
    %6 = arith.addf %4, %5 : vector<256x128xf32>
    %cst = arith.constant 0.000000e+00 : f32
    %7 = vector.broadcast %cst : f32 to vector<256x128xf32>
    %8 = arith.maximumf %6, %7 : vector<256x128xf32>
    %c0_4 = arith.constant 0 : index
    %c0_5 = arith.constant 0 : index
    %9 = vector.load %arg3[%c0_4, %c0_5] : memref<256x128xf32, #tpu.memory_space<vmem>>, vector<256x128xf32>
    tpu.vector_store %arg3[%c0_4, %c0_5], %8 {strides = array<i32>} : memref<256x128xf32, #tpu.memory_space<vmem>>, vector<256x128xf32>,
    return
  }
  func.func @transform_0(%arg0: i32) -> (i32, i32) {
    %c0_i32 = arith.constant 0 : i32
    %c0_i32_0 = arith.constant 0 : i32
    return %arg0, %c0_i32 : i32, i32
  }
  func.func @transform_1(%arg0: i32) -> (i32, i32) {
    %c0_i32 = arith.constant 0 : i32
    %c0_i32_0 = arith.constant 0 : i32
    %c0_i32_1 = arith.constant 0 : i32
    return %c0_i32, %c0_i32_0 : i32, i32
  }
  func.func @transform_2(%arg0: i32) -> (i32, i32) {
    %c0_i32 = arith.constant 0 : i32
    %c0_i32_0 = arith.constant 0 : i32
    return %arg0, %c0_i32 : i32, i32
  }
}

</mosaic_0001>

<bundles_post_ra>
// kernel: double_conv_forward.5
= control target key start
LH: loop header
LB: loop body
LE: loop exit
PB: predicated region body
PF: predicated region fallthrough
CT: control target
= control target key end

     0   :  { %7 = vsyncpa [#allocation3], 0  ;;  %s1286_s0 = inlined_call_operand.hbm [shape: f32[512,128], index: 0, kind: input, shape index: {}]   ;;  %s1287_s1 = inlined_call_operand.hbm [shape: f32[2,128], index: 1, kind: input, shape index: {}]   ;;  %s1288_s2 = inlined_call_operand.hbm [shape: bf16[512,128], index: 2, kind: output, shape index: {}]  }
   0x1   :  { %9 = vsyncpa [#allocation3 + $0x1], 0 }
   0x2   :  { %10 = vsyncpa [#allocation6], 0 }
   0x3   :  { %11 = vsyncpa [#allocation4], 0 }
   0x4   :  { %13 = vsyncpa [#allocation4 + $0x1], 0  ;;  %s964_s9 = smov 0   ;;  %s966_s10 = smov 0  }
   0x5   :  { %s968_s11 = smov 0   ;;  %s970_s12 = smov 0  }
   0x6 LB: > { %s985_s13 = sadd.s32 4294967295, %s940_s12   ;;  %s572_s14 = sadd.s32 4294967294, %s940_s12   ;;  %s940_s12 = sphi %s970_s12, %s1313_s12   ;;  %s936_s11 = sphi %s968_s11, %s1312_s11   ;;  %s932_s10 = sphi %s966_s10, %s1311_s10   ;;  %s928_s9 = sphi %s964_s9, %s1310_s9  }
   0x7   : > { %s989_s15 = sadd.s32 1, %s940_s12   ;;  %s26_s16 = sadd.s32 1, %s936_s11 }
   0x8   : > { %s23_s17 = ssub.s32 %s940_s12, %s989_s15  ;;  %p33_p0 = scmp.ne.s32.totalorder %s936_s11, %s932_s10 }
   0x9   : > { %p24_p1 = scmp.eq.s32.totalorder %s23_s17, 0  ;;  %p34_p2 = scmp.eq.s32.totalorder %s940_s12, 0 }
   0xa   : > { %p39_p3 = scmp.ne.s32.totalorder %s932_s10, %s928_s9  ;;  %p1289_p4 = scmp.eq.s32.totalorder %s985_s13, 0 }
   0xb   : > { %s1001_s18 = scalar_select %p24_p1, %s936_s11, %s26_s16  }
   0xc   : > { %p1003_p5 = por %p34_p2, %p33_p0  ;;  %p1009_p6 = por %p1289_p4, %p39_p3 }
   0xd   : > { %p84_p7 = scmp.eq.s32.totalorder %s985_s13, 1  ;;  %p90_p8 = scmp.eq.s32.totalorder %s572_s14, 1 }
   0xe   : > { %s1295_s20 = scalar_select %p1009_p6, 1, 0 }
   0xf   : > { %p573_p9 = scmp.ge.s32.totalorder %s940_s12, 1  ;;  %p97_p10 = scmp.lt.s32.totalorder %s940_s12, 3 }
  0x10   : > { %p1016_p11 = por %p84_p7, %p33_p0  ;;  %p1020_p12 = por %p90_p8, %p39_p3 }
  0x11   : > { %p1024_p13 = pnand %p573_p9, %p97_p10  ;;  %s942_s24 = smov [#allocation5]  }
  0x12   : > { %s1296_s21 = scalar_select %p1016_p11, 1, 0 }
  0x13   : > { %s1297_s22 = scalar_select %p1020_p12, 1, 0 }
  0x14   : > { %s1298_s23 = scalar_select %p1024_p13, 1, 0 }
  0x15   : > { %p759_p2 = pneg %p1024_p13  ;;  %s110_s25 = sshll.u32 %s942_s24, 4  ;;  %s111_s25 = int_to_ptr.vmem [resolvable:$true] %s110_s25 }
  0x16   : > { %p772_p4 = scmp.lt.s32.totalorder %s940_s12, 2  ;;  %p1299_p0 = scmp.eq.s32.totalorder %s985_s13, 0 }
  0x17   : > { %s121_s27 = sand.u32 1, %s936_s11   ;;  %s812_s4 = scalar_lea.hbm %s1287_s1, 32 }
  0x18   : > { %p1034_p7 = pnand %p759_p2, %p1299_p0  ;;  %p1041_p3 = pnand %p772_p4, %p1003_p5 }
  0x19   : > { %s576_s29 = sshll.u32 %s121_s27, 8  ;;  %p813_p8 = scmp.ne.s32.totalorder %s1287_s1, %s812_s4 }
  0x1a   : > { %s1301_s28 = scalar_select %p1041_p3, 1, 0 }
  0x1b   : > { %p814_p9 = pneg %p1034_p7  ;;  %p819_p4 = scmp.lt.u32.totalorder %s812_s4, %s1287_s1 }
  0x1d   : > { %p815_p10 = pnand %p814_p9, %p813_p8 }
  0x1f   : > { %p816_p2 = pneg %p815_p10 }
  0x21   : > { %p821_p5 = pnand %p819_p4, %p816_p2 }
  0x23   : > { %824 = shalt.err (!%p821_p5)
}
  0x24   : > { %s825_s14 = scalar_lea.vmem %s111_s25, 32  ;;  %p833_p11 = scmp.lt.s32.totalorder %s111_s25, %s111_s25 }
  0x25   : > { %p826_p0 = scmp.ne.s32.totalorder %s111_s25, %s825_s14  ;;  %p834_p6 = scmp.lt.s32.totalorder %s825_s14, %s825_s14 }
  0x27   : > { %p828_p1 = pnand %p826_p0, %p814_p9  ;;  %p835_p13 = por %p834_p6, %p833_p11 }
  0x29   : > { %p829_p12 = pneg %p828_p1 }
  0x2b   : > { %p836_p3 = pnand %p835_p13, %p829_p12 }
  0x2d   : > { %839 = shalt.err (!%p836_p3)
}
  0x2e   : > { %762 = dma.hbm_to_vmem [thread:$0]  (!%p1034_p7), %s1287_s1, 32, %s111_s25, [#allocation6]  }
  0x2f   : > { %s622_s19 = sshll.u32 %s940_s12, 12  ;;  %s125_s24 = scalar_lea.vmem [#allocation2], %s576_s29 }
  0x30   : > { %s132_s30 = sshll.u32 %s125_s24, 4  ;;  %s1065_s5 = scalar_lea.hbm %s1286_s0, %s622_s19  ;;  %s1067_s30 = int_to_ptr.vmem [resolvable:$true] %s132_s30 }
  0x31   : > { %s1069_s26 = scalar_lea.sflag [#allocation3], %s121_s27  ;;  %s840_s6 = scalar_lea.hbm %s1065_s5, 4096 }
  0x32   : > { %p841_p6 = scmp.ne.s32.totalorder %s1065_s5, %s840_s6  ;;  %p1302_p11 = scmp.ne.s32.totalorder %s1301_s28, 0 }
  0x33   : > { %s845_s7 = scalar_lea.hbm %s1286_s0, 8192  ;;  %p846_p7 = scmp.lt.u32.totalorder %s1065_s5, %s1286_s0 }
  0x34   : > { %p842_p12 = pneg %p1302_p11  ;;  %p847_p3 = scmp.lt.u32.totalorder %s845_s7, %s840_s6 }
  0x35   : > { %p849_p9 = scmp.lt.u32.totalorder %s840_s6, %s1065_s5 }
  0x36   : > { %p843_p13 = pnand %p842_p12, %p841_p6  ;;  %p848_p8 = por %p847_p3, %p846_p7 }
  0x38   : > { %p844_p1 = pneg %p843_p13  ;;  %p850_p10 = por %p849_p9, %p848_p8 }
  0x3a   : > { %p851_p2 = pnand %p850_p10, %p844_p1 }
  0x3c   : > { %854 = shalt.err (!%p851_p2)
}
  0x3d   : > { %s855_s27 = scalar_lea.vmem %s1067_s30, 4096  ;;  %s943_s16 = smov [#allocation2]  }
  0x3e   : > { %p856_p4 = scmp.ne.s32.totalorder %s1067_s30, %s855_s27  ;;  %s860_s17 = sshll.u32 %s943_s16, 4  ;;  %s861_s17 = int_to_ptr.vmem [resolvable:$false] %s860_s17 }
  0x3f   : > { %s862_s19 = scalar_lea.vmem %s861_s17, 8192  ;;  %p863_p6 = scmp.lt.s32.totalorder %s1067_s30, %s861_s17 }
  0x40   : > { %p858_p5 = pnand %p856_p4, %p842_p12  ;;  %p864_p13 = scmp.lt.s32.totalorder %s862_s19, %s855_s27 }
  0x42   : > { %p859_p0 = pneg %p858_p5  ;;  %p865_p7 = por %p864_p13, %p863_p6 }
  0x44   : > { %p866_p3 = pnand %p865_p7, %p859_p0 }
  0x46   : > { %869 = shalt.err (!%p866_p3)
}
  0x47   : > { %s944_s24 = smov 128   ;;  %s945_s3 = smov 8  }
  0x48   : > { %766 = dma.hbm_to_vmem [thread:$0]  (!%p1302_p11), %s1065_s5, 4096, %s1067_s30, %s1069_s26, %s944_s24, %s944_s24, %s945_s3  }
  0x49   : > { %p1303_p12 = scmp.ne.s32.totalorder %s1298_s23, 0 }
  0x4a   : > { %s1100_s4 = sand.u32 (!%p1303_p12), 1, %s932_s10   ;;  %p1304_p1 = scmp.ne.s32.totalorder (!%p1303_p12), %s1295_s20, 0 }
  0x4b   : > { %144 = sbr.rel (%p1303_p12) target bundleno = 135 (0x87), region = 28  ;;  %s580_s6 = sshll.u32 (!%p1303_p12), %s1100_s4, 8 }
  0x4c   : > { %s147_s25 = scalar_lea.sflag (!%p1303_p12), [#allocation3], %s1100_s4  ;;  %s1104_s29 = scalar_lea.vmem (!%p1303_p12), [#allocation2], %s580_s6 }
  0x52   : > { %915 = dma.done.wait (%p1304_p1), %s147_s25, 4096  }
  0x53   : > { %917 = vsyncadd (%p1304_p1), %s147_s25, 4294963200  ;;  %p1305_p11 = scmp.eq.s32.totalorder %s985_s13, 0 }
  0x55   : > { %919 = dma.done.wait (%p1305_p11), [#allocation6], 32   ;;  %p1306_p8 = pmov %p1305_p11 }
  0x56   : > { %v1114_v0 = vld [vmem:[#allocation5] ss:$0 sm:$0xff]  ;;  %v1116_v1 = vld [vmem:[#allocation5 + $0x1] ss:$0 sm:$0xff]  ;;  %v180_v3 = vld [vmem:[%s1104_s29 + $0x8] sm:$0xff]  ;;  %s582_s20 = sshll.u32 %s1100_s4, 7 }
  0x57   : > { %921 = vsyncadd (%p1306_p8), [#allocation6], 4294967264  ;;  %v179_v2 = vld [vmem:[%s1104_s29] sm:$0xff]  ;;  %v181_v5 = vld [vmem:[%s1104_s29 + $0x10] sm:$0xff]  ;;  %v216_v7 = vmul.f32 %v1114_v0, %v180_v3  ;;  %s1158_s23 = scalar_lea.vmem [#allocation7], %s582_s20  ;;  %s655_s28 = sshll.u32 %s985_s13, 11 }
  0x58   : > { %v215_v4 = vmul.f32 %v1114_v0, %v179_v2  ;;  %v182_v6 = vld [vmem:[%s1104_s29 + $0x18] sm:$0xff]  ;;  %v217_v8 = vmul.f32 %v1114_v0, %v181_v5  ;;  %v183_v10 = vld [vmem:[%s1104_s29 + $0x20] sm:$0xff]  ;;  %v184_v11 = vld [vmem:[%s1104_s29 + $0x28] sm:$0xff]  ;;  %s489_s30 = sshll.u32 %s1158_s23, 4  ;;  %s1238_s7 = scalar_lea.hbm %s1288_s2, %s655_s28  ;;  %s1240_s30 = int_to_ptr.vmem [resolvable:$true] %s489_s30 }
  0x59   : > { %v218_v9 = vmul.f32 %v1114_v0, %v182_v6  ;;  %v185_v12 = vld [vmem:[%s1104_s29 + $0x30] sm:$0xff]  ;;  %v219_v14 = vmul.f32 %v1114_v0, %v183_v10  ;;  %v220_v15 = vmul.f32 %v1114_v0, %v184_v11  ;;  %v186_v16 = vld [vmem:[%s1104_s29 + $0x38] sm:$0xff]  ;;  %v252_v18 = vadd.f32 %v1116_v1, %v216_v7  ;;  %v187_v22 = vld [vmem:[%s1104_s29 + $0x40] sm:$0xff]  ;;  %s476_s13 = scalar_lea.sflag [#allocation4], %s1100_s4  ;;  %s870_s8 = scalar_lea.vmem %s1240_s30, 2048 }
  0x5a   : > { %v251_v13 = vadd.f32 %v1116_v1, %v215_v4  ;;  %v221_v17 = vmul.f32 %v1114_v0, %v185_v12  ;;  %v253_v19 = vadd.f32 %v1116_v1, %v217_v8  ;;  %v222_v21 = vmul.f32 %v1114_v0, %v186_v16  ;;  %v188_v27 = vld [vmem:[%s1104_s29 + $0x48] sm:$0xff]  ;;  %v189_v32 = vld [vmem:[%s1104_s29 + $0x50] sm:$0xff]  ;;  %v190_v33 = vld [vmem:[%s1104_s29 + $0x58] sm:$0xff]  ;;  %p871_p9 = scmp.ne.s32.totalorder %s1240_s30, %s870_s8  ;;  %p1307_p10 = scmp.ne.s32.totalorder %s1296_s21, 0 }
  0x5b   : > { %v254_v20 = vadd.f32 %v1116_v1, %v218_v9  ;;  %v255_v24 = vadd.f32 %v1116_v1, %v219_v14  ;;  %v256_v25 = vadd.f32 %v1116_v1, %v220_v15  ;;  %v284_v28 = vmax.f32 %v252_v18, 0.0  ;;  %v191_v38 = vld [vmem:[%s1104_s29 + $0x60] sm:$0xff]  ;;  %v192_v39 = vld [vmem:[%s1104_s29 + $0x68] sm:$0xff]  ;;  %v193_v44 = vld [vmem:[%s1104_s29 + $0x70] sm:$0xff]  ;;  %s946_s14 = smov [#allocation7]  }
  0x5c   : > { %v283_v23 = vmax.f32 %v251_v13, 0.0  ;;  %v257_v26 = vadd.f32 %v1116_v1, %v221_v17  ;;  %v285_v29 = vmax.f32 %v253_v19, 0.0  ;;  %v258_v31 = vadd.f32 %v1116_v1, %v222_v21  ;;  %v194_v49 = vld [vmem:[%s1104_s29 + $0x78] sm:$0xff]  ;;  %v195_v54 = vld [vmem:[%s1104_s29 + $0x80] sm:$0xff]  ;;  %v196_v63 = vld [vmem:[%s1104_s29 + $0x88] sm:$0xff]  ;;  %p872_p2 = pnand %p871_p9, %p1307_p10  ;;  %s874_s27 = sshll.u32 %s946_s14, 4  ;;  %s875_s27 = int_to_ptr.vmem [resolvable:$false] %s874_s27 }
  0x5d   : > { %v286_v30 = vmax.f32 %v254_v20, 0.0  ;;  %v287_v34 = vmax.f32 %v255_v24, 0.0  ;;  %v288_v35 = vmax.f32 %v256_v25, 0.0  ;;  %v223_v37 = vmul.f32 %v1114_v0, %v187_v22  ;;  %v197_v6 = vld [vmem:[%s1104_s29 + $0x90] sm:$0xff]  ;;  %v198_v7 = vld [vmem:[%s1104_s29 + $0x98] sm:$0xff]  ;;  %v199_v12 = vld [vmem:[%s1104_s29 + $0xa0] sm:$0xff]  ;;  %p877_p5 = scmp.lt.s32.totalorder %s1240_s30, %s875_s27 }
  0x5e   : > { %v289_v36 = vmax.f32 %v257_v26, 0.0  ;;  %v659_v40 = vpack.c.bf16 %v284_v28, %v283_v23  ;;  %v290_v42 = vmax.f32 %v258_v31, 0.0  ;;  %v224_v43 = vmul.f32 %v1114_v0, %v188_v27  ;;  %v200_v13 = vld [vmem:[%s1104_s29 + $0xa8] sm:$0xff]  ;;  %v201_v18 = vld [vmem:[%s1104_s29 + $0xb0] sm:$0xff]  ;;  %v202_v23 = vld [vmem:[%s1104_s29 + $0xb8] sm:$0xff]  ;;  %p873_p4 = pneg %p872_p2  ;;  %s876_s16 = scalar_lea.vmem %s875_s27, 4096 }
  0x5f   : > { %v664_v41 = vpack.c.bf16 %v286_v30, %v285_v29  ;;  %v669_v45 = vpack.c.bf16 %v288_v35, %v287_v34  ;;  %v259_v46 = vadd.f32 %v1116_v1, %v223_v37  ;;  %v225_v47 = vmul.f32 %v1114_v0, %v189_v32  ;;  %v203_v28 = vld [vmem:[%s1104_s29 + $0xc0] sm:$0xff]  ;;  %v204_v37 = vld [vmem:[%s1104_s29 + $0xc8] sm:$0xff]  ;;  %p878_p0 = scmp.lt.s32.totalorder %s876_s16, %s870_s8 }
  0x60   : > { %v226_v48 = vmul.f32 %v1114_v0, %v190_v33  ;;  %660 = vst [vmem:[%s1158_s23] sm:$0xff] %v659_v40   ;;  %v674_v50 = vpack.c.bf16 %v290_v42, %v289_v36  ;;  %v260_v51 = vadd.f32 %v1116_v1, %v224_v43  ;;  %v227_v52 = vmul.f32 %v1114_v0, %v191_v38  ;;  %v205_v42 = vld [vmem:[%s1104_s29 + $0xd0] sm:$0xff]  ;;  %v206_v43 = vld [vmem:[%s1104_s29 + $0xd8] sm:$0xff] }
  0x61   : > { %736 = vst [vmem:[%s1158_s23 + $0x8] sm:$0xff] %v664_v41   ;;  %v228_v53 = vmul.f32 %v1114_v0, %v192_v39  ;;  %737 = vst [vmem:[%s1158_s23 + $0x10] sm:$0xff] %v669_v45   ;;  %v291_v55 = vmax.f32 %v259_v46, 0.0  ;;  %v261_v56 = vadd.f32 %v1116_v1, %v225_v47  ;;  %v229_v58 = vmul.f32 %v1114_v0, %v193_v44  ;;  %p879_p6 = por %p878_p0, %p877_p5 }
  0x62   : > { %v262_v57 = vadd.f32 %v1116_v1, %v226_v48  ;;  %738 = vst [vmem:[%s1158_s23 + $0x18] sm:$0xff] %v674_v50   ;;  %v292_v59 = vmax.f32 %v260_v51, 0.0  ;;  %v263_v60 = vadd.f32 %v1116_v1, %v227_v52  ;;  %v230_v62 = vmul.f32 %v1114_v0, %v194_v49  ;;  %v207_v48 = vld [vmem:[%s1104_s29 + $0xe0] sm:$0xff]  ;;  %v208_v49 = vld [vmem:[%s1104_s29 + $0xe8] sm:$0xff] }
  0x63   : > { %v264_v61 = vadd.f32 %v1116_v1, %v228_v53  ;;  %v293_v2 = vmax.f32 %v261_v56, 0.0  ;;  %v265_v4 = vadd.f32 %v1116_v1, %v229_v58  ;;  %v231_v5 = vmul.f32 %v1114_v0, %v195_v54  ;;  %v209_v54 = vld [vmem:[%s1104_s29 + $0xf0] sm:$0xff]  ;;  %p880_p13 = pnand %p879_p6, %p873_p4 }
  0x64   : > { %v294_v3 = vmax.f32 %v262_v57, 0.0  ;;  %v679_v8 = vpack.c.bf16 %v292_v59, %v291_v55  ;;  %v295_v9 = vmax.f32 %v263_v60, 0.0  ;;  %v266_v11 = vadd.f32 %v1116_v1, %v230_v62  ;;  %v210_v59 = vld [vmem:[%s1104_s29 + $0xf8] sm:$0xff] }
  0x65   : > { %v296_v10 = vmax.f32 %v264_v61, 0.0  ;;  %v297_v15 = vmax.f32 %v265_v4, 0.0  ;;  %v232_v16 = vmul.f32 %v1114_v0, %v196_v63  ;;  %v267_v17 = vadd.f32 %v1116_v1, %v231_v5 }
  0x66   : > { %v684_v14 = vpack.c.bf16 %v294_v3, %v293_v2  ;;  %739 = vst [vmem:[%s1158_s23 + $0x20] sm:$0xff] %v679_v8   ;;  %v298_v20 = vmax.f32 %v266_v11, 0.0  ;;  %v233_v21 = vmul.f32 %v1114_v0, %v197_v6  ;;  %v234_v22 = vmul.f32 %v1114_v0, %v198_v7 }
  0x67   : > { %v689_v19 = vpack.c.bf16 %v296_v10, %v295_v9  ;;  %v268_v24 = vadd.f32 %v1116_v1, %v232_v16  ;;  %v299_v25 = vmax.f32 %v267_v17, 0.0  ;;  %v235_v26 = vmul.f32 %v1114_v0, %v199_v12 }
  0x68   : > { %740 = vst [vmem:[%s1158_s23 + $0x28] sm:$0xff] %v684_v14   ;;  %v236_v27 = vmul.f32 %v1114_v0, %v200_v13  ;;  %v694_v29 = vpack.c.bf16 %v298_v20, %v297_v15  ;;  %v269_v30 = vadd.f32 %v1116_v1, %v233_v21  ;;  %v270_v31 = vadd.f32 %v1116_v1, %v234_v22 }
  0x69   : > { %741 = vst [vmem:[%s1158_s23 + $0x30] sm:$0xff] %v689_v19   ;;  %v237_v32 = vmul.f32 %v1114_v0, %v201_v18  ;;  %v300_v33 = vmax.f32 %v268_v24, 0.0  ;;  %v271_v34 = vadd.f32 %v1116_v1, %v235_v26  ;;  %v238_v36 = vmul.f32 %v1114_v0, %v202_v23 }
  0x6a   : > { %v272_v35 = vadd.f32 %v1116_v1, %v236_v27  ;;  %742 = vst [vmem:[%s1158_s23 + $0x38] sm:$0xff] %v694_v29   ;;  %v301_v38 = vmax.f32 %v269_v30, 0.0  ;;  %v302_v39 = vmax.f32 %v270_v31, 0.0  ;;  %v239_v41 = vmul.f32 %v1114_v0, %v203_v28 }
  0x6b   : > { %v273_v40 = vadd.f32 %v1116_v1, %v237_v32  ;;  %v699_v44 = vpack.c.bf16 %v300_v33, %v299_v25  ;;  %v303_v45 = vmax.f32 %v271_v34, 0.0  ;;  %v274_v47 = vadd.f32 %v1116_v1, %v238_v36 }
  0x6c   : > { %v304_v46 = vmax.f32 %v272_v35, 0.0  ;;  %v704_v50 = vpack.c.bf16 %v302_v39, %v301_v38  ;;  %v240_v52 = vmul.f32 %v1114_v0, %v204_v37  ;;  %v275_v53 = vadd.f32 %v1116_v1, %v239_v41 }
  0x6d   : > { %v305_v51 = vmax.f32 %v273_v40, 0.0  ;;  %743 = vst [vmem:[%s1158_s23 + $0x40] sm:$0xff] %v699_v44   ;;  %v306_v56 = vmax.f32 %v274_v47, 0.0  ;;  %v241_v57 = vmul.f32 %v1114_v0, %v205_v42  ;;  %v242_v58 = vmul.f32 %v1114_v0, %v206_v43 }
  0x6e   : > { %v709_v55 = vpack.c.bf16 %v304_v46, %v303_v45  ;;  %744 = vst [vmem:[%s1158_s23 + $0x48] sm:$0xff] %v704_v50   ;;  %v276_v60 = vadd.f32 %v1116_v1, %v240_v52  ;;  %v307_v61 = vmax.f32 %v275_v53, 0.0  ;;  %v243_v62 = vmul.f32 %v1114_v0, %v207_v48 }
  0x6f   : > { %v244_v63 = vmul.f32 %v1114_v0, %v208_v49  ;;  %v714_v2 = vpack.c.bf16 %v306_v56, %v305_v51  ;;  %v277_v3 = vadd.f32 %v1116_v1, %v241_v57  ;;  %v278_v4 = vadd.f32 %v1116_v1, %v242_v58 }
  0x70   : > { %745 = vst [vmem:[%s1158_s23 + $0x50] sm:$0xff] %v709_v55   ;;  %v245_v5 = vmul.f32 %v1114_v0, %v209_v54  ;;  %v308_v6 = vmax.f32 %v276_v60, 0.0  ;;  %v279_v7 = vadd.f32 %v1116_v1, %v243_v62  ;;  %v246_v9 = vmul.f32 %v1114_v0, %v210_v59 }
  0x71   : > { %v280_v8 = vadd.f32 %v1116_v1, %v244_v63  ;;  %746 = vst [vmem:[%s1158_s23 + $0x58] sm:$0xff] %v714_v2   ;;  %v309_v10 = vmax.f32 %v277_v3, 0.0  ;;  %v310_v11 = vmax.f32 %v278_v4, 0.0 }
  0x72   : > { %v281_v12 = vadd.f32 %v1116_v1, %v245_v5  ;;  %v719_v13 = vpack.c.bf16 %v308_v6, %v307_v61  ;;  %v311_v14 = vmax.f32 %v279_v7, 0.0  ;;  %v282_v16 = vadd.f32 %v1116_v1, %v246_v9 }
  0x73   : > { %v312_v15 = vmax.f32 %v280_v8, 0.0  ;;  %v724_v17 = vpack.c.bf16 %v310_v11, %v309_v10 }
  0x74   : > { %v313_v18 = vmax.f32 %v281_v12, 0.0  ;;  %747 = vst [vmem:[%s1158_s23 + $0x60] sm:$0xff] %v719_v13   ;;  %v314_v19 = vmax.f32 %v282_v16, 0.0 }
  0x75   : > { %v729_v0 = vpack.c.bf16 %v312_v15, %v311_v14  ;;  %748 = vst [vmem:[%s1158_s23 + $0x68] sm:$0xff] %v724_v17  }
  0x76   : > { %v734_v1 = vpack.c.bf16 %v314_v19, %v313_v18 }
  0x77   : > { %749 = vst [vmem:[%s1158_s23 + $0x70] sm:$0xff] %v729_v0  }
  0x78   : > { %750 = vst [vmem:[%s1158_s23 + $0x78] sm:$0xff] %v734_v1  }
  0x79   : > { %883 = shalt.err (!%p880_p13)
}
  0x7a   : > { %s884_s17 = scalar_lea.hbm %s1238_s7, 2048  ;;  %s888_s3 = scalar_lea.hbm %s1288_s2, 4096 }
  0x7b   : > { %p885_p7 = scmp.ne.s32.totalorder %s1238_s7, %s884_s17  ;;  %p889_p1 = scmp.lt.u32.totalorder %s1238_s7, %s1288_s2 }
  0x7c   : > { %p890_p11 = scmp.lt.u32.totalorder %s888_s3, %s884_s17  ;;  %p892_p9 = scmp.lt.u32.totalorder %s884_s17, %s1238_s7 }
  0x7d   : > { %p886_p3 = pnand %p885_p7, %p1307_p10 }
  0x7e   : > { %p891_p8 = por %p890_p11, %p889_p1 }
  0x7f   : > { %p887_p12 = pneg %p886_p3 }
  0x80   : > { %p893_p2 = por %p892_p9, %p891_p8 }
  0x82   : > { %p894_p4 = pnand %p893_p2, %p887_p12 }
  0x84   : > { %897 = shalt.err (!%p894_p4)
}
  0x85   : > { %s947_s29 = smov 64   ;;  %s948_s20 = smov 4  }
  0x86   : > { %757 = dma.vmem_to_hbm [thread:$0]  (%p1307_p10), %s1240_s30, 2048, %s1238_s7, %s476_s13, %s947_s29, %s947_s29, %s948_s20  }
  0x87 PF: > { %s504_s23 = sand.u32 1, %s928_s9   ;;  %p1308_p5 = scmp.ne.s32.totalorder %s1297_s22, 0 }
  0x88   : > { %p1309_p0 = scmp.ge.s32.totalorder %s940_s12, 2  ;;  %s505_s28 = scalar_lea.sflag [#allocation4], %s504_s23 }
  0x8a   : > { %p768_p6 = pnand %p1309_p0, %p1308_p5 }
  0x8c   : > { %923 = dma.done.wait (!%p768_p6), %s505_s28, 2048  }
  0x8d   : > { %925 = vsyncadd (!%p768_p6), %s505_s28, 4294965248  ;;  %p16_p13 = scmp.ge.s32.totalorder %s989_s15, 4   ;;  %s1310_s9 = smov %s932_s10 }
  0x8e   : > { %s1311_s10 = smov %s936_s11  ;;  %s1312_s11 = smov %s1001_s18 }
  0x8f   : > { %s1313_s12 = smov %s989_s15  ;;  %18 = sbr.rel (!%p16_p13) target bundleno = 6 (0x6), region = 77 }
  0x96   :  { %510 = vsyncpa [#allocation3], 1 }
  0x97   :  { %512 = vsyncpa [#allocation3 + $0x1], 1 }
  0x98   :  { %513 = vsyncpa [#allocation6], 1 }
  0x99   :  { %514 = vsyncpa [#allocation4], 1 }
  0x9a   :  { %516 = vsyncpa [#allocation4 + $0x1], 1 }

// kernel: double_conv_forward.7
= control target key start
LH: loop header
LB: loop body
LE: loop exit
PB: predicated region body
PF: predicated region fallthrough
CT: control target
= control target key end

     0   :  { %7 = vsyncpa [#allocation3], 0  ;;  %s1016_s0 = inlined_call_operand.hbm [shape: f32[512,128], index: 0, kind: input, shape index: {}]   ;;  %s1017_s1 = inlined_call_operand.hbm [shape: f32[2,128], index: 1, kind: input, shape index: {}]   ;;  %s1018_s2 = inlined_call_operand.hbm [shape: f32[512,128], index: 2, kind: output, shape index: {}]  }
   0x1   :  { %9 = vsyncpa [#allocation3 + $0x1], 0 }
   0x2   :  { %10 = vsyncpa [#allocation6], 0 }
   0x3   :  { %11 = vsyncpa [#allocation4], 0 }
   0x4   :  { %13 = vsyncpa [#allocation4 + $0x1], 0  ;;  %s677_s9 = smov 0   ;;  %s679_s10 = smov 0  }
   0x5   :  { %s681_s11 = smov 0   ;;  %s683_s12 = smov 0  }
   0x6 LB: > { %s698_s13 = sadd.s32 4294967295, %s653_s12   ;;  %s444_s14 = sadd.s32 4294967294, %s653_s12   ;;  %s653_s12 = sphi %s683_s12, %s1043_s12   ;;  %s649_s11 = sphi %s681_s11, %s1042_s11   ;;  %s645_s10 = sphi %s679_s10, %s1041_s10   ;;  %s641_s9 = sphi %s677_s9, %s1040_s9  }
   0x7   : > { %s702_s15 = sadd.s32 1, %s653_s12   ;;  %s26_s16 = sadd.s32 1, %s649_s11 }
   0x8   : > { %s23_s17 = ssub.s32 %s653_s12, %s702_s15  ;;  %p33_p0 = scmp.ne.s32.totalorder %s649_s11, %s645_s10 }
   0x9   : > { %p24_p1 = scmp.eq.s32.totalorder %s23_s17, 0  ;;  %p34_p2 = scmp.eq.s32.totalorder %s653_s12, 0 }
   0xa   : > { %p39_p3 = scmp.ne.s32.totalorder %s645_s10, %s641_s9  ;;  %p1019_p4 = scmp.eq.s32.totalorder %s698_s13, 0 }
   0xb   : > { %s714_s18 = scalar_select %p24_p1, %s649_s11, %s26_s16  }
   0xc   : > { %p716_p5 = por %p34_p2, %p33_p0  ;;  %p722_p6 = por %p1019_p4, %p39_p3 }
   0xd   : > { %p84_p7 = scmp.eq.s32.totalorder %s698_s13, 1  ;;  %p90_p8 = scmp.eq.s32.totalorder %s444_s14, 1 }
   0xe   : > { %s1025_s20 = scalar_select %p722_p6, 1, 0 }
   0xf   : > { %p445_p9 = scmp.ge.s32.totalorder %s653_s12, 1  ;;  %p97_p10 = scmp.lt.s32.totalorder %s653_s12, 3 }
  0x10   : > { %p729_p11 = por %p84_p7, %p33_p0  ;;  %p733_p12 = por %p90_p8, %p39_p3 }
  0x11   : > { %p737_p13 = pnand %p445_p9, %p97_p10  ;;  %s655_s24 = smov [#allocation5]  }
  0x12   : > { %s1026_s21 = scalar_select %p729_p11, 1, 0 }
  0x13   : > { %s1027_s22 = scalar_select %p733_p12, 1, 0 }
  0x14   : > { %s1028_s23 = scalar_select %p737_p13, 1, 0 }
  0x15   : > { %p472_p2 = pneg %p737_p13  ;;  %s110_s25 = sshll.u32 %s655_s24, 4  ;;  %s111_s25 = int_to_ptr.vmem [resolvable:$true] %s110_s25 }
  0x16   : > { %p485_p4 = scmp.lt.s32.totalorder %s653_s12, 2  ;;  %p1029_p0 = scmp.eq.s32.totalorder %s698_s13, 0 }
  0x17   : > { %s121_s27 = sand.u32 1, %s649_s11   ;;  %s525_s4 = scalar_lea.hbm %s1017_s1, 32 }
  0x18   : > { %p747_p7 = pnand %p472_p2, %p1029_p0  ;;  %p754_p3 = pnand %p485_p4, %p716_p5 }
  0x19   : > { %s448_s29 = sshll.u32 %s121_s27, 8  ;;  %p526_p8 = scmp.ne.s32.totalorder %s1017_s1, %s525_s4 }
  0x1a   : > { %s1031_s28 = scalar_select %p754_p3, 1, 0 }
  0x1b   : > { %p527_p9 = pneg %p747_p7  ;;  %p532_p4 = scmp.lt.u32.totalorder %s525_s4, %s1017_s1 }
  0x1d   : > { %p528_p10 = pnand %p527_p9, %p526_p8 }
  0x1f   : > { %p529_p2 = pneg %p528_p10 }
  0x21   : > { %p534_p5 = pnand %p532_p4, %p529_p2 }
  0x23   : > { %537 = shalt.err (!%p534_p5)
}
  0x24   : > { %s538_s14 = scalar_lea.vmem %s111_s25, 32  ;;  %p546_p11 = scmp.lt.s32.totalorder %s111_s25, %s111_s25 }
  0x25   : > { %p539_p0 = scmp.ne.s32.totalorder %s111_s25, %s538_s14  ;;  %p547_p6 = scmp.lt.s32.totalorder %s538_s14, %s538_s14 }
  0x27   : > { %p541_p1 = pnand %p539_p0, %p527_p9  ;;  %p548_p13 = por %p547_p6, %p546_p11 }
  0x29   : > { %p542_p12 = pneg %p541_p1 }
  0x2b   : > { %p549_p3 = pnand %p548_p13, %p542_p12 }
  0x2d   : > { %552 = shalt.err (!%p549_p3)
}
  0x2e   : > { %475 = dma.hbm_to_vmem [thread:$0]  (!%p747_p7), %s1017_s1, 32, %s111_s25, [#allocation6]  }
  0x2f   : > { %s462_s19 = sshll.u32 %s653_s12, 12  ;;  %s125_s24 = scalar_lea.vmem [#allocation2], %s448_s29 }
  0x30   : > { %s132_s30 = sshll.u32 %s125_s24, 4  ;;  %s778_s5 = scalar_lea.hbm %s1016_s0, %s462_s19  ;;  %s780_s30 = int_to_ptr.vmem [resolvable:$true] %s132_s30 }
  0x31   : > { %s782_s26 = scalar_lea.sflag [#allocation3], %s121_s27  ;;  %s553_s6 = scalar_lea.hbm %s778_s5, 4096 }
  0x32   : > { %p554_p6 = scmp.ne.s32.totalorder %s778_s5, %s553_s6  ;;  %p1032_p11 = scmp.ne.s32.totalorder %s1031_s28, 0 }
  0x33   : > { %s558_s7 = scalar_lea.hbm %s1016_s0, 8192  ;;  %p559_p7 = scmp.lt.u32.totalorder %s778_s5, %s1016_s0 }
  0x34   : > { %p555_p12 = pneg %p1032_p11  ;;  %p560_p3 = scmp.lt.u32.totalorder %s558_s7, %s553_s6 }
  0x35   : > { %p562_p9 = scmp.lt.u32.totalorder %s553_s6, %s778_s5 }
  0x36   : > { %p556_p13 = pnand %p555_p12, %p554_p6  ;;  %p561_p8 = por %p560_p3, %p559_p7 }
  0x38   : > { %p557_p1 = pneg %p556_p13  ;;  %p563_p10 = por %p562_p9, %p561_p8 }
  0x3a   : > { %p564_p2 = pnand %p563_p10, %p557_p1 }
  0x3c   : > { %567 = shalt.err (!%p564_p2)
}
  0x3d   : > { %s568_s27 = scalar_lea.vmem %s780_s30, 4096  ;;  %s656_s16 = smov [#allocation2]  }
  0x3e   : > { %p569_p4 = scmp.ne.s32.totalorder %s780_s30, %s568_s27  ;;  %s573_s17 = sshll.u32 %s656_s16, 4  ;;  %s574_s17 = int_to_ptr.vmem [resolvable:$false] %s573_s17 }
  0x3f   : > { %s575_s19 = scalar_lea.vmem %s574_s17, 8192  ;;  %p576_p6 = scmp.lt.s32.totalorder %s780_s30, %s574_s17 }
  0x40   : > { %p571_p5 = pnand %p569_p4, %p555_p12  ;;  %p577_p13 = scmp.lt.s32.totalorder %s575_s19, %s568_s27 }
  0x42   : > { %p572_p0 = pneg %p571_p5  ;;  %p578_p7 = por %p577_p13, %p576_p6 }
  0x44   : > { %p579_p3 = pnand %p578_p7, %p572_p0 }
  0x46   : > { %582 = shalt.err (!%p579_p3)
}
  0x47   : > { %s657_s24 = smov 128   ;;  %s658_s3 = smov 8  }
  0x48   : > { %479 = dma.hbm_to_vmem [thread:$0]  (!%p1032_p11), %s778_s5, 4096, %s780_s30, %s782_s26, %s657_s24, %s657_s24, %s658_s3  }
  0x49   : > { %p1033_p12 = scmp.ne.s32.totalorder %s1028_s23, 0 }
  0x4a   : > { %s813_s4 = sand.u32 (!%p1033_p12), 1, %s645_s10   ;;  %p1034_p1 = scmp.ne.s32.totalorder (!%p1033_p12), %s1025_s20, 0 }
  0x4b   : > { %144 = sbr.rel (%p1033_p12) target bundleno = 131 (0x83), region = 28  ;;  %s452_s6 = sshll.u32 (!%p1033_p12), %s813_s4, 8 }
  0x4c   : > { %s147_s25 = scalar_lea.sflag (!%p1033_p12), [#allocation3], %s813_s4  ;;  %s819_s29 = scalar_lea.vmem (!%p1033_p12), [#allocation2], %s452_s6 }
  0x52   : > { %628 = dma.done.wait (%p1034_p1), %s147_s25, 4096  }
  0x53   : > { %630 = vsyncadd (%p1034_p1), %s147_s25, 4294963200  ;;  %p1035_p11 = scmp.eq.s32.totalorder %s698_s13, 0 }
  0x55   : > { %632 = dma.done.wait (%p1035_p11), [#allocation6], 32   ;;  %p1036_p8 = pmov %p1035_p11 }
  0x56   : > { %v829_v0 = vld [vmem:[#allocation5] ss:$0 sm:$0xff]  ;;  %v831_v1 = vld [vmem:[#allocation5 + $0x1] ss:$0 sm:$0xff]  ;;  %v180_v4 = vld [vmem:[%s819_s29 + $0x8] sm:$0xff]  ;;  %s866_s20 = scalar_lea.vmem [#allocation7], %s452_s6 }
  0x57   : > { %634 = vsyncadd (%p1036_p8), [#allocation6], 4294967264  ;;  %v179_v2 = vld [vmem:[%s819_s29] sm:$0xff]  ;;  %v181_v5 = vld [vmem:[%s819_s29 + $0x10] sm:$0xff]  ;;  %v216_v7 = vmul.f32 %v829_v0, %v180_v4  ;;  %s463_s23 = sshll.u32 %s698_s13, 12  ;;  %s361_s28 = sshll.u32 %s866_s20, 4  ;;  %s965_s28 = int_to_ptr.vmem [resolvable:$true] %s361_s28 }
  0x58   : > { %v215_v3 = vmul.f32 %v829_v0, %v179_v2  ;;  %v182_v6 = vld [vmem:[%s819_s29 + $0x18] sm:$0xff]  ;;  %v217_v8 = vmul.f32 %v829_v0, %v181_v5  ;;  %v183_v10 = vld [vmem:[%s819_s29 + $0x20] sm:$0xff]  ;;  %v184_v11 = vld [vmem:[%s819_s29 + $0x28] sm:$0xff]  ;;  %s963_s5 = scalar_lea.hbm %s1018_s2, %s463_s23  ;;  %s348_s26 = scalar_lea.sflag [#allocation4], %s813_s4 }
  0x59   : > { %v218_v9 = vmul.f32 %v829_v0, %v182_v6  ;;  %v185_v12 = vld [vmem:[%s819_s29 + $0x30] sm:$0xff]  ;;  %v219_v14 = vmul.f32 %v829_v0, %v183_v10  ;;  %v220_v15 = vmul.f32 %v829_v0, %v184_v11  ;;  %v186_v17 = vld [vmem:[%s819_s29 + $0x38] sm:$0xff]  ;;  %v252_v18 = vadd.f32 %v831_v1, %v216_v7  ;;  %v187_v22 = vld [vmem:[%s819_s29 + $0x40] sm:$0xff]  ;;  %s583_s7 = scalar_lea.vmem %s965_s28, 4096  ;;  %p1037_p10 = scmp.ne.s32.totalorder %s1026_s21, 0 }
  0x5a   : > { %v251_v13 = vadd.f32 %v831_v1, %v215_v3  ;;  %v221_v16 = vmul.f32 %v829_v0, %v185_v12  ;;  %v253_v19 = vadd.f32 %v831_v1, %v217_v8  ;;  %v222_v21 = vmul.f32 %v829_v0, %v186_v17  ;;  %v188_v27 = vld [vmem:[%s819_s29 + $0x48] sm:$0xff]  ;;  %v189_v28 = vld [vmem:[%s819_s29 + $0x50] sm:$0xff]  ;;  %v190_v29 = vld [vmem:[%s819_s29 + $0x58] sm:$0xff]  ;;  %p584_p9 = scmp.ne.s32.totalorder %s965_s28, %s583_s7  ;;  %s659_s8 = smov [#allocation7]  }
  0x5b   : > { %v254_v20 = vadd.f32 %v831_v1, %v218_v9  ;;  %v255_v24 = vadd.f32 %v831_v1, %v219_v14  ;;  %v256_v25 = vadd.f32 %v831_v1, %v220_v15  ;;  %v284_v30 = vmax.f32 %v252_v18, 0.0  ;;  %v191_v34 = vld [vmem:[%s819_s29 + $0x60] sm:$0xff]  ;;  %v192_v35 = vld [vmem:[%s819_s29 + $0x68] sm:$0xff]  ;;  %v193_v36 = vld [vmem:[%s819_s29 + $0x70] sm:$0xff]  ;;  %s587_s14 = sshll.u32 %s659_s8, 4  ;;  %s588_s14 = int_to_ptr.vmem [resolvable:$false] %s587_s14 }
  0x5c   : > { %v283_v23 = vmax.f32 %v251_v13, 0.0  ;;  %v257_v26 = vadd.f32 %v831_v1, %v221_v16  ;;  %v285_v31 = vmax.f32 %v253_v19, 0.0  ;;  %v258_v33 = vadd.f32 %v831_v1, %v222_v21  ;;  %v194_v41 = vld [vmem:[%s819_s29 + $0x78] sm:$0xff]  ;;  %v195_v54 = vld [vmem:[%s819_s29 + $0x80] sm:$0xff]  ;;  %v196_v59 = vld [vmem:[%s819_s29 + $0x88] sm:$0xff]  ;;  %p585_p2 = pnand %p584_p9, %p1037_p10  ;;  %s589_s27 = scalar_lea.vmem %s588_s14, 8192 }
  0x5d   : > { %v286_v32 = vmax.f32 %v254_v20, 0.0  ;;  %v287_v37 = vmax.f32 %v255_v24, 0.0  ;;  %v288_v38 = vmax.f32 %v256_v25, 0.0  ;;  %v223_v40 = vmul.f32 %v829_v0, %v187_v22  ;;  %316 = vst [vmem:[%s866_s20 + $0x8] sm:$0xff] %v284_v30  ;;  %v197_v60 = vld [vmem:[%s819_s29 + $0x90] sm:$0xff]  ;;  %v198_v61 = vld [vmem:[%s819_s29 + $0x98] sm:$0xff]  ;;  %p590_p5 = scmp.lt.s32.totalorder %s965_s28, %s588_s14  ;;  %p591_p0 = scmp.lt.s32.totalorder %s589_s27, %s583_s7 }
  0x5e   : > { %315 = vst [vmem:[%s866_s20] sm:$0xff] %v283_v23  ;;  %v289_v39 = vmax.f32 %v257_v26, 0.0  ;;  %317 = vst [vmem:[%s866_s20 + $0x10] sm:$0xff] %v285_v31  ;;  %v290_v42 = vmax.f32 %v258_v33, 0.0  ;;  %v224_v43 = vmul.f32 %v829_v0, %v188_v27  ;;  %v225_v44 = vmul.f32 %v829_v0, %v189_v28  ;;  %v199_v4 = vld [vmem:[%s819_s29 + $0xa0] sm:$0xff]  ;;  %v200_v5 = vld [vmem:[%s819_s29 + $0xa8] sm:$0xff]  ;;  %p586_p4 = pneg %p585_p2 }
  0x5f   : > { %318 = vst [vmem:[%s866_s20 + $0x18] sm:$0xff] %v286_v32  ;;  %v226_v45 = vmul.f32 %v829_v0, %v190_v29  ;;  %319 = vst [vmem:[%s866_s20 + $0x20] sm:$0xff] %v287_v37  ;;  %v259_v46 = vadd.f32 %v831_v1, %v223_v40  ;;  %v227_v47 = vmul.f32 %v829_v0, %v191_v34  ;;  %v201_v6 = vld [vmem:[%s819_s29 + $0xb0] sm:$0xff]  ;;  %v202_v11 = vld [vmem:[%s819_s29 + $0xb8] sm:$0xff]  ;;  %p592_p6 = por %p591_p0, %p590_p5 }
  0x60   : > { %320 = vst [vmem:[%s866_s20 + $0x28] sm:$0xff] %v288_v38  ;;  %321 = vst [vmem:[%s866_s20 + $0x30] sm:$0xff] %v289_v39  ;;  %v228_v48 = vmul.f32 %v829_v0, %v192_v35  ;;  %v229_v49 = vmul.f32 %v829_v0, %v193_v36  ;;  %v260_v50 = vadd.f32 %v831_v1, %v224_v43  ;;  %v203_v24 = vld [vmem:[%s819_s29 + $0xc0] sm:$0xff]  ;;  %v204_v29 = vld [vmem:[%s819_s29 + $0xc8] sm:$0xff] }
  0x61   : > { %322 = vst [vmem:[%s866_s20 + $0x38] sm:$0xff] %v290_v42  ;;  %v261_v51 = vadd.f32 %v831_v1, %v225_v44  ;;  %v262_v52 = vadd.f32 %v831_v1, %v226_v45  ;;  %v230_v53 = vmul.f32 %v829_v0, %v194_v41  ;;  %v291_v55 = vmax.f32 %v259_v46, 0.0  ;;  %v205_v30 = vld [vmem:[%s819_s29 + $0xd0] sm:$0xff]  ;;  %v206_v31 = vld [vmem:[%s819_s29 + $0xd8] sm:$0xff]  ;;  %v207_v36 = vld [vmem:[%s819_s29 + $0xe0] sm:$0xff]  ;;  %p593_p13 = pnand %p592_p6, %p586_p4 }
  0x62   : > { %v263_v56 = vadd.f32 %v831_v1, %v227_v47  ;;  %v264_v57 = vadd.f32 %v831_v1, %v228_v48  ;;  %v265_v58 = vadd.f32 %v831_v1, %v229_v49  ;;  %v292_v62 = vmax.f32 %v260_v50, 0.0  ;;  %v208_v37 = vld [vmem:[%s819_s29 + $0xe8] sm:$0xff]  ;;  %v209_v38 = vld [vmem:[%s819_s29 + $0xf0] sm:$0xff]  ;;  %v210_v43 = vld [vmem:[%s819_s29 + $0xf8] sm:$0xff] }
  0x63   : > { %v293_v63 = vmax.f32 %v261_v51, 0.0  ;;  %v294_v2 = vmax.f32 %v262_v52, 0.0  ;;  %v266_v3 = vadd.f32 %v831_v1, %v230_v53  ;;  %323 = vst [vmem:[%s866_s20 + $0x40] sm:$0xff] %v291_v55  ;;  %v231_v10 = vmul.f32 %v829_v0, %v195_v54 }
  0x64   : > { %v295_v7 = vmax.f32 %v263_v56, 0.0  ;;  %v296_v8 = vmax.f32 %v264_v57, 0.0  ;;  %v297_v9 = vmax.f32 %v265_v58, 0.0  ;;  %324 = vst [vmem:[%s866_s20 + $0x48] sm:$0xff] %v292_v62  ;;  %v232_v13 = vmul.f32 %v829_v0, %v196_v59 }
  0x65   : > { %325 = vst [vmem:[%s866_s20 + $0x50] sm:$0xff] %v293_v63  ;;  %326 = vst [vmem:[%s866_s20 + $0x58] sm:$0xff] %v294_v2  ;;  %v298_v12 = vmax.f32 %v266_v3, 0.0  ;;  %v233_v14 = vmul.f32 %v829_v0, %v197_v60  ;;  %v234_v15 = vmul.f32 %v829_v0, %v198_v61  ;;  %v267_v16 = vadd.f32 %v831_v1, %v231_v10 }
  0x66   : > { %327 = vst [vmem:[%s866_s20 + $0x60] sm:$0xff] %v295_v7  ;;  %328 = vst [vmem:[%s866_s20 + $0x68] sm:$0xff] %v296_v8  ;;  %v235_v17 = vmul.f32 %v829_v0, %v199_v4  ;;  %v236_v18 = vmul.f32 %v829_v0, %v200_v5  ;;  %v237_v19 = vmul.f32 %v829_v0, %v201_v6 }
  0x67   : > { %329 = vst [vmem:[%s866_s20 + $0x70] sm:$0xff] %v297_v9  ;;  %330 = vst [vmem:[%s866_s20 + $0x78] sm:$0xff] %v298_v12  ;;  %v268_v20 = vadd.f32 %v831_v1, %v232_v13  ;;  %v269_v21 = vadd.f32 %v831_v1, %v233_v14  ;;  %v270_v22 = vadd.f32 %v831_v1, %v234_v15  ;;  %v299_v25 = vmax.f32 %v267_v16, 0.0 }
  0x68   : > { %v238_v23 = vmul.f32 %v829_v0, %v202_v11  ;;  %v271_v26 = vadd.f32 %v831_v1, %v235_v17  ;;  %v272_v27 = vadd.f32 %v831_v1, %v236_v18  ;;  %v273_v28 = vadd.f32 %v831_v1, %v237_v19 }
  0x69   : > { %v300_v32 = vmax.f32 %v268_v20, 0.0  ;;  %v301_v33 = vmax.f32 %v269_v21, 0.0  ;;  %v302_v34 = vmax.f32 %v270_v22, 0.0  ;;  %331 = vst [vmem:[%s866_s20 + $0x80] sm:$0xff] %v299_v25  ;;  %v239_v42 = vmul.f32 %v829_v0, %v203_v24 }
  0x6a   : > { %v274_v35 = vadd.f32 %v831_v1, %v238_v23  ;;  %v303_v39 = vmax.f32 %v271_v26, 0.0  ;;  %v304_v40 = vmax.f32 %v272_v27, 0.0  ;;  %v305_v41 = vmax.f32 %v273_v28, 0.0 }
  0x6b   : > { %332 = vst [vmem:[%s866_s20 + $0x88] sm:$0xff] %v300_v32  ;;  %333 = vst [vmem:[%s866_s20 + $0x90] sm:$0xff] %v301_v33  ;;  %v240_v45 = vmul.f32 %v829_v0, %v204_v29  ;;  %v241_v46 = vmul.f32 %v829_v0, %v205_v30  ;;  %v242_v47 = vmul.f32 %v829_v0, %v206_v31 }
  0x6c   : > { %334 = vst [vmem:[%s866_s20 + $0x98] sm:$0xff] %v302_v34  ;;  %v306_v44 = vmax.f32 %v274_v35, 0.0  ;;  %335 = vst [vmem:[%s866_s20 + $0xa0] sm:$0xff] %v303_v39  ;;  %v275_v48 = vadd.f32 %v831_v1, %v239_v42  ;;  %v243_v49 = vmul.f32 %v829_v0, %v207_v36  ;;  %v244_v50 = vmul.f32 %v829_v0, %v208_v37 }
  0x6d   : > { %336 = vst [vmem:[%s866_s20 + $0xa8] sm:$0xff] %v304_v40  ;;  %337 = vst [vmem:[%s866_s20 + $0xb0] sm:$0xff] %v305_v41  ;;  %v245_v51 = vmul.f32 %v829_v0, %v209_v38  ;;  %v276_v52 = vadd.f32 %v831_v1, %v240_v45  ;;  %v277_v53 = vadd.f32 %v831_v1, %v241_v46 }
  0x6e   : > { %338 = vst [vmem:[%s866_s20 + $0xb8] sm:$0xff] %v306_v44  ;;  %v278_v54 = vadd.f32 %v831_v1, %v242_v47  ;;  %v246_v55 = vmul.f32 %v829_v0, %v210_v43  ;;  %v307_v56 = vmax.f32 %v275_v48, 0.0  ;;  %v279_v57 = vadd.f32 %v831_v1, %v243_v49 }
  0x6f   : > { %v280_v58 = vadd.f32 %v831_v1, %v244_v50  ;;  %v281_v59 = vadd.f32 %v831_v1, %v245_v51  ;;  %v308_v60 = vmax.f32 %v276_v52, 0.0  ;;  %v309_v61 = vmax.f32 %v277_v53, 0.0 }
  0x70   : > { %v310_v62 = vmax.f32 %v278_v54, 0.0  ;;  %v282_v0 = vadd.f32 %v831_v1, %v246_v55  ;;  %339 = vst [vmem:[%s866_s20 + $0xc0] sm:$0xff] %v307_v56  ;;  %v311_v63 = vmax.f32 %v279_v57, 0.0 }
  0x71   : > { %v312_v2 = vmax.f32 %v280_v58, 0.0  ;;  %v313_v3 = vmax.f32 %v281_v59, 0.0  ;;  %340 = vst [vmem:[%s866_s20 + $0xc8] sm:$0xff] %v308_v60  ;;  %341 = vst [vmem:[%s866_s20 + $0xd0] sm:$0xff] %v309_v61 }
  0x72   : > { %342 = vst [vmem:[%s866_s20 + $0xd8] sm:$0xff] %v310_v62  ;;  %v314_v4 = vmax.f32 %v282_v0, 0.0  ;;  %343 = vst [vmem:[%s866_s20 + $0xe0] sm:$0xff] %v311_v63 }
  0x73   : > { %344 = vst [vmem:[%s866_s20 + $0xe8] sm:$0xff] %v312_v2  ;;  %345 = vst [vmem:[%s866_s20 + $0xf0] sm:$0xff] %v313_v3 }
  0x74   : > { %346 = vst [vmem:[%s866_s20 + $0xf8] sm:$0xff] %v314_v4 }
  0x75   : > { %596 = shalt.err (!%p593_p13)
}
  0x76   : > { %s597_s16 = scalar_lea.hbm %s963_s5, 4096  ;;  %s601_s24 = scalar_lea.hbm %s1018_s2, 8192 }
  0x77   : > { %p598_p7 = scmp.ne.s32.totalorder %s963_s5, %s597_s16  ;;  %p602_p1 = scmp.lt.u32.totalorder %s963_s5, %s1018_s2 }
  0x78   : > { %p603_p11 = scmp.lt.u32.totalorder %s601_s24, %s597_s16  ;;  %p605_p9 = scmp.lt.u32.totalorder %s597_s16, %s963_s5 }
  0x79   : > { %p599_p3 = pnand %p598_p7, %p1037_p10 }
  0x7a   : > { %p604_p8 = por %p603_p11, %p602_p1 }
  0x7b   : > { %p600_p12 = pneg %p599_p3 }
  0x7c   : > { %p606_p2 = por %p605_p9, %p604_p8 }
  0x7e   : > { %p607_p4 = pnand %p606_p2, %p600_p12 }
  0x80   : > { %610 = shalt.err (!%p607_p4)
}
  0x81   : > { %s660_s25 = smov 128   ;;  %s661_s29 = smov 8  }
  0x82   : > { %470 = dma.vmem_to_hbm [thread:$0]  (%p1037_p10), %s965_s28, 4096, %s963_s5, %s348_s26, %s660_s25, %s660_s25, %s661_s29  }
  0x83 PF: > { %s376_s20 = sand.u32 1, %s641_s9   ;;  %p1038_p5 = scmp.ne.s32.totalorder %s1027_s22, 0 }
  0x84   : > { %p1039_p0 = scmp.ge.s32.totalorder %s653_s12, 2  ;;  %s377_s23 = scalar_lea.sflag [#allocation4], %s376_s20 }
  0x86   : > { %p481_p6 = pnand %p1039_p0, %p1038_p5 }
  0x88   : > { %636 = dma.done.wait (!%p481_p6), %s377_s23, 4096  }
  0x89   : > { %638 = vsyncadd (!%p481_p6), %s377_s23, 4294963200  ;;  %p16_p13 = scmp.ge.s32.totalorder %s702_s15, 4   ;;  %s1040_s9 = smov %s645_s10 }
  0x8a   : > { %s1041_s10 = smov %s649_s11  ;;  %s1042_s11 = smov %s714_s18 }
  0x8b   : > { %s1043_s12 = smov %s702_s15  ;;  %18 = sbr.rel (!%p16_p13) target bundleno = 6 (0x6), region = 77 }
  0x92   :  { %382 = vsyncpa [#allocation3], 1 }
  0x93   :  { %384 = vsyncpa [#allocation3 + $0x1], 1 }
  0x94   :  { %385 = vsyncpa [#allocation6], 1 }
  0x95   :  { %386 = vsyncpa [#allocation4], 1 }
  0x96   :  { %388 = vsyncpa [#allocation4 + $0x1], 1 }

// kernel: double_conv_forward.4
= control target key start
LH: loop header
LB: loop body
LE: loop exit
PB: predicated region body
PF: predicated region fallthrough
CT: control target
= control target key end

     0   :  { %11 = vsyncpa [#allocation4], 0  ;;  %s9368_s0 = inlined_call_operand.hbm [shape: bf16[2,18,18,128], index: 0, kind: input, shape index: {}]   ;;  %s9369_s1 = inlined_call_operand.hbm [shape: bf16[9,128,128], index: 1, kind: input, shape index: {}]   ;;  %s9370_s2 = inlined_call_operand.hbm [shape: f32[1,128], index: 2, kind: input, shape index: {}]   ;;  %s9371_s3 = inlined_call_operand.hbm [shape: f32[1,128], index: 3, kind: input, shape index: {}]   ;;  %s9372_s4 = inlined_call_operand.hbm [shape: f32[512,128], index: 4, kind: output, shape index: {0}]   ;;  %s9373_s5 = inlined_call_operand.hbm [shape: f32[2,128], index: 5, kind: output, shape index: {1}]  }
   0x1   :  { %13 = vsyncpa [#allocation4 + $0x1], 0 }
   0x2   :  { %14 = vsyncpa [#allocation7], 0 }
   0x3   :  { %15 = vsyncpa [#allocation10], 0 }
   0x4   :  { %16 = vsyncpa [#allocation5], 0 }
   0x5   :  { %18 = vsyncpa [#allocation5 + $0x1], 0 }
   0x6   :  { %19 = vsyncpa [#allocation13], 0  ;;  %s8193_s18 = smov 0   ;;  %s8195_s19 = smov 0  }
   0x7   :  { %s8197_s20 = smov 0   ;;  %s8199_s21 = smov 0  }
   0x8 LB: > { %s8214_s22 = sadd.s32 4294967295, %s8150_s21   ;;  %s6248_s23 = sadd.s32 4294967294, %s8150_s21   ;;  %s8150_s21 = sphi %s8199_s21, %s9408_s21   ;;  %s8146_s20 = sphi %s8197_s20, %s9407_s20   ;;  %s8142_s19 = sphi %s8195_s19, %s9406_s19   ;;  %s8138_s18 = sphi %s8193_s18, %s9405_s18  }
   0x9   : > { %p45_p0 = scmp.ne.s32.totalorder %s8142_s19, %s8138_s18  ;;  %p9374_p1 = scmp.eq.s32.totalorder %s8214_s22, 0 }
   0xa   : > { %p138_p3 = scmp.eq.s32.totalorder %s6248_s23, 1  ;;  %p6249_p5 = scmp.ge.s32.totalorder %s8150_s21, 1 }
   0xb   : > { %p8223_p4 = por %p9374_p1, %p45_p0  ;;  %p166_p7 = scmp.lt.s32.totalorder %s8150_s21, 3 }
   0xc   : > { %p8228_p6 = por %p138_p3, %p45_p0  ;;  %s8152_s27 = smov [#allocation6]  }
   0xd   : > { %s9378_s24 = scalar_select %p8223_p4, 1, 0 }
   0xe   : > { %s9379_s25 = scalar_select %p8228_p6, 1, 0 }
   0xf   : > { %p8234_p9 = pnand %p6249_p5, %p166_p7  ;;  %s178_s28 = sshll.u32 %s8152_s27, 4  ;;  %s8238_s28 = int_to_ptr.vmem [resolvable:$true] %s178_s28 }
  0x10   : > { %s8153_s30 = smov [#allocation8]   ;;  %s8154_s7 = smov [#allocation9]  }
  0x11   : > { %s9380_s26 = scalar_select %p8234_p9, 1, 0 }
  0x12   : > { %p7733_p10 = pneg %p8234_p9  ;;  %s192_s6 = sshll.u32 %s8153_s30, 4  ;;  %s8249_s6 = int_to_ptr.vmem [resolvable:$true] %s192_s6 }
  0x13   : > { %s8251_s8 = sshll.u32 %s8154_s7, 4  ;;  %s7932_s11 = scalar_lea.hbm %s9369_s1, 9216  ;;  %s204_s8 = int_to_ptr.vmem [resolvable:$true] %s8251_s8 }
  0x14   : > { %p8245_p12 = pnand %p7733_p10, %p9374_p1  ;;  %p7933_p13 = scmp.ne.s32.totalorder %s9369_s1, %s7932_s11 }
  0x15   : > { %p7939_p7 = scmp.lt.u32.totalorder %s7932_s11, %s9369_s1 }
  0x16   : > { %p8261_p0 = pneg %p8245_p12 }
  0x18   : > { %p7935_p3 = pnand %p8261_p0, %p7933_p13 }
  0x1a   : > { %p7936_p5 = pneg %p7935_p3 }
  0x1c   : > { %p7941_p10 = pnand %p7939_p7, %p7936_p5 }
  0x1e   : > { %7944 = shalt.err (!%p7941_p10)
}
  0x1f   : > { %s7945_s17 = scalar_lea.vmem %s8238_s28, 9216  ;;  %p7953_p2 = scmp.lt.s32.totalorder %s8238_s28, %s8238_s28 }
  0x20   : > { %p7946_p11 = scmp.ne.s32.totalorder %s8238_s28, %s7945_s17  ;;  %p7954_p6 = scmp.lt.s32.totalorder %s7945_s17, %s7945_s17 }
  0x22   : > { %p7948_p8 = pnand %p7946_p11, %p8261_p0  ;;  %p7955_p13 = por %p7954_p6, %p7953_p2 }
  0x24   : > { %p7949_p1 = pneg %p7948_p8 }
  0x26   : > { %p7956_p3 = pnand %p7955_p13, %p7949_p1 }
  0x28   : > { %7959 = shalt.err (!%p7956_p3)
}
  0x29   : > { %s9377_s23 = smov 64   ;;  %s8156_s27 = smov 4  }
  0x2a   : > { %7736 = dma.hbm_to_vmem [thread:$0]  (!%p8245_p12), %s9369_s1, 9216, %s8238_s28, [#allocation7], %s9377_s23, %s9377_s23, %s8156_s27  }
  0x2b   : > { %s7960_s11 = scalar_lea.hbm %s9370_s2, 16 }
  0x2c   : > { %p7961_p1 = scmp.ne.s32.totalorder %s9370_s2, %s7960_s11  ;;  %p7967_p8 = scmp.lt.u32.totalorder %s7960_s11, %s9370_s2 }
  0x2e   : > { %p7963_p2 = pnand %p7961_p1, %p8261_p0 }
  0x30   : > { %p7964_p6 = pneg %p7963_p2 }
  0x32   : > { %p7969_p11 = pnand %p7967_p8, %p7964_p6 }
  0x34   : > { %7972 = shalt.err (!%p7969_p11)
}
  0x35   : > { %s7973_s28 = scalar_lea.vmem %s8249_s6, 16  ;;  %s7980_s17 = scalar_lea.vmem %s8249_s6, 32 }
  0x36   : > { %p7974_p5 = scmp.ne.s32.totalorder %s8249_s6, %s7973_s28  ;;  %p7981_p13 = scmp.lt.s32.totalorder %s8249_s6, %s8249_s6 }
  0x37   : > { %p7982_p3 = scmp.lt.s32.totalorder %s7980_s17, %s7973_s28 }
  0x38   : > { %p7976_p7 = pnand %p7974_p5, %p8261_p0 }
  0x39   : > { %p7983_p1 = por %p7982_p3, %p7981_p13 }
  0x3a   : > { %p7977_p10 = pneg %p7976_p7 }
  0x3c   : > { %p7984_p2 = pnand %p7983_p1, %p7977_p10 }
  0x3e   : > { %7987 = shalt.err (!%p7984_p2)
}
  0x3f   : > { %7739 = dma.hbm_to_vmem [thread:$0]  (!%p8245_p12), %s9370_s2, 16, %s8249_s6, [#allocation7]  }
  0x40   : > { %s7988_s11 = scalar_lea.hbm %s9371_s3, 16 }
  0x41   : > { %p7989_p6 = scmp.ne.s32.totalorder %s9371_s3, %s7988_s11  ;;  %p7995_p5 = scmp.lt.u32.totalorder %s7988_s11, %s9371_s3 }
  0x43   : > { %p7991_p8 = pnand %p7989_p6, %p8261_p0 }
  0x45   : > { %p7992_p11 = pneg %p7991_p8 }
  0x47   : > { %p7997_p7 = pnand %p7995_p5, %p7992_p11 }
  0x49   : > { %8000 = shalt.err (!%p7997_p7)
}
  0x4a   : > { %s8001_s28 = scalar_lea.vmem %s204_s8, 16  ;;  %s8008_s6 = scalar_lea.vmem %s204_s8, 32 }
  0x4b   : > { %p8002_p10 = scmp.ne.s32.totalorder %s204_s8, %s8001_s28  ;;  %p8009_p1 = scmp.lt.s32.totalorder %s204_s8, %s204_s8 }
  0x4c   : > { %p8010_p2 = scmp.lt.s32.totalorder %s8008_s6, %s8001_s28 }
  0x4d   : > { %p8004_p13 = pnand %p8002_p10, %p8261_p0 }
  0x4e   : > { %p8011_p4 = por %p8010_p2, %p8009_p1 }
  0x4f   : > { %p8005_p3 = pneg %p8004_p13 }
  0x51   : > { %p8012_p9 = pnand %p8011_p4, %p8005_p3 }
  0x53   : > { %8015 = shalt.err (!%p8012_p9)
}
  0x54   : > { %7742 = dma.hbm_to_vmem [thread:$0]  (!%p8245_p12), %s9371_s3, 16, %s204_s8, [#allocation10]  }
  0x55   : > { %s8329_s14 = sadd.s32 1, %s8150_s21   ;;  %s32_s29 = sadd.s32 1, %s8146_s20 }
  0x56   : > { %s29_s7 = ssub.s32 %s8150_s21, %s8329_s14  ;;  %p39_p9 = scmp.ne.s32.totalorder %s8146_s20, %s8142_s19 }
  0x57   : > { %p30_p4 = scmp.eq.s32.totalorder %s29_s7, 0  ;;  %p40_p0 = scmp.eq.s32.totalorder %s8150_s21, 0 }
  0x58   : > { %p7754_p6 = scmp.lt.s32.totalorder %s8150_s21, 2  ;;  %p9383_p11 = scmp.eq.s32.totalorder %s8214_s22, 1 }
  0x59   : > { %s8339_s9 = scalar_select %p30_p4, %s8146_s20, %s32_s29  }
  0x5a   : > { %p41_p8 = por %p40_p0, %p39_p9  ;;  %p8343_p5 = por %p9383_p11, %p39_p9 }
  0x5b   : > { %s214_s11 = sand.u32 1, %s8146_s20   ;;  %s7711_s12 = smul.u32 3456, %s8150_s21 }
  0x5c   : > { %s7710_s8 = smul.u32 216, %s214_s11  ;;  %p8349_p12 = pnand %p7754_p6, %p41_p8 }
  0x5d   : > { %s8356_s28 = scalar_lea.hbm %s9368_s0, %s7711_s12  ;;  %s8360_s30 = scalar_lea.sflag [#allocation4], %s214_s11 }
  0x5e   : > { %s218_s6 = scalar_lea.vmem [#allocation3], %s7710_s8  ;;  %s8016_s7 = scalar_lea.hbm %s8356_s28, 3456 }
  0x5f   : > { %s225_s17 = sshll.u32 %s218_s6, 4  ;;  %p8017_p7 = scmp.ne.s32.totalorder %s8356_s28, %s8016_s7  ;;  %s8358_s17 = int_to_ptr.vmem [resolvable:$true] %s225_s17 }
  0x60   : > { %p8018_p10 = pneg %p8349_p12  ;;  %s8021_s15 = scalar_lea.hbm %s9368_s0, 6912 }
  0x61   : > { %p8022_p1 = scmp.lt.u32.totalorder %s8356_s28, %s9368_s0  ;;  %p8023_p2 = scmp.lt.u32.totalorder %s8021_s15, %s8016_s7 }
  0x62   : > { %p8019_p13 = pnand %p8018_p10, %p8017_p7  ;;  %p8025_p9 = scmp.lt.u32.totalorder %s8016_s7, %s8356_s28 }
  0x63   : > { %p8024_p4 = por %p8023_p2, %p8022_p1 }
  0x64   : > { %p8020_p3 = pneg %p8019_p13 }
  0x65   : > { %p8026_p0 = por %p8025_p9, %p8024_p4 }
  0x67   : > { %p8027_p6 = pnand %p8026_p0, %p8020_p3 }
  0x69   : > { %8030 = shalt.err (!%p8027_p6)
}
  0x6a   : > { %s8031_s11 = scalar_lea.vmem %s8358_s17, 3456  ;;  %s8157_s8 = smov [#allocation3]  }
  0x6b   : > { %p8032_p8 = scmp.ne.s32.totalorder %s8358_s17, %s8031_s11  ;;  %s8036_s6 = sshll.u32 %s8157_s8, 4  ;;  %s8037_s6 = int_to_ptr.vmem [resolvable:$false] %s8036_s6 }
  0x6c   : > { %s8038_s23 = scalar_lea.vmem %s8037_s6, 6912  ;;  %p8039_p13 = scmp.lt.s32.totalorder %s8358_s17, %s8037_s6 }
  0x6d   : > { %p8034_p11 = pnand %p8032_p8, %p8018_p10  ;;  %p8040_p1 = scmp.lt.s32.totalorder %s8038_s23, %s8031_s11 }
  0x6f   : > { %p8035_p7 = pneg %p8034_p11  ;;  %p8041_p2 = por %p8040_p1, %p8039_p13 }
  0x71   : > { %p8042_p4 = pnand %p8041_p2, %p8035_p7 }
  0x73   : > { %8045 = shalt.err (!%p8042_p4)
}
  0x74   : > { %s9386_s7 = smov 64   ;;  %p9387_p10 = scmp.ne.s32.totalorder %s9380_s26, 0 }
  0x75   : > { %7746 = dma.hbm_to_vmem [thread:$0]  (!%p8349_p12), %s8356_s28, 3456, %s8358_s17, %s8360_s30, %s9386_s7, %s9386_s7, %s8156_s27  }
  0x76   : > { %237 = sbr.rel (%p9387_p10) target bundleno = 797 (0x31d), region = 36  ;;  %s8394_s29 = sand.u32 (!%p9387_p10), 1, %s8142_s19  }
  0x77   : > { %s7712_s12 = smul.u32 (!%p9387_p10), 216, %s8394_s29  ;;  %s240_s15 = scalar_lea.sflag (!%p9387_p10), [#allocation4], %s8394_s29 }
  0x78   : > { %p9388_p3 = scmp.ne.s32.totalorder (!%p9387_p10), %s9378_s24, 0 }
  0x79   : > { %s8398_s16 = scalar_lea.vmem (!%p9387_p10), [#allocation3], %s7712_s12 }
  0x7d   : > { %8117 = dma.done.wait (%p9388_p3), %s240_s15, 3456  }
  0x7e   : > { %8119 = vsyncadd (%p9388_p3), %s240_s15, 4294963840  ;;  %p9389_p12 = scmp.eq.s32.totalorder %s8214_s22, 0 }
  0x80   : > { %8121 = dma.done.wait (%p9389_p12), [#allocation7], 9232   ;;  %p9390_p9 = pmov %p9389_p12 }
  0x82   : > { %8123 = vsyncadd (%p9390_p9), [#allocation7], 4294958064  ;;  %p9391_p0 = pmov %p9390_p9 }
  0x84   : > { %8125 = dma.done.wait (%p9391_p0), [#allocation10], 16   ;;  %p9392_p6 = pmov %p9391_p0 }
  0x85   : > { %s6259_s26 = sshll.u32 %s8394_s29, 8  ;;  %p9393_p8 = scmp.ne.s32.totalorder %s8214_s22, 0 }
  0x86   : > { %8127 = vsyncadd (%p9392_p6), [#allocation10], 4294967280  ;;  %s8413_s27 = scalar_lea.vmem [#allocation11], %s6259_s26  ;;  %v8158_v0 = vmov (!%p9393_p8), 0.0  }
  0x87   : > { %287 = sbr.rel (%p9393_p8) target bundleno = 142 (0x8e), region = 56  ;;  %288 = vst [vmem:[#allocation12] sm:$0x3] (!%p9393_p8), %v8158_v0 }
  0x8e PF: > { %v7802_v1 = vld [vmem:[#allocation6] sm:$0xff]   ;;  %v7804_v3 = vld [vmem:[#allocation6 + $0x8] sm:$0xff]   ;;  %v7806_v5 = vld [vmem:[#allocation6 + $0x10] sm:$0xff]   ;;  %vm818_vm0 = vsmask.f32 3328  ;;  %vm1687_vm3 = vcmask 1042432  }
  0x8f   : > { %v7803_v2 = vld [vmem:[#allocation6 + $0x100] sm:$0xff]   ;;  %7006 = vmatprep.subr.bf16.mxu1 %v7802_v1  ;;  %v7805_v4 = vld [vmem:[#allocation6 + $0x108] sm:$0xff]   ;;  %v7807_v6 = vld [vmem:[#allocation6 + $0x110] sm:$0xff]   ;;  %vm819_vm1 = vsmask.f32 7440  ;;  %vm1688_vm4 = vcmask 1046532  }
  0x90   : > { %7198 = vmatprep.subr.bf16.mxu0 %v7803_v2  ;;  %7007 = vmatpush3.bf16.msra.mxu1 %v7802_v1  ;;  %v7808_v7 = vld [vmem:[#allocation6 + $0x18] sm:$0xff]   ;;  %v7810_v9 = vld [vmem:[#allocation6 + $0x20] sm:$0xff]   ;;  %v7812_v11 = vld [vmem:[#allocation6 + $0x28] sm:$0xff]   ;;  %p6781_p11 = scmp.ne.s32.totalorder %s8214_s22, 1 }
  0x91   : > { %7199 = vmatpush3.bf16.msra.mxu0 %v7803_v2  ;;  %7008 = vmatprep.subr.bf16.mxu1 %v7804_v3  ;;  %v7809_v8 = vld [vmem:[#allocation6 + $0x118] sm:$0xff]   ;;  %v7811_v10 = vld [vmem:[#allocation6 + $0x120] sm:$0xff]   ;;  %v7813_v12 = vld [vmem:[#allocation6 + $0x128] sm:$0xff]  }
  0x92   : > { %7200 = vmatprep.subr.bf16.mxu0 %v7805_v4  ;;  %v7818_v13 = vld [vmem:[%s8398_s16] sm:$0xff]   ;;  %v6405_v14 = vld [vmem:[%s8398_s16 + $0xc] sm:$0xf]  ;;  %v6406_v15 = vld [vmem:[%s8398_s16 + $0x10] sm:$0xf] }
  0x93   : > { %7022 = vmatprep.mubr.bf16.mxu1 %v7818_v13  ;;  %v6407_v16 = vld [vmem:[%s8398_s16 + $0x14] sm:$0x1]  ;;  %v2688_v17 = vshrl.u32 %v6405_v14, 16  ;;  %v2691_v18 = vshll.u32 %v6405_v14, 16  ;;  %v7814_v19 = vld [vmem:[#allocation6 + $0x30] sm:$0xff]   ;;  %v2697_v20 = vshll.u32 %v6406_v15, 16  ;;  %vm8426_vm2 = vmor %vm818_vm0, %vm819_vm1 }
  0x94   : > { %7009 = vmatpush3.bf16.msra.mxu1 %v7804_v3  ;;  %v2701_v21 = vshrl.u32 %v6406_v15, 16  ;;  %v2707_v22 = vshll.u32 %v6407_v16, 16  ;;  %v7815_v25 = vld [vmem:[#allocation6 + $0x130] sm:$0xff]   ;;  %v6408_v30 = vld [vmem:[%s8398_s16 + $0x18] sm:$0xf]  ;;  %v7816_v33 = vld [vmem:[#allocation6 + $0x38] sm:$0xff]  }
  0x95   : > { %7201 = vmatpush3.bf16.msra.mxu0 %v7805_v4  ;;  %7010 = vmatprep.subr.bf16.mxu1 %v7806_v5  ;;  %v2690_v23 = vrot.slane %v2688_v17, 4  ;;  %v2693_v24 = vrot.slane %v2691_v18, 5  ;;  %v2699_v26 = vrot.slane %v2697_v20, 5  ;;  %v6409_v31 = vld [vmem:[%s8398_s16 + $0x1c] sm:$0xf]  ;;  %v2712_v36 = vshrl.u32 %v6408_v30, 16  ;;  %vm8487_vm5 = vmor %vm1687_vm3, %vm1688_vm4 }
  0x96   : > { %7202 = vmatprep.subr.bf16.mxu0 %v7807_v6  ;;  %v2703_v27 = vrot.slane %v2701_v21, 4  ;;  %v2709_v28 = vrot.slane %v2707_v22, 5  ;;  %v6410_v32 = vld [vmem:[%s8398_s16 + $0x20] sm:$0x1]  ;;  %v2715_v37 = vshll.u32 %v6408_v30, 16  ;;  %v2721_v38 = vshll.u32 %v6409_v31, 16 }
  0x97   : > { %v2694_v29 = vor.u32 %v2693_v24, %v2690_v23  ;;  %v7817_v39 = vld [vmem:[#allocation6 + $0x138] sm:$0xff]   ;;  %v2725_v41 = vshrl.u32 %v6409_v31, 16  ;;  %v2731_v42 = vshll.u32 %v6410_v32, 16  ;;  %v2714_v44 = vrot.slane %v2712_v36, 4  ;;  %v7820_v48 = vld [vmem:[#allocation6 + $0x40] sm:$0xff]   ;;  %v7826_v32 = vld [vmem:[#allocation6 + $0x150] sm:$0xff]  }
  0x98   : > { %7011 = vmatpush3.bf16.msra.mxu1 %v7806_v5  ;;  %v2704_v35 = vor.u32 %v2703_v27, %v2699_v26  ;;  %v2717_v45 = vrot.slane %v2715_v37, 5  ;;  %v2723_v46 = vrot.slane %v2721_v38, 5  ;;  %v7821_v53 = vld [vmem:[#allocation6 + $0x140] sm:$0xff]   ;;  %v6411_v54 = vld [vmem:[%s8398_s16 + $0x24] sm:$0xf] }
  0x99   : > { %7203 = vmatpush3.bf16.msra.mxu0 %v7807_v6  ;;  %7012 = vmatprep.subr.bf16.mxu1 %v7808_v7  ;;  %v2695_v40 = vrot.slane %v2694_v29, 4  ;;  %v2727_v49 = vrot.slane %v2725_v41, 4  ;;  %v2733_v52 = vrot.slane %v2731_v42, 5  ;;  %v7819_v56 = vld [vmem:[%s8398_s16 + $0xc] sm:$0xff]   ;;  %v6412_v58 = vld [vmem:[%s8398_s16 + $0x28] sm:$0xf] }
  0x9a   : > { %7204 = vmatprep.subr.bf16.mxu0 %v7809_v8  ;;  %v2705_v43 = vrot.slane %v2704_v35, 4  ;;  %v2718_v51 = vor.u32 %v2717_v45, %v2714_v44  ;;  %v6413_v59 = vld [vmem:[%s8398_s16 + $0x2c] sm:$0x1]  ;;  %v2736_v60 = vshrl.u32 %v6411_v54, 16  ;;  %v2739_v61 = vshll.u32 %v6411_v54, 16  ;;  %v7823_v3 = vld [vmem:[%s8398_s16 + $0x18] sm:$0xff]  }
  0x9b   : > { %v2700_v47 = vsel %vm8426_vm2, %v2695_v40, %v2699_v26  ;;  %v2728_v57 = vor.u32 %v2727_v49, %v2723_v46  ;;  %v2745_v63 = vshll.u32 %v6412_v58, 16  ;;  %v2749_v0 = vshrl.u32 %v6412_v58, 16  ;;  %v6414_v14 = vld [vmem:[%s8398_s16 + $0x30] sm:$0xf]  ;;  %v6415_v15 = vld [vmem:[%s8398_s16 + $0x34] sm:$0xf] }
  0x9c   : > { %7013 = vmatpush3.bf16.msra.mxu1 %v7808_v7  ;;  %v2710_v50 = vsel %vm8426_vm2, %v2705_v43, %v2709_v28  ;;  %v2719_v62 = vrot.slane %v2718_v51, 4  ;;  %v2755_v1 = vshll.u32 %v6413_v59, 16  ;;  %v2738_v4 = vrot.slane %v2736_v60, 4  ;;  %v7822_v7 = vld [vmem:[#allocation6 + $0x148] sm:$0xff]   ;;  %v7828_v37 = vld [vmem:[%s8398_s16 + $0x30] sm:$0xff]  }
  0x9d   : > { %7205 = vmatpush3.bf16.msra.mxu0 %v7809_v8  ;;  %7014 = vmatprep.subr.bf16.mxu1 %v7810_v9  ;;  %v6453_v55 = vcombine.low %v2700_v47, %v2710_v50  ;;  %v2729_v2 = vrot.slane %v2728_v57, 4  ;;  %v2741_v5 = vrot.slane %v2739_v61, 5  ;;  %v2747_v8 = vrot.slane %v2745_v63, 5  ;;  %v6416_v18 = vld [vmem:[%s8398_s16 + $0x38] sm:$0x1]  ;;  %v7824_v29 = vld [vmem:[%s8398_s16 + $0x24] sm:$0xff]  }
  0x9e   : > { %7206 = vmatprep.subr.bf16.mxu0 %v7811_v10  ;;  %v2724_v6 = vsel %vm8426_vm2, %v2719_v62, %v2723_v46  ;;  %v2763_v20 = vshll.u32 %v6414_v14, 16  ;;  %v2769_v22 = vshll.u32 %v6415_v15, 16  ;;  %v2773_v23 = vshrl.u32 %v6415_v15, 16  ;;  %v6417_v40 = vld [vmem:[%s8398_s16 + $0x3c] sm:$0xf] }
  0x9f   : > { %7214 = vmatprep.mubr.bf16.mxu0 %v6453_v55  ;;  %v2742_v13 = vor.u32 %v2741_v5, %v2738_v4  ;;  %v2779_v24 = vshll.u32 %v6416_v18, 16  ;;  %v6418_v41 = vld [vmem:[%s8398_s16 + $0x40] sm:$0xf]  ;;  %v6419_v42 = vld [vmem:[%s8398_s16 + $0x44] sm:$0x1]  ;;  %v2784_v44 = vshrl.u32 %v6417_v40, 16 }
  0xa0   : > { %7015 = vmatpush3.bf16.msra.mxu1 %v7810_v9  ;;  %v2751_v9 = vrot.slane %v2749_v0, 4  ;;  %v2765_v27 = vrot.slane %v2763_v20, 5  ;;  %v2771_v30 = vrot.slane %v2769_v22, 5  ;;  %v2775_v31 = vrot.slane %v2773_v23, 4  ;;  %v7830_v55 = vld [vmem:[#allocation6 + $0x50] sm:$0xff]  }
  0xa1   : > { %7207 = vmatpush3.bf16.msra.mxu0 %v7811_v10  ;;  %7016 = vmatprep.subr.bf16.mxu1 %v7812_v11  ;;  %v2757_v10 = vrot.slane %v2755_v1, 5  ;;  %v2743_v21 = vrot.slane %v2742_v13, 4  ;;  %v2781_v36 = vrot.slane %v2779_v24, 5  ;;  %v2787_v45 = vshll.u32 %v6417_v40, 16  ;;  %v6420_v59 = vld [vmem:[%s8398_s16 + $0x48] sm:$0xf] }
  0xa2   : > { %7208 = vmatprep.subr.bf16.mxu0 %v7813_v12  ;;  %v2752_v17 = vor.u32 %v2751_v9, %v2747_v8  ;;  %v2793_v46 = vshll.u32 %v6418_v41, 16  ;;  %v2797_v49 = vshrl.u32 %v6418_v41, 16  ;;  %v2803_v50 = vshll.u32 %v6419_v42, 16  ;;  %v6421_v62 = vld [vmem:[%s8398_s16 + $0x4c] sm:$0xf]  ;;  %v7831_v9 = vld [vmem:[#allocation6 + $0x160] sm:$0xff]  }
  0xa3   : > { %v2748_v28 = vsel %vm8426_vm2, %v2743_v21, %v2747_v8  ;;  %v6422_v63 = vld [vmem:[%s8398_s16 + $0x50] sm:$0x1]  ;;  %v2808_v0 = vshrl.u32 %v6420_v59, 16  ;;  %v2811_v1 = vshll.u32 %v6420_v59, 16  ;;  %v2821_v4 = vshrl.u32 %v6421_v62, 16  ;;  %v7832_v24 = vld [vmem:[#allocation6 + $0x168] sm:$0xff]  }
  0xa4   : > { %7017 = vmatpush3.bf16.msra.mxu1 %v7812_v11  ;;  %v7825_v11 = vld [vmem:[#allocation6 + $0x48] sm:$0xff]   ;;  %v2795_v54 = vrot.slane %v2793_v46, 5  ;;  %v2799_v57 = vrot.slane %v2797_v49, 4  ;;  %v2805_v58 = vrot.slane %v2803_v50, 5  ;;  %v2827_v5 = vshll.u32 %v6422_v63, 16  ;;  %v7835_v41 = vld [vmem:[#allocation6 + $0x58] sm:$0xff]  }
  0xa5   : > { %7209 = vmatpush3.bf16.msra.mxu0 %v7813_v12  ;;  %7018 = vmatprep.subr.bf16.mxu1 %v7814_v19  ;;  %v2734_v12 = vsel %vm8426_vm2, %v2729_v2, %v2733_v52  ;;  %v2786_v52 = vrot.slane %v2784_v44, 4  ;;  %v2813_v8 = vrot.slane %v2811_v1, 5  ;;  %v2823_v13 = vrot.slane %v2821_v4, 4  ;;  %v6423_v20 = vld [vmem:[%s8398_s16 + $0x54] sm:$0xf] }
  0xa6   : > { %7210 = vmatprep.subr.bf16.mxu0 %v7815_v25  ;;  %v6454_v16 = vcombine.low %v2724_v6, %v2734_v12  ;;  %v2800_v2 = vor.u32 %v2799_v57, %v2795_v54  ;;  %v2829_v18 = vrot.slane %v2827_v5, 5  ;;  %v6424_v21 = vld [vmem:[%s8398_s16 + $0x58] sm:$0xf]  ;;  %v6426_v44 = vld [vmem:[%s8398_s16 + $0x60] sm:$0xf] }
  0xa7   : > { %v7834_v40 = vld [vmem:[%s8398_s16 + $0x54] sm:$0xff]   ;;  %v6428_v46 = vld [vmem:[%s8398_s16 + $0x68] sm:$0x1]  ;;  %v2859_v49 = vshll.u32 %v6426_v44, 16  ;;  %v6477_v1 = vld [vmem:[%s8398_s16 + $0xc] sm:$0xe] }
  0xa8   : > { %7019 = vmatpush3.bf16.msra.mxu1 %v7814_v19  ;;  %v2760_v19 = vshrl.u32 %v6414_v14, 16 }
  0xa9   : > { %7211 = vmatpush3.bf16.msra.mxu0 %v7815_v25  ;;  %7020 = vmatprep.subr.bf16.mxu1 %v7816_v33  ;;  %v2753_v25 = vrot.slane %v2752_v17, 4  ;;  %v2861_v57 = vrot.slane %v2859_v49, 5  ;;  %v7845_v49 = vld [vmem:[#allocation6 + $0x188] sm:$0xff]  }
  0xaa   : > { %7212 = vmatprep.subr.bf16.mxu0 %v7817_v39  ;;  %v2762_v26 = vrot.slane %v2760_v19, 4  ;;  %v7833_v19 = vld [vmem:[%s8398_s16 + $0x48] sm:$0xff]  }
  0xac   : > { %7021 = vmatpush3.bf16.msra.mxu1 %v7816_v33  ;;  %v2758_v33 = vsel %vm8426_vm2, %v2753_v25, %v2757_v10  ;;  %v2766_v35 = vor.u32 %v2765_v27, %v2762_v26  ;;  %v2801_v10 = vrot.slane %v2800_v2, 4  ;;  %v6425_v25 = vld [vmem:[%s8398_s16 + $0x5c] sm:$0x1]  ;;  %v2832_v26 = vshrl.u32 %v6423_v20, 16 }
  0xad   : > { %7213 = vmatpush3.bf16.msra.mxu0 %v7817_v39  ;;  %7054 = vmatprep.subr.bf16.mxu1 %v7820_v48  ;;  %v6455_v38 = vcombine.low %v2748_v28, %v2758_v33  ;;  %v2776_v39 = vor.u32 %v2775_v31, %v2771_v30  ;;  %v2835_v27 = vshll.u32 %v6423_v20, 16  ;;  %v2851_v31 = vshll.u32 %v6425_v25, 16 }
  0xae   : > { %7246 = vmatprep.subr.bf16.mxu0 %v7821_v53  ;;  %v2767_v43 = vrot.slane %v2766_v35, 4  ;;  %v2834_v33 = vrot.slane %v2832_v26, 4 }
  0xaf   : > { %7023 = vmatmul.mubr.bf16.vlgmr.msra.gmra.mrb[0].mxu1 %v7819_v56  ;;  %v2777_v47 = vrot.slane %v2776_v39, 4  ;;  %v2837_v35 = vrot.slane %v2835_v27, 5  ;;  %v2853_v39 = vrot.slane %v2851_v31, 5 }
  0xb0   : > { %7215 = vmatmul.mubr.bf16.vlgmr.msra.gmra.mrb[0].mxu0 %v6454_v16  ;;  %7055 = vmatpush3.bf16.msra.mxu1 %v7820_v48  ;;  %v7827_v48 = vld [vmem:[#allocation6 + $0x158] sm:$0xff]   ;;  %v2772_v51 = vsel %vm8426_vm2, %v2767_v43, %v2771_v30  ;;  %v2806_v16 = vsel %vm8426_vm2, %v2801_v10, %v2805_v58  ;;  %v2845_v30 = vshrl.u32 %v6424_v21, 16 }
  0xb1   : > { %7247 = vmatpush3.bf16.msra.mxu0 %v7821_v53  ;;  %7026 = vmatprep.mubr.bf16.mxu1 %v7823_v3  ;;  %v2789_v53 = vrot.slane %v2787_v45, 5  ;;  %v2782_v56 = vsel %vm8426_vm2, %v2777_v47, %v2781_v36  ;;  %v2817_v3 = vshll.u32 %v6421_v62, 16  ;;  %v2838_v43 = vor.u32 %v2837_v35, %v2834_v33  ;;  %v6427_v45 = vld [vmem:[%s8398_s16 + $0x64] sm:$0xf]  ;;  %v6485_v33 = vld [vmem:[%s8398_s16 + $0x2c] sm:$0x1] }
  0xb2   : > { %7248 = vmatprep.subr.bf16.mxu0 %v7822_v7  ;;  %7056 = vmatprep.subr.bf16.mxu1 %v7825_v11  ;;  %v6456_v60 = vcombine.low %v2772_v51, %v2782_v56  ;;  %v2865_v50 = vshll.u32 %v6427_v45, 16  ;;  %v7836_v51 = vld [vmem:[#allocation6 + $0x170] sm:$0xff]  }
  0xb3   : > { %7218 = vmatprep.mubr.bf16.mxu0 %v6455_v38  ;;  %v2790_v61 = vor.u32 %v2789_v53, %v2786_v52  ;;  %v2819_v12 = vrot.slane %v2817_v3, 5  ;;  %v2847_v38 = vrot.slane %v2845_v30, 4  ;;  %v2839_v52 = vrot.slane %v2838_v43, 4  ;;  %v6483_v30 = vld [vmem:[%s8398_s16 + $0x24] sm:$0xe] }
  0xb4   : > { %7057 = vmatpush3.bf16.msra.mxu1 %v7825_v11  ;;  %v7829_v11 = vld [vmem:[%s8398_s16 + $0x3c] sm:$0xff]   ;;  %v2869_v53 = vshrl.u32 %v6427_v45, 16  ;;  %v2867_v58 = vrot.slane %v2865_v50, 5  ;;  %v6527_v35 = vrot.slane %v6483_v30, 9  ;;  %v7843_v43 = vld [vmem:[%s8398_s16 + $0x84] sm:$0xff]  }
  0xb5   : > { %7249 = vmatpush3.bf16.msra.mxu0 %v7822_v7  ;;  %7058 = vmatprep.subr.bf16.mxu1 %v7830_v55  ;;  %v2791_v6 = vrot.slane %v2790_v61, 4  ;;  %v2810_v7 = vrot.slane %v2808_v0, 4  ;;  %v2824_v17 = vor.u32 %v2823_v13, %v2819_v12  ;;  %v7837_v61 = vld [vmem:[#allocation6 + $0x178] sm:$0xff]   ;;  %v7838_v0 = vld [vmem:[%s8398_s16 + $0x60] sm:$0xff]  }
  0xb6   : > { %7250 = vmatprep.subr.bf16.mxu0 %v7826_v32  ;;  %v6487_v45 = vld [vmem:[%s8398_s16 + $0x34] sm:$0xf]  ;;  %v6500_v30 = vld [vmem:[%s8398_s16 + $0x68] sm:$0x1] }
  0xb7   : > { %7027 = vmatmul.mubr.bf16.gmra.mrb[4].mxu1 %v7824_v29  ;;  %v2796_v14 = vsel %vm8426_vm2, %v2791_v6, %v2795_v54  ;;  %v2814_v15 = vor.u32 %v2813_v8, %v2810_v7  ;;  %v2825_v28 = vrot.slane %v2824_v17, 4  ;;  %v2841_v29 = vshll.u32 %v6424_v21, 16  ;;  %v6478_v6 = vld [vmem:[%s8398_s16 + $0x10] sm:$0xf]  ;;  %v6479_v7 = vld [vmem:[%s8398_s16 + $0x14] sm:$0x1] }
  0xb8   : > { %7030 = vmatprep.mubr.bf16.mxu1 %v7828_v37  ;;  %7059 = vmatpush3.bf16.msra.mxu1 %v7830_v55  ;;  %v6457_v22 = vcombine.low %v2796_v14, %v2806_v16  ;;  %v2875_v54 = vshll.u32 %v6428_v46, 16  ;;  %v6525_v8 = vrot.slane %v6477_v1, 9  ;;  %v3555_v10 = vrot.slane %v6478_v6, 5  ;;  %v7841_v14 = vld [vmem:[#allocation6 + $0x180] sm:$0xff]   ;;  %v6492_v1 = vld [vmem:[%s8398_s16 + $0x48] sm:$0xe] }
  0xb9   : > { %7251 = vmatpush3.bf16.msra.mxu0 %v7826_v32  ;;  %v2815_v23 = vrot.slane %v2814_v15, 4  ;;  %v2830_v36 = vsel %vm8426_vm2, %v2825_v28, %v2829_v18  ;;  %v2843_v37 = vrot.slane %v2841_v29, 5  ;;  %7060 = vmatprep.subr.bf16.mxu1 %v7835_v41  ;;  %v7839_v18 = vld [vmem:[%s8398_s16 + $0x6c] sm:$0xff]   ;;  %v6481_v21 = vld [vmem:[%s8398_s16 + $0x1c] sm:$0xf] }
  0xba   : > { %7219 = vmatmul.mubr.bf16.gmra.mrb[4].mxu0 %v6456_v60  ;;  %7252 = vmatprep.subr.bf16.mxu0 %v7827_v48  ;;  %v2871_v60 = vrot.slane %v2869_v53, 4  ;;  %v2877_v4 = vrot.slane %v2875_v54, 5  ;;  %v3556_v16 = vsel %vm8487_vm5, %v6525_v8, %v3555_v10  ;;  %v3557_v17 = vrot.slane %v3555_v10, 4  ;;  %v6493_v6 = vld [vmem:[%s8398_s16 + $0x4c] sm:$0xf] }
  0xbb   : > { %7222 = vmatprep.mubr.bf16.mxu0 %v6457_v22  ;;  %v2820_v32 = vsel %vm8426_vm2, %v2815_v23, %v2819_v12  ;;  %v2848_v47 = vor.u32 %v2847_v38, %v2843_v37  ;;  %v2844_v59 = vsel %vm8426_vm2, %v2839_v52, %v2843_v37  ;;  %v7840_v12 = vld [vmem:[#allocation6 + $0x60] sm:$0xff]   ;;  %v6482_v22 = vld [vmem:[%s8398_s16 + $0x20] sm:$0x1]  ;;  %v3562_v27 = vrot.slane %v6481_v21, 5 }
  0xbc   : > { %v6458_v42 = vcombine.low %v2820_v32, %v2830_v36  ;;  %7061 = vmatpush3.bf16.msra.mxu1 %v7835_v41  ;;  %v2872_v3 = vor.u32 %v2871_v60, %v2867_v58  ;;  %v3565_v28 = vrot.slane %v6482_v22, 5  ;;  %v6484_v32 = vld [vmem:[%s8398_s16 + $0x28] sm:$0xf]  ;;  %v3572_v38 = vrot.slane %v6485_v33, 5 }
  0xbd   : > { %7253 = vmatpush3.bf16.msra.mxu0 %v7827_v48  ;;  %v2856_v48 = vshrl.u32 %v6426_v44, 16  ;;  %v2849_v55 = vrot.slane %v2848_v47, 4  ;;  %7062 = vmatprep.subr.bf16.mxu1 %v7840_v12  ;;  %v3564_v31 = vrot.slane %v3562_v27, 4  ;;  %v3569_v37 = vrot.slane %v6484_v32, 5  ;;  %v6486_v44 = vld [vmem:[%s8398_s16 + $0x30] sm:$0xe] }
  0xbe   : > { %7254 = vmatprep.subr.bf16.mxu0 %v7831_v9  ;;  %v2873_v13 = vrot.slane %v2872_v3, 4  ;;  %v6488_v47 = vld [vmem:[%s8398_s16 + $0x38] sm:$0x1]  ;;  %v7848_v60 = vld [vmem:[#allocation6 + $0x70] sm:$0xff]   ;;  %v6530_v8 = vrot.slane %v6492_v1, 9  ;;  %v7853_v32 = vld [vmem:[#allocation6 + $0x198] sm:$0xff]  }
  0xbf   : > { %7031 = vmatmul.mubr.bf16.gmra.mrb[8].mxu1 %v7829_v11  ;;  %v2858_v56 = vrot.slane %v2856_v48, 4  ;;  %v2854_v62 = vsel %vm8426_vm2, %v2849_v55, %v2853_v39  ;;  %v3558_v11 = vrot.slane %v6479_v7, 5  ;;  %v3566_v39 = vsel %vm8487_vm5, %v3564_v31, %v3565_v28  ;;  %v7846_v55 = vld [vmem:[%s8398_s16 + $0x90] sm:$0xff]   ;;  %v6498_v28 = vld [vmem:[%s8398_s16 + $0x60] sm:$0xe] }
  0xc0   : > { %7034 = vmatprep.mubr.bf16.mxu1 %v7833_v19  ;;  %v6459_v2 = vcombine.low %v2844_v59, %v2854_v62  ;;  %v6480_v19 = vld [vmem:[%s8398_s16 + $0x18] sm:$0xe]  ;;  %v2878_v20 = vsel %vm8426_vm2, %v2873_v13, %v2877_v4  ;;  %7063 = vmatpush3.bf16.msra.mxu1 %v7840_v12  ;;  %v3570_v41 = vsel %vm8487_vm5, %v6527_v35, %v3569_v37  ;;  %v3576_v48 = vrot.slane %v6487_v45, 5  ;;  %v7847_v4 = vld [vmem:[%s8398_s16 + $0x9c] sm:$0xff]   ;;  %v6494_v7 = vld [vmem:[%s8398_s16 + $0x50] sm:$0x1] }
  0xc1   : > { %7255 = vmatpush3.bf16.msra.mxu0 %v7831_v9  ;;  %v2862_v63 = vor.u32 %v2861_v57, %v2858_v56  ;;  %v6526_v23 = vrot.slane %v6480_v19, 9  ;;  %v3559_v26 = vsel %vm8487_vm5, %v3557_v17, %v3558_v11  ;;  %v3579_v52 = vrot.slane %v6488_v47, 5  ;;  %v6489_v56 = vld [vmem:[%s8398_s16 + $0x3c] sm:$0xe]  ;;  %v6490_v57 = vld [vmem:[%s8398_s16 + $0x40] sm:$0xf] }
  0xc2   : > { %7256 = vmatprep.subr.bf16.mxu0 %v7832_v24  ;;  %7223 = vmatmul.mubr.bf16.gmra.mrb[8].mxu0 %v6458_v42  ;;  %v6541_v29 = vcombine.low %v3556_v16, %v3559_v26  ;;  %v3571_v42 = vrot.slane %v3569_v37, 4  ;;  %v3578_v54 = vrot.slane %v3576_v48, 4  ;;  %v6529_v59 = vrot.slane %v6489_v56, 9  ;;  %v7849_v13 = vld [vmem:[#allocation6 + $0x190] sm:$0xff]   ;;  %v6495_v17 = vld [vmem:[%s8398_s16 + $0x54] sm:$0xe] }
  0xc3   : > { %v2863_v9 = vrot.slane %v2862_v63, 4  ;;  %7226 = vmatprep.mubr.bf16.mxu0 %v6459_v2  ;;  %v3563_v36 = vsel %vm8487_vm5, %v6526_v23, %v3562_v27  ;;  %v3593_v12 = vrot.slane %v6494_v7, 5  ;;  %v7850_v16 = vld [vmem:[%s8398_s16 + $0xa8] sm:$0xff]   ;;  %v6497_v19 = vld [vmem:[%s8398_s16 + $0x5c] sm:$0x1]  ;;  %v6532_v31 = vrot.slane %v6498_v28, 9 }
  0xc4   : > { %v6542_v46 = vcombine.low %v3563_v36, %v3566_v39  ;;  %v3573_v50 = vsel %vm8487_vm5, %v3571_v42, %v3572_v38  ;;  %v3600_v22 = vrot.slane %v6497_v19, 5  ;;  %v7852_v27 = vld [vmem:[#allocation6 + $0x78] sm:$0xff]   ;;  %v3607_v37 = vrot.slane %v6500_v30, 5  ;;  %v6506_v30 = vld [vmem:[%s8398_s16 + $0x80] sm:$0x1] }
  0xc5   : > { %7257 = vmatpush3.bf16.msra.mxu0 %v7832_v24  ;;  %v2868_v15 = vsel %vm8426_vm2, %v2863_v9, %v2867_v58  ;;  %v7842_v24 = vld [vmem:[%s8398_s16 + $0x78] sm:$0xff]   ;;  %v6543_v53 = vcombine.low %v3570_v41, %v3573_v50  ;;  %v6491_v58 = vld [vmem:[%s8398_s16 + $0x44] sm:$0x1]  ;;  %v3590_v9 = vrot.slane %v6493_v6, 5  ;;  %v772_v42 = vld [vmem:[%s8398_s16 + $0x8] sm:$0x1] }
  0xc6   : > { %7258 = vmatprep.subr.bf16.mxu0 %v7836_v51  ;;  %v6460_v25 = vcombine.low %v2868_v15, %v2878_v20  ;;  %v3586_v62 = vrot.slane %v6491_v58, 5  ;;  %v6531_v20 = vrot.slane %v6495_v17, 9  ;;  %v7851_v35 = vld [vmem:[%s8398_s16 + $0xb4] sm:$0xff]   ;;  %v771_v41 = vld [vmem:[%s8398_s16 + $0x4] sm:$0xf] }
  0xc7   : > { %7035 = vmatmul.mubr.bf16.gmra.mrb[12].mxu1 %v7834_v40  ;;  %v7844_v40 = vld [vmem:[#allocation6 + $0x68] sm:$0xff]   ;;  %v3592_v15 = vrot.slane %v3590_v9, 4  ;;  %v3591_v23 = vsel %vm8487_vm5, %v6530_v8, %v3590_v9  ;;  %v6501_v47 = vld [vmem:[%s8398_s16 + $0x6c] sm:$0xe]  ;;  %v835_v50 = vshrl.u32 %v771_v41, 16 }
  0xc8   : > { %7038 = vmatprep.mubr.bf16.mxu1 %v7838_v0  ;;  %7064 = vmatprep.subr.bf16.mxu1 %v7844_v40  ;;  %v3580_v0 = vsel %vm8487_vm5, %v3578_v54, %v3579_v52  ;;  %v6502_v52 = vld [vmem:[%s8398_s16 + $0x70] sm:$0xf]  ;;  %v775_v7 = vld [vmem:[%s8398_s16 + $0x14] sm:$0x1] }
  0xc9   : > { %7259 = vmatpush3.bf16.msra.mxu0 %v7836_v51  ;;  %v6528_v51 = vrot.slane %v6486_v44, 9  ;;  %7065 = vmatpush3.bf16.msra.mxu1 %v7844_v40  ;;  %v770_v40 = vld [vmem:[%s8398_s16] sm:$0xf]  ;;  %v3611_v58 = vrot.slane %v6502_v52, 5  ;;  %v774_v6 = vld [vmem:[%s8398_s16 + $0x10] sm:$0xf] }
  0xca   : > { %7260 = vmatprep.subr.bf16.mxu0 %v7837_v61  ;;  %7227 = vmatmul.mubr.bf16.gmra.mrb[12].mxu0 %v6460_v25  ;;  %v822_v45 = vshrl.u32 %v770_v40, 16 }
  0xcb   : > { %7262 = vmatprep.mubr.bf16.mxu0 %v6541_v29  ;;  %v3577_v63 = vsel %vm8487_vm5, %v6528_v51, %v3576_v48  ;;  %7066 = vmatprep.subr.bf16.mxu1 %v7848_v60  ;;  %v6499_v29 = vld [vmem:[%s8398_s16 + $0x64] sm:$0xf]  ;;  %v8561_v48 = vld [vmem:[#allocation6 + $0x80] sm:$0xff]   ;;  %v841_v51 = vshll.u32 %v772_v42, 16 }
  0xcc   : > { %v6544_v10 = vcombine.low %v3577_v63, %v3580_v0  ;;  %v3604_v36 = vrot.slane %v6499_v29, 5  ;;  %v773_v0 = vld [vmem:[%s8398_s16 + $0xc] sm:$0xf]  ;;  %v777_v42 = vld [vmem:[%s8398_s16 + $0x1c] sm:$0xf] }
  0xcd   : > { %7261 = vmatpush3.bf16.msra.mxu0 %v7837_v61  ;;  %v3583_v61 = vrot.slane %v6490_v57, 5  ;;  %7067 = vmatpush3.bf16.msra.mxu1 %v7848_v60  ;;  %v6503_v57 = vld [vmem:[%s8398_s16 + $0x74] sm:$0x1]  ;;  %v843_v63 = vrot.slane %v841_v51, 5  ;;  %v846_v9 = vshrl.u32 %v773_v0, 16  ;;  %v883_v52 = vshrl.u32 %v777_v42, 16 }
  0xce   : > { %7294 = vmatprep.subr.bf16.mxu0 %v7841_v14  ;;  %7068 = vmatprep.subr.bf16.mxu1 %v7852_v27  ;;  %v3606_v44 = vrot.slane %v3604_v36, 4 }
  0xcf   : > { %7039 = vmatmul.mubr.bf16.gmra.mrb[16].mxu1 %v7839_v18  ;;  %v3584_v2 = vsel %vm8487_vm5, %v6529_v59, %v3583_v61  ;;  %v3585_v3 = vrot.slane %v3583_v61, 4  ;;  %v6496_v18 = vld [vmem:[%s8398_s16 + $0x58] sm:$0xf]  ;;  %v848_v19 = vrot.slane %v846_v9, 4 }
  0xd0   : > { %7042 = vmatprep.mubr.bf16.mxu1 %v7842_v24  ;;  %v3597_v21 = vrot.slane %v6496_v18, 5  ;;  %v3594_v24 = vsel %vm8487_vm5, %v3592_v15, %v3593_v12  ;;  %v3608_v54 = vsel %vm8487_vm5, %v3606_v44, %v3607_v37  ;;  %v7855_v59 = vld [vmem:[#allocation6 + $0x1a0] sm:$0xff]   ;;  %v7857_v12 = vld [vmem:[#allocation6 + $0x1a8] sm:$0xff]   ;;  %v859_v15 = vshrl.u32 %v774_v6, 16 }
  0xd1   : > { %v3587_v11 = vsel %vm8487_vm5, %v3585_v3, %v3586_v62  ;;  %v6546_v38 = vcombine.low %v3591_v23, %v3594_v24  ;;  %7069 = vmatpush3.bf16.msra.mxu1 %v7852_v27  ;;  %v837_v62 = vrot.slane %v835_v50, 4  ;;  %v3613_v3 = vrot.slane %v3611_v58, 4  ;;  %v6505_v27 = vld [vmem:[%s8398_s16 + $0x7c] sm:$0xf]  ;;  %v776_v37 = vld [vmem:[%s8398_s16 + $0x18] sm:$0xf] }
  0xd2   : > { %7263 = vmatmul.mubr.bf16.vlgmr.msra.gmra.mrb[0].mxu0 %v6542_v46  ;;  %v3598_v25 = vsel %vm8487_vm5, %v6531_v20, %v3597_v21  ;;  %v3599_v26 = vrot.slane %v3597_v21, 4  ;;  %v825_v46 = vshll.u32 %v770_v40, 16  ;;  %7102 = vmatprep.subr.bf16.mxu1 %v8561_v48  ;;  %v6504_v21 = vld [vmem:[%s8398_s16 + $0x78] sm:$0xe] }
  0xd3   : > { %7295 = vmatpush3.bf16.msra.mxu0 %v7841_v14  ;;  %7266 = vmatprep.mubr.bf16.mxu0 %v6543_v53  ;;  %v6545_v14 = vcombine.low %v3584_v2, %v3587_v11  ;;  %v6533_v53 = vrot.slane %v6501_v47, 9  ;;  %v855_v11 = vshll.u32 %v774_v6, 16  ;;  %v879_v47 = vshll.u32 %v777_v42, 16 }
  0xd4   : > { %7296 = vmatprep.subr.bf16.mxu0 %v7845_v49  ;;  %v3601_v33 = vsel %vm8487_vm5, %v3599_v26, %v3600_v22  ;;  %v827_v56 = vrot.slane %v825_v46, 5  ;;  %v7859_v22 = vld [vmem:[#allocation6 + $0x1b0] sm:$0xff]   ;;  %v873_v46 = vshll.u32 %v776_v37, 16 }
  0xd5   : > { %v6547_v39 = vcombine.low %v3598_v25, %v3601_v33  ;;  %v3612_v2 = vsel %vm8487_vm5, %v6533_v53, %v3611_v58  ;;  %v857_v24 = vrot.slane %v855_v11, 5  ;;  %v861_v25 = vrot.slane %v859_v15, 4 }
  0xd7   : > { %7043 = vmatmul.mubr.bf16.gmra.mrb[20].mxu1 %v7843_v43  ;;  %7297 = vmatpush3.bf16.msra.mxu0 %v7845_v49  ;;  %v8558_v43 = vsel %vm8487_vm5, %v6532_v31, %v3604_v36  ;;  %v831_v49 = vshll.u32 %v771_v41, 16  ;;  %v6534_v31 = vrot.slane %v6504_v21, 9  ;;  %v3621_v36 = vrot.slane %v6506_v30, 5 }
  0xd8   : > { %7046 = vmatprep.mubr.bf16.mxu1 %v7846_v55  ;;  %7298 = vmatprep.subr.bf16.mxu0 %v7849_v13  ;;  %v824_v55 = vrot.slane %v822_v45, 4  ;;  %v6548_v60 = vcombine.low %v8558_v43, %v3608_v54  ;;  %v778_v43 = vld [vmem:[%s8398_s16 + $0x20] sm:$0x1]  ;;  %v870_v45 = vshrl.u32 %v776_v37, 16  ;;  %v6508_v54 = vld [vmem:[%s8398_s16 + $0x88] sm:$0xf] }
  0xd9   : > { %v833_v61 = vrot.slane %v831_v49, 5  ;;  %v6507_v49 = vld [vmem:[%s8398_s16 + $0x84] sm:$0xe]  ;;  %v889_v53 = vshll.u32 %v778_v43, 16 }
  0xda   : > { %7267 = vmatmul.mubr.bf16.gmra.mrb[4].mxu0 %v6544_v10  ;;  %v828_v1 = vor.u32 %v827_v56, %v824_v55  ;;  %v849_v10 = vshll.u32 %v773_v0, 16  ;;  %v6509_v55 = vld [vmem:[%s8398_s16 + $0x8c] sm:$0x1]  ;;  %v872_v58 = vrot.slane %v870_v45, 4  ;;  %v885_v0 = vrot.slane %v883_v52, 4 }
  0xdb   : > { %7270 = vmatprep.mubr.bf16.mxu0 %v6545_v14  ;;  %7299 = vmatpush3.bf16.msra.mxu0 %v7849_v13  ;;  %v838_v8 = vor.u32 %v837_v62, %v833_v61  ;;  %v6535_v6 = vrot.slane %v6507_v49, 9  ;;  %v6514_v52 = vld [vmem:[%s8398_s16 + $0xa0] sm:$0xf] }
  0xdc   : > { %7300 = vmatprep.subr.bf16.mxu0 %v7853_v32  ;;  %v829_v13 = vrot.slane %v828_v1, 4  ;;  %v851_v20 = vrot.slane %v849_v10, 5  ;;  %v891_v1 = vrot.slane %v889_v53, 5 }
  0xdd   : > { %v839_v17 = vrot.slane %v838_v8, 4  ;;  %v3628_v8 = vrot.slane %v6509_v55, 5 }
  0xde   : > { %v834_v23 = vsel %vm8426_vm2, %v829_v13, %v833_v61  ;;  %v852_v29 = vor.u32 %v851_v20, %v848_v19  ;;  %v780_v61 = vld [vmem:[%s8398_s16 + $0x28] sm:$0xf]  ;;  %v8604_v19 = vld [vmem:[#allocation6 + $0x1c0] sm:$0xff]  }
  0xdf   : > { %7047 = vmatmul.mubr.bf16.gmra.mrb[24].mxu1 %v7847_v4  ;;  %7301 = vmatpush3.bf16.msra.mxu0 %v7853_v32  ;;  %v3614_v4 = vrot.slane %v6503_v57, 5  ;;  %v844_v28 = vsel %vm8426_vm2, %v839_v17, %v843_v63  ;;  %v3618_v32 = vrot.slane %v6505_v27, 5  ;;  %v881_v63 = vrot.slane %v879_v47, 5  ;;  %v7858_v13 = vld [vmem:[#allocation6 + $0x90] sm:$0xff]  }
  0xe0   : > { %7050 = vmatprep.mubr.bf16.mxu1 %v7850_v16  ;;  %7302 = vmatprep.subr.bf16.mxu0 %v7855_v59  ;;  %v865_v16 = vshll.u32 %v775_v7, 16  ;;  %v6285_v33 = vcombine.low %v834_v23, %v844_v28  ;;  %v3625_v7 = vrot.slane %v6508_v54, 5  ;;  %v907_v17 = vshrl.u32 %v780_v61, 16  ;;  %v6512_v28 = vld [vmem:[%s8398_s16 + $0x98] sm:$0x1] }
  0xe1   : > { %v3615_v14 = vsel %vm8487_vm5, %v3613_v3, %v3614_v4  ;;  %v3619_v40 = vsel %vm8487_vm5, %v6534_v31, %v3618_v32  ;;  %v3620_v41 = vrot.slane %v3618_v32, 4  ;;  %v7856_v3 = vld [vmem:[#allocation6 + $0x88] sm:$0xff]   ;;  %v886_v9 = vor.u32 %v885_v0, %v881_v63 }
  0xe2   : > { %7271 = vmatmul.mubr.bf16.gmra.mrb[8].mxu0 %v6546_v38  ;;  %v6549_v18 = vcombine.low %v3612_v2, %v3615_v14  ;;  %v867_v26 = vrot.slane %v865_v16, 5  ;;  %v7861_v38 = vld [vmem:[#allocation6 + $0x1b8] sm:$0xff]   ;;  %v3626_v15 = vsel %vm8487_vm5, %v6535_v6, %v3625_v7  ;;  %v3627_v16 = vrot.slane %v3625_v7, 4  ;;  %v7863_v6 = vld [vmem:[#allocation6 + $0xa0] sm:$0xff]  }
  0xe3   : > { %7274 = vmatprep.mubr.bf16.mxu0 %v6547_v39  ;;  %7303 = vmatpush3.bf16.msra.mxu0 %v7855_v59  ;;  %v853_v39 = vrot.slane %v852_v29, 4  ;;  %v3622_v51 = vsel %vm8487_vm5, %v3620_v41, %v3621_v36  ;;  %v875_v59 = vrot.slane %v873_v46, 5  ;;  %v781_v2 = vld [vmem:[%s8398_s16 + $0x2c] sm:$0x1]  ;;  %v887_v20 = vrot.slane %v886_v9, 4 }
  0xe4   : > { %7304 = vmatprep.subr.bf16.mxu0 %v7857_v12  ;;  %v6550_v57 = vcombine.low %v3619_v40, %v3622_v51  ;;  %v913_v27 = vshll.u32 %v781_v2, 16  ;;  %v783_v40 = vld [vmem:[%s8398_s16 + $0x34] sm:$0xf]  ;;  %v784_v41 = vld [vmem:[%s8398_s16 + $0x38] sm:$0x1]  ;;  %v3635_v43 = vrot.slane %v6512_v28, 5 }
  0xe5   : > { %v858_v50 = vsel %vm8426_vm2, %v853_v39, %v857_v24  ;;  %v876_v4 = vor.u32 %v875_v59, %v872_v58  ;;  %v892_v29 = vsel %vm8426_vm2, %v887_v20, %v891_v1  ;;  %v6513_v46 = vld [vmem:[%s8398_s16 + $0x9c] sm:$0xe]  ;;  %v927_v51 = vshll.u32 %v783_v40, 16 }
  0xe6   : > { %v3639_v9 = vrot.slane %v6514_v52, 5 }
  0xe7   : > { %7051 = vmatmul.mubr.bf16.gmra.mrb[28].mxu1 %v7851_v35  ;;  %v862_v35 = vor.u32 %v861_v25, %v857_v24  ;;  %7305 = vmatpush3.bf16.msra.mxu0 %v7857_v12  ;;  %v903_v12 = vshll.u32 %v780_v61, 16  ;;  %v877_v14 = vrot.slane %v876_v4, 4  ;;  %v6511_v24 = vld [vmem:[%s8398_s16 + $0x94] sm:$0xf]  ;;  %v3629_v25 = vsel %vm8487_vm5, %v3627_v16, %v3628_v8  ;;  %v787_v4 = vld [vmem:[%s8398_s16 + $0x44] sm:$0x1] }
  0xe8   : > { %7306 = vmatprep.subr.bf16.mxu0 %v7859_v22  ;;  %7070 = vmatprep.mubr.bf16.mxu1 %v6285_v33  ;;  %v6551_v30 = vcombine.low %v3626_v15, %v3629_v25  ;;  %v782_v33 = vld [vmem:[%s8398_s16 + $0x30] sm:$0xf]  ;;  %v3632_v39 = vrot.slane %v6511_v24, 5  ;;  %v937_v61 = vshll.u32 %v784_v41, 16  ;;  %v6537_v8 = vrot.slane %v6513_v46, 9 }
  0xe9   : > { %v863_v44 = vrot.slane %v862_v35, 4  ;;  %v905_v23 = vrot.slane %v903_v12, 5  ;;  %v7860_v35 = vld [vmem:[#allocation6 + $0x98] sm:$0xff]   ;;  %v921_v45 = vshll.u32 %v782_v33, 16 }
  0xea   : > { %7275 = vmatmul.mubr.bf16.gmra.mrb[12].mxu0 %v6548_v60  ;;  %v779_v60 = vld [vmem:[%s8398_s16 + $0x24] sm:$0xf]  ;;  %v939_v7 = vrot.slane %v937_v61, 5  ;;  %v6516_v15 = vld [vmem:[%s8398_s16 + $0xa8] sm:$0xe]  ;;  %v3640_v16 = vsel %vm8487_vm5, %v6537_v8, %v3639_v9 }
  0xeb   : > { %7278 = vmatprep.mubr.bf16.mxu0 %v6549_v18  ;;  %v868_v56 = vsel %vm8426_vm2, %v863_v44, %v867_v26  ;;  %7307 = vmatpush3.bf16.msra.mxu0 %v7859_v22  ;;  %v894_v10 = vshrl.u32 %v779_v60, 16  ;;  %v897_v11 = vshll.u32 %v779_v60, 16  ;;  %v6510_v18 = vld [vmem:[%s8398_s16 + $0x90] sm:$0xe]  ;;  %v909_v26 = vrot.slane %v907_v17, 4 }
  0xec   : > { %v6286_v62 = vcombine.low %v858_v50, %v868_v56  ;;  %7308 = vmatprep.subr.bf16.mxu0 %v7861_v38  ;;  %v6536_v32 = vrot.slane %v6510_v18, 9  ;;  %v918_v44 = vshrl.u32 %v782_v33, 16  ;;  %v3634_v50 = vrot.slane %v3632_v39, 4  ;;  %v6518_v25 = vld [vmem:[%s8398_s16 + $0xb0] sm:$0x1] }
  0xed   : > { %v896_v21 = vrot.slane %v894_v10, 4  ;;  %v899_v22 = vrot.slane %v897_v11, 5  ;;  %v910_v37 = vor.u32 %v909_v26, %v905_v23  ;;  %v923_v55 = vrot.slane %v921_v45, 5  ;;  %v7867_v26 = vld [vmem:[#allocation6 + $0xa8] sm:$0xff]   ;;  %v7875_v8 = vld [vmem:[#allocation6 + $0xb8] sm:$0xff]  }
  0xee   : > { %v3633_v49 = vsel %vm8487_vm5, %v6536_v32, %v3632_v39  ;;  %v920_v54 = vrot.slane %v918_v44, 4  ;;  %v931_v56 = vshrl.u32 %v783_v40, 16  ;;  %v3636_v59 = vsel %vm8487_vm5, %v3634_v50, %v3635_v43  ;;  %v790_v43 = vld [vmem:[%s8398_s16 + $0x50] sm:$0x1] }
  0xef   : > { %7071 = vmatmul.mubr.bf16.vlgmr.msra.gmra.mrb[0].mxu1 %v6286_v62  ;;  %7309 = vmatpush3.bf16.msra.mxu0 %v7861_v38  ;;  %v900_v31 = vor.u32 %v899_v22, %v896_v21  ;;  %v915_v38 = vrot.slane %v913_v27, 5  ;;  %v911_v47 = vrot.slane %v910_v37, 4  ;;  %v929_v60 = vrot.slane %v927_v51, 5  ;;  %v785_v62 = vld [vmem:[%s8398_s16 + $0x3c] sm:$0xf]  ;;  %v7871_v37 = vld [vmem:[#allocation6 + $0xb0] sm:$0xff]  }
  0xf0   : > { %7103 = vmatpush3.bf16.msra.mxu1 %v8561_v48  ;;  %v882_v48 = vsel %vm8426_vm2, %v877_v14, %v881_v63  ;;  %7342 = vmatprep.subr.bf16.mxu0 %v8604_v19  ;;  %v786_v63 = vld [vmem:[%s8398_s16 + $0x40] sm:$0xf]  ;;  %v6552_v1 = vcombine.low %v3633_v49, %v3636_v59  ;;  %v924_v2 = vor.u32 %v923_v55, %v920_v54  ;;  %v942_v14 = vshrl.u32 %v785_v62, 16  ;;  %v6517_v21 = vld [vmem:[%s8398_s16 + $0xac] sm:$0xf] }
  0xf1   : > { %7104 = vmatprep.subr.bf16.mxu1 %v7856_v3  ;;  %v6287_v36 = vcombine.low %v882_v48, %v892_v29  ;;  %v901_v42 = vrot.slane %v900_v31, 4  ;;  %v916_v58 = vsel %vm8426_vm2, %v911_v47, %v915_v38  ;;  %v3641_v17 = vrot.slane %v3639_v9, 4  ;;  %v6519_v49 = vld [vmem:[%s8398_s16 + $0xb4] sm:$0xe]  ;;  %v6520_v54 = vld [vmem:[%s8398_s16 + $0xb8] sm:$0xf] }
  0xf2   : > { %7279 = vmatmul.mubr.bf16.gmra.mrb[16].mxu0 %v6550_v57  ;;  %v6515_v57 = vld [vmem:[%s8398_s16 + $0xa4] sm:$0x1]  ;;  %v925_v11 = vrot.slane %v924_v2, 4  ;;  %v951_v18 = vshll.u32 %v786_v63, 16  ;;  %v955_v20 = vshrl.u32 %v786_v63, 16  ;;  %v944_v24 = vrot.slane %v942_v14, 4 }
  0xf3   : > { %7282 = vmatprep.mubr.bf16.mxu0 %v6551_v30  ;;  %7074 = vmatprep.mubr.bf16.mxu1 %v6287_v36  ;;  %v906_v53 = vsel %vm8426_vm2, %v901_v42, %v905_v23  ;;  %v3642_v10 = vrot.slane %v6515_v57, 5  ;;  %v961_v30 = vshll.u32 %v787_v4, 16  ;;  %v788_v36 = vld [vmem:[%s8398_s16 + $0x48] sm:$0xf]  ;;  %v3646_v41 = vrot.slane %v6517_v21, 5 }
  0xf4   : > { %7105 = vmatpush3.bf16.msra.mxu1 %v7856_v3  ;;  %v6288_v0 = vcombine.low %v906_v53, %v916_v58  ;;  %v933_v3 = vrot.slane %v931_v56, 4  ;;  %v930_v22 = vsel %vm8426_vm2, %v925_v11, %v929_v60  ;;  %v953_v28 = vrot.slane %v951_v18, 5  ;;  %v789_v42 = vld [vmem:[%s8398_s16 + $0x4c] sm:$0xf]  ;;  %v6521_v59 = vld [vmem:[%s8398_s16 + $0xbc] sm:$0x1] }
  0xf5   : > { %7106 = vmatprep.subr.bf16.mxu1 %v7858_v13  ;;  %v3643_v27 = vsel %vm8487_vm5, %v3641_v17, %v3642_v10  ;;  %v957_v29 = vrot.slane %v955_v20, 4  ;;  %v963_v40 = vrot.slane %v961_v30, 5  ;;  %v3649_v45 = vrot.slane %v6518_v25, 5  ;;  %v6522_v17 = vld [vmem:[%s8398_s16 + $0xc0] sm:$0xe] }
  0xf6   : > { %v934_v12 = vor.u32 %v933_v3, %v929_v60  ;;  %v6553_v32 = vcombine.low %v3640_v16, %v3643_v27  ;;  %v966_v46 = vshrl.u32 %v788_v36, 16  ;;  %v969_v47 = vshll.u32 %v788_v36, 16  ;;  %v6524_v27 = vld [vmem:[%s8398_s16 + $0xc8] sm:$0x1] }
  0xf7   : > { %7075 = vmatmul.mubr.bf16.gmra.mrb[4].mxu1 %v6288_v0  ;;  %v958_v39 = vor.u32 %v957_v29, %v953_v28  ;;  %v3648_v52 = vrot.slane %v3646_v41, 4  ;;  %v975_v53 = vshll.u32 %v789_v42, 16  ;;  %v979_v58 = vshrl.u32 %v789_v42, 16  ;;  %v791_v0 = vld [vmem:[%s8398_s16 + $0x54] sm:$0xf] }
  0xf8   : > { %7107 = vmatpush3.bf16.msra.mxu1 %v7858_v13  ;;  %v945_v13 = vshll.u32 %v785_v62, 16  ;;  %v935_v23 = vrot.slane %v934_v12, 4  ;;  %v968_v56 = vrot.slane %v966_v46, 4  ;;  %v971_v57 = vrot.slane %v969_v47, 5 }
  0xf9   : > { %7108 = vmatprep.subr.bf16.mxu1 %v7860_v35  ;;  %v959_v50 = vrot.slane %v958_v39, 4  ;;  %v3650_v61 = vsel %vm8487_vm5, %v3648_v52, %v3649_v45  ;;  %v977_v62 = vrot.slane %v975_v53, 5  ;;  %v985_v63 = vshll.u32 %v790_v43, 16  ;;  %v795_v43 = vld [vmem:[%s8398_s16 + $0x64] sm:$0xf] }
  0xfa   : > { %7283 = vmatmul.mubr.bf16.gmra.mrb[20].mxu0 %v6552_v1  ;;  %v947_v48 = vrot.slane %v945_v13, 5  ;;  %v940_v31 = vsel %vm8426_vm2, %v935_v23, %v939_v7  ;;  %v792_v1 = vld [vmem:[%s8398_s16 + $0x58] sm:$0xf]  ;;  %v972_v4 = vor.u32 %v971_v57, %v968_v56  ;;  %v793_v7 = vld [vmem:[%s8398_s16 + $0x5c] sm:$0x1]  ;;  %v6539_v10 = vrot.slane %v6519_v49, 9 }
  0xfb   : > { %v6289_v38 = vcombine.low %v930_v22, %v940_v31  ;;  %7286 = vmatprep.mubr.bf16.mxu0 %v6553_v32  ;;  %v964_v60 = vsel %vm8426_vm2, %v959_v50, %v963_v40  ;;  %v987_v9 = vrot.slane %v985_v63, 5  ;;  %v3653_v11 = vrot.slane %v6520_v54, 5  ;;  %v6523_v23 = vld [vmem:[%s8398_s16 + $0xc4] sm:$0xf] }
  0xfc   : > { %7109 = vmatpush3.bf16.msra.mxu1 %v7860_v35  ;;  %v948_v33 = vor.u32 %v947_v48, %v944_v24  ;;  %v6538_v35 = vrot.slane %v6516_v15, 9  ;;  %v3656_v12 = vrot.slane %v6521_v59, 5  ;;  %v973_v14 = vrot.slane %v972_v4, 4  ;;  %v797_v59 = vld [vmem:[%s8398_s16 + $0x6c] sm:$0xf] }
  0xfd   : > { %7110 = vmatprep.subr.bf16.mxu1 %v7863_v6  ;;  %7078 = vmatprep.mubr.bf16.mxu1 %v6289_v38  ;;  %v990_v15 = vshrl.u32 %v791_v0, 16  ;;  %v993_v16 = vshll.u32 %v791_v0, 16  ;;  %v3654_v18 = vsel %vm8487_vm5, %v6539_v10, %v3653_v11  ;;  %v3655_v20 = vrot.slane %v3653_v11, 4  ;;  %v794_v38 = vld [vmem:[%s8398_s16 + $0x60] sm:$0xf] }
  0xfe   : > { %v949_v44 = vrot.slane %v948_v33, 4  ;;  %v3647_v51 = vsel %vm8487_vm5, %v6538_v35, %v3646_v41  ;;  %v999_v21 = vshll.u32 %v792_v1, 16  ;;  %v1003_v22 = vshrl.u32 %v792_v1, 16  ;;  %v798_v0 = vld [vmem:[%s8398_s16 + $0x70] sm:$0xf] }
  0xff   : > { %v6554_v3 = vcombine.low %v3647_v51, %v3650_v61  ;;  %v978_v24 = vsel %vm8426_vm2, %v973_v14, %v977_v62  ;;  %v992_v25 = vrot.slane %v990_v15, 4  ;;  %v3657_v29 = vsel %vm8487_vm5, %v3655_v20, %v3656_v12  ;;  %v799_v1 = vld [vmem:[%s8398_s16 + $0x74] sm:$0x1] }
 0x100   : > { %7111 = vmatpush3.bf16.msra.mxu1 %v7863_v6  ;;  %v954_v55 = vsel %vm8426_vm2, %v949_v44, %v953_v28  ;;  %v981_v6 = vrot.slane %v979_v58, 4  ;;  %v8667_v28 = vld [vmem:[#allocation6 + $0xc0] sm:$0xff]   ;;  %v1001_v30 = vrot.slane %v999_v21, 5  ;;  %v1005_v31 = vrot.slane %v1003_v22, 4  ;;  %v796_v44 = vld [vmem:[%s8398_s16 + $0x68] sm:$0x1] }
 0x101   : > { %7112 = vmatprep.subr.bf16.mxu1 %v7867_v26  ;;  %v6290_v2 = vcombine.low %v954_v55, %v964_v60  ;;  %v1009_v32 = vshll.u32 %v793_v7, 16  ;;  %v6555_v35 = vcombine.low %v3654_v18, %v3657_v29  ;;  %v3660_v42 = vrot.slane %v6523_v23, 5  ;;  %v7862_v58 = vld [vmem:[%s8398_s16 + $0x18] sm:$0xff]   ;;  %v7864_v23 = vld [vmem:[%s8398_s16 + $0x24] sm:$0xff]  }
 0x102   : > { %7287 = vmatmul.mubr.bf16.gmra.mrb[24].mxu0 %v6554_v3  ;;  %v982_v13 = vor.u32 %v981_v6, %v977_v62  ;;  %v1006_v40 = vor.u32 %v1005_v31, %v1001_v30  ;;  %v3663_v46 = vrot.slane %v6524_v27, 5  ;;  %v1014_v47 = vshrl.u32 %v794_v38, 16  ;;  %v7866_v27 = vld [vmem:[%s8398_s16 + $0x30] sm:$0xff]  }
 0x103   : > { %7079 = vmatmul.mubr.bf16.gmra.mrb[8].mxu1 %v6290_v2  ;;  %v1011_v41 = vrot.slane %v1009_v32, 5  ;;  %7290 = vmatprep.mubr.bf16.mxu0 %v6555_v35  ;;  %v1017_v49 = vshll.u32 %v794_v38, 16  ;;  %v3662_v52 = vrot.slane %v3660_v42, 4  ;;  %v1023_v53 = vshll.u32 %v795_v43, 16  ;;  %v803_v38 = vld [vmem:[%s8398_s16 + $0x84] sm:$0xf] }
 0x104   : > { %7113 = vmatpush3.bf16.msra.mxu1 %v7867_v26  ;;  %v983_v48 = vrot.slane %v982_v13, 4  ;;  %v995_v26 = vrot.slane %v993_v16, 5  ;;  %v1007_v50 = vrot.slane %v1006_v40, 4  ;;  %v1016_v55 = vrot.slane %v1014_v47, 4 }
 0x105   : > { %7114 = vmatprep.subr.bf16.mxu1 %v7871_v37  ;;  %v1019_v56 = vrot.slane %v1017_v49, 5  ;;  %v1027_v57 = vshrl.u32 %v795_v43, 16  ;;  %v3664_v61 = vsel %vm8487_vm5, %v3662_v52, %v3663_v46  ;;  %v1025_v62 = vrot.slane %v1023_v53, 5  ;;  %v805_v49 = vld [vmem:[%s8398_s16 + $0x8c] sm:$0x1] }
 0x106   : > { %v988_v33 = vsel %vm8426_vm2, %v983_v48, %v987_v9  ;;  %v996_v36 = vor.u32 %v995_v26, %v992_v25  ;;  %v1012_v60 = vsel %vm8426_vm2, %v1007_v50, %v1011_v41  ;;  %v1033_v63 = vshll.u32 %v796_v44, 16  ;;  %v800_v48 = vld [vmem:[%s8398_s16 + $0x78] sm:$0xf]  ;;  %v801_v25 = vld [vmem:[%s8398_s16 + $0x7c] sm:$0xf] }
 0x107   : > { %v6291_v39 = vcombine.low %v978_v24, %v988_v33  ;;  %v1020_v4 = vor.u32 %v1019_v56, %v1016_v55  ;;  %v1029_v6 = vrot.slane %v1027_v57, 4  ;;  %v1041_v9 = vshll.u32 %v797_v59, 16  ;;  %v802_v26 = vld [vmem:[%s8398_s16 + $0x80] sm:$0x1]  ;;  %v804_v44 = vld [vmem:[%s8398_s16 + $0x88] sm:$0xf] }
 0x108   : > { %7115 = vmatpush3.bf16.msra.mxu1 %v7871_v37  ;;  %v6540_v37 = vrot.slane %v6522_v17, 9  ;;  %v997_v45 = vrot.slane %v996_v36, 4  ;;  %v1035_v7 = vrot.slane %v1033_v63, 5  ;;  %v1047_v10 = vshll.u32 %v798_v0, 16  ;;  %v7873_v55 = vld [vmem:[#allocation6 + $0x1d0] sm:$0xff]  }
 0x109   : > { %7116 = vmatprep.subr.bf16.mxu1 %v7875_v8  ;;  %7082 = vmatprep.mubr.bf16.mxu1 %v6291_v39  ;;  %v1021_v11 = vrot.slane %v1020_v4, 4  ;;  %v1030_v12 = vor.u32 %v1029_v6, %v1025_v62  ;;  %v1051_v14 = vshrl.u32 %v798_v0, 16  ;;  %v1057_v13 = vshll.u32 %v799_v1, 16  ;;  %v7869_v39 = vld [vmem:[#allocation6 + $0x1c8] sm:$0xff]   ;;  %v7870_v4 = vld [vmem:[%s8398_s16 + $0x48] sm:$0xff]  }
 0x10a   : > { %v3661_v51 = vsel %vm8487_vm5, %v6540_v37, %v3660_v42  ;;  %v1002_v54 = vsel %vm8426_vm2, %v997_v45, %v1001_v30  ;;  %v1043_v16 = vrot.slane %v1041_v9, 5  ;;  %v1049_v17 = vrot.slane %v1047_v10, 5  ;;  %v7868_v0 = vld [vmem:[%s8398_s16 + $0x3c] sm:$0xff]   ;;  %v807_v9 = vld [vmem:[%s8398_s16 + $0x94] sm:$0xf] }
 0x10b   : > { %v6292_v2 = vcombine.low %v1002_v54, %v1012_v60  ;;  %v6556_v3 = vcombine.low %v3661_v51, %v3664_v61  ;;  %v1026_v18 = vsel %vm8426_vm2, %v1021_v11, %v1025_v62  ;;  %v1031_v20 = vrot.slane %v1030_v12, 4  ;;  %v808_v10 = vld [vmem:[%s8398_s16 + $0x98] sm:$0x1] }
 0x10c   : > { %7117 = vmatpush3.bf16.msra.mxu1 %v7875_v8  ;;  %v1038_v8 = vshrl.u32 %v797_v59, 16  ;;  %v1053_v21 = vrot.slane %v1051_v14, 4  ;;  %v1059_v22 = vrot.slane %v1057_v13, 5  ;;  %v1062_v31 = vshrl.u32 %v800_v48, 16 }
 0x10d   : > { %7150 = vmatprep.subr.bf16.mxu1 %v8667_v28  ;;  %7083 = vmatmul.mubr.bf16.gmra.mrb[12].mxu1 %v6292_v2  ;;  %v1036_v29 = vsel %vm8426_vm2, %v1031_v20, %v1035_v7  ;;  %v1065_v32 = vshll.u32 %v800_v48, 16  ;;  %v1071_v36 = vshll.u32 %v801_v25, 16  ;;  %v1075_v37 = vshrl.u32 %v801_v25, 16  ;;  %v810_v25 = vld [vmem:[%s8398_s16 + $0xa0] sm:$0xf] }
 0x10e   : > { %7291 = vmatmul.mubr.bf16.gmra.mrb[28].mxu0 %v6556_v3  ;;  %v1040_v15 = vrot.slane %v1038_v8, 4  ;;  %v1054_v30 = vor.u32 %v1053_v21, %v1049_v17  ;;  %v6293_v33 = vcombine.low %v1026_v18, %v1036_v29  ;;  %v1064_v41 = vrot.slane %v1062_v31, 4  ;;  %v806_v3 = vld [vmem:[%s8398_s16 + $0x90] sm:$0xf]  ;;  %v809_v21 = vld [vmem:[%s8398_s16 + $0x9c] sm:$0xf] }
 0x10f   : > { %7310 = vmatprep.mubr.bf16.mxu0 %v7862_v58  ;;  %v1067_v42 = vrot.slane %v1065_v32, 5  ;;  %v1081_v43 = vshll.u32 %v802_v26, 16  ;;  %v1073_v46 = vrot.slane %v1071_v36, 5  ;;  %v1077_v47 = vrot.slane %v1075_v37, 4  ;;  %v7881_v37 = vld [vmem:[#allocation6 + $0x1e0] sm:$0xff]  }
 0x110   : > { %v1044_v24 = vor.u32 %v1043_v16, %v1040_v15  ;;  %v1055_v40 = vrot.slane %v1054_v30, 4  ;;  %7086 = vmatprep.mubr.bf16.mxu1 %v6293_v33  ;;  %v1086_v50 = vshrl.u32 %v803_v38, 16  ;;  %v1089_v54 = vshll.u32 %v803_v38, 16  ;;  %v7877_v15 = vld [vmem:[#allocation6 + $0x1d8] sm:$0xff]   ;;  %v811_v30 = vld [vmem:[%s8398_s16 + $0xa4] sm:$0x1] }
 0x111   : > { %v1068_v52 = vor.u32 %v1067_v42, %v1064_v41  ;;  %v1083_v53 = vrot.slane %v1081_v43, 5  ;;  %v1078_v57 = vor.u32 %v1077_v47, %v1073_v46  ;;  %v1095_v59 = vshll.u32 %v804_v44, 16 }
 0x112   : > { %v1045_v35 = vrot.slane %v1044_v24, 4  ;;  %v1060_v51 = vsel %vm8426_vm2, %v1055_v40, %v1059_v22  ;;  %v1088_v58 = vrot.slane %v1086_v50, 4  ;;  %v1091_v61 = vrot.slane %v1089_v54, 5  ;;  %v812_v54 = vld [vmem:[%s8398_s16 + $0xa8] sm:$0xf] }
 0x113   : > { %v1069_v60 = vrot.slane %v1068_v52, 4  ;;  %v1099_v62 = vshrl.u32 %v804_v44, 16  ;;  %v1105_v63 = vshll.u32 %v805_v49, 16  ;;  %v1079_v1 = vrot.slane %v1078_v57, 4 }
 0x114   : > { %v1050_v45 = vsel %vm8426_vm2, %v1045_v35, %v1049_v17  ;;  %v1097_v2 = vrot.slane %v1095_v59, 5  ;;  %v1092_v6 = vor.u32 %v1091_v61, %v1088_v58  ;;  %v1110_v12 = vshrl.u32 %v806_v3, 16  ;;  %v814_v59 = vld [vmem:[%s8398_s16 + $0xb0] sm:$0x1] }
 0x115   : > { %v6294_v56 = vcombine.low %v1050_v45, %v1060_v51  ;;  %v1101_v7 = vrot.slane %v1099_v62, 4  ;;  %v1107_v8 = vrot.slane %v1105_v63, 5  ;;  %v1084_v11 = vsel %vm8426_vm2, %v1079_v1, %v1083_v53  ;;  %v7874_v51 = vld [vmem:[%s8398_s16 + $0x60] sm:$0xff]  }
 0x116   : > { %7311 = vmatmul.mubr.bf16.vlgmr.msra.gmra.mrb[0].mxu0 %v7864_v23  ;;  %v1113_v14 = vshll.u32 %v806_v3, 16  ;;  %v1119_v13 = vshll.u32 %v807_v9, 16  ;;  %v1093_v17 = vrot.slane %v1092_v6, 4  ;;  %v1123_v20 = vshrl.u32 %v807_v9, 16  ;;  %v7885_v1 = vld [vmem:[#allocation6 + $0x1e8] sm:$0xff]  }
 0x117   : > { %7343 = vmatpush3.bf16.msra.mxu0 %v8604_v19  ;;  %7314 = vmatprep.mubr.bf16.mxu0 %v7866_v27  ;;  %v1074_v19 = vsel %vm8426_vm2, %v1069_v60, %v1073_v46  ;;  %v1102_v18 = vor.u32 %v1101_v7, %v1097_v2  ;;  %v1112_v22 = vrot.slane %v1110_v12, 4  ;;  %v1129_v48 = vshll.u32 %v808_v10, 16  ;;  %v7872_v46 = vld [vmem:[%s8398_s16 + $0x54] sm:$0xff]  }
 0x118   : > { %7344 = vmatprep.subr.bf16.mxu0 %v7869_v39  ;;  %7087 = vmatmul.mubr.bf16.gmra.mrb[16].mxu1 %v6294_v56  ;;  %v6295_v16 = vcombine.low %v1074_v19, %v1084_v11  ;;  %v1115_v23 = vrot.slane %v1113_v14, 5  ;;  %v1121_v24 = vrot.slane %v1119_v13, 5  ;;  %v1098_v26 = vsel %vm8426_vm2, %v1093_v17, %v1097_v2  ;;  %v815_v6 = vld [vmem:[%s8398_s16 + $0xb4] sm:$0xf]  ;;  %v816_v10 = vld [vmem:[%s8398_s16 + $0xb8] sm:$0xf] }
 0x119   : > { %v1103_v27 = vrot.slane %v1102_v18, 4  ;;  %v1125_v29 = vrot.slane %v1123_v20, 4  ;;  %v1134_v31 = vshrl.u32 %v809_v21, 16  ;;  %v1131_v33 = vrot.slane %v1129_v48, 5  ;;  %v817_v11 = vld [vmem:[%s8398_s16 + $0xbc] sm:$0x1] }
 0x11a   : > { %7090 = vmatprep.mubr.bf16.mxu1 %v6295_v16  ;;  %v1116_v32 = vor.u32 %v1115_v23, %v1112_v22  ;;  %v1137_v35 = vshll.u32 %v809_v21, 16  ;;  %v1143_v36 = vshll.u32 %v810_v25, 16  ;;  %v1147_v41 = vshrl.u32 %v810_v25, 16  ;;  %v7889_v16 = vld [vmem:[#allocation6 + $0x1f0] sm:$0xff]  }
 0x11b   : > { %7345 = vmatpush3.bf16.msra.mxu0 %v7869_v39  ;;  %v1108_v38 = vsel %vm8426_vm2, %v1103_v27, %v1107_v8  ;;  %v1126_v39 = vor.u32 %v1125_v29, %v1121_v24  ;;  %v1136_v40 = vrot.slane %v1134_v31, 4  ;;  %v1153_v50 = vshll.u32 %v811_v30, 16  ;;  %v7876_v25 = vld [vmem:[%s8398_s16 + $0x6c] sm:$0xff]   ;;  %v7878_v30 = vld [vmem:[%s8398_s16 + $0x78] sm:$0xff]  }
 0x11c   : > { %7346 = vmatprep.subr.bf16.mxu0 %v7873_v55  ;;  %v6296_v42 = vcombine.low %v1098_v26, %v1108_v38  ;;  %v1117_v43 = vrot.slane %v1116_v32, 4  ;;  %v1139_v44 = vrot.slane %v1137_v35, 5  ;;  %v1145_v45 = vrot.slane %v1143_v36, 5  ;;  %v7893_v35 = vld [vmem:[#allocation6 + $0x1f8] sm:$0xff]   ;;  %v1591_v38 = vld [vmem:[%s8398_s16] sm:$0xe] }
 0x11d   : > { %v1127_v47 = vrot.slane %v1126_v39, 4  ;;  %v1149_v49 = vrot.slane %v1147_v41, 4  ;;  %v1155_v58 = vrot.slane %v1153_v50, 5  ;;  %v1158_v60 = vshrl.u32 %v812_v54, 16  ;;  %v1592_v39 = vld [vmem:[%s8398_s16 + $0x4] sm:$0xf] }
 0x11e   : > { %7315 = vmatmul.mubr.bf16.gmra.mrb[4].mxu0 %v7868_v0  ;;  %v1122_v52 = vsel %vm8426_vm2, %v1117_v43, %v1121_v24  ;;  %v1140_v53 = vor.u32 %v1139_v44, %v1136_v40  ;;  %v1161_v63 = vshll.u32 %v812_v54, 16  ;;  %v1177_v19 = vshll.u32 %v814_v59, 16  ;;  %v1593_v40 = vld [vmem:[%s8398_s16 + $0x8] sm:$0x1]  ;;  %v1595_v50 = vld [vmem:[%s8398_s16 + $0x10] sm:$0xf] }
 0x11f   : > { %7318 = vmatprep.mubr.bf16.mxu0 %v7870_v4  ;;  %7347 = vmatpush3.bf16.msra.mxu0 %v7873_v55  ;;  %v813_v55 = vld [vmem:[%s8398_s16 + $0xac] sm:$0xf]  ;;  %v1132_v56 = vsel %vm8426_vm2, %v1127_v47, %v1131_v33  ;;  %v1150_v57 = vor.u32 %v1149_v49, %v1145_v45  ;;  %v1160_v3 = vrot.slane %v1158_v60, 4  ;;  %v1185_v20 = vshll.u32 %v815_v6, 16  ;;  %v1596_v54 = vld [vmem:[%s8398_s16 + $0x14] sm:$0x1] }
 0x120   : > { %7348 = vmatprep.subr.bf16.mxu0 %v7877_v15  ;;  %7091 = vmatmul.mubr.bf16.gmra.mrb[20].mxu1 %v6296_v42  ;;  %v6297_v61 = vcombine.low %v1122_v52, %v1132_v56  ;;  %v1141_v62 = vrot.slane %v1140_v53, 4  ;;  %v1167_v0 = vshll.u32 %v813_v55, 16  ;;  %v1171_v4 = vshrl.u32 %v813_v55, 16  ;;  %v1594_v49 = vld [vmem:[%s8398_s16 + $0xc] sm:$0xe]  ;;  %v7880_v56 = vld [vmem:[%s8398_s16 + $0x84] sm:$0xff]  }
 0x121   : > { %v1151_v2 = vrot.slane %v1150_v57, 4  ;;  %v1163_v8 = vrot.slane %v1161_v63, 5  ;;  %v1179_v13 = vrot.slane %v1177_v19, 5  ;;  %v1191_v21 = vshll.u32 %v816_v10, 16  ;;  %v8753_v57 = vld [vmem:[#allocation6 + $0x200] sm:$0xff]  }
 0x122   : > { %7094 = vmatprep.mubr.bf16.mxu1 %v6297_v61  ;;  %v1146_v7 = vsel %vm8426_vm2, %v1141_v62, %v1145_v45  ;;  %v1169_v9 = vrot.slane %v1167_v0, 5  ;;  %v1173_v14 = vrot.slane %v1171_v4, 4  ;;  %v1195_v24 = vshrl.u32 %v816_v10, 16  ;;  %v1598_v4 = vld [vmem:[%s8398_s16 + $0x1c] sm:$0xf] }
 0x123   : > { %7349 = vmatpush3.bf16.msra.mxu0 %v7877_v15  ;;  %v1156_v12 = vsel %vm8426_vm2, %v1151_v2, %v1155_v58  ;;  %v1182_v15 = vshrl.u32 %v815_v6, 16  ;;  %v1164_v18 = vor.u32 %v1163_v8, %v1160_v3  ;;  %v1201_v48 = vshll.u32 %v817_v11, 16  ;;  %v1597_v2 = vld [vmem:[%s8398_s16 + $0x18] sm:$0xe]  ;;  %v7882_v3 = vld [vmem:[%s8398_s16 + $0x90] sm:$0xff]  }
 0x124   : > { %7350 = vmatprep.subr.bf16.mxu0 %v7881_v37  ;;  %v6298_v17 = vcombine.low %v1146_v7, %v1156_v12  ;;  %v1174_v22 = vor.u32 %v1173_v14, %v1169_v9  ;;  %v1187_v27 = vrot.slane %v1185_v20, 5  ;;  %v1193_v29 = vrot.slane %v1191_v21, 5  ;;  %v1599_v19 = vld [vmem:[%s8398_s16 + $0x20] sm:$0x1]  ;;  %v1600_v11 = vld [vmem:[%s8398_s16 + $0x24] sm:$0xe] }
 0x125   : > { %v1184_v23 = vrot.slane %v1182_v15, 4  ;;  %v1165_v26 = vrot.slane %v1164_v18, 4  ;;  %v1197_v32 = vrot.slane %v1195_v24, 4  ;;  %v1203_v33 = vrot.slane %v1201_v48, 5  ;;  %v1601_v12 = vld [vmem:[%s8398_s16 + $0x28] sm:$0xf] }
 0x126   : > { %7319 = vmatmul.mubr.bf16.gmra.mrb[8].mxu0 %v7872_v46  ;;  %v1175_v31 = vrot.slane %v1174_v22, 4  ;;  %v6309_v43 = vrot.slane %v1591_v38, 9  ;;  %v1692_v44 = vrot.slane %v1592_v39, 5  ;;  %v1695_v47 = vrot.slane %v1593_v40, 5  ;;  %v1602_v14 = vld [vmem:[%s8398_s16 + $0x2c] sm:$0x1] }
 0x127   : > { %7322 = vmatprep.mubr.bf16.mxu0 %v7874_v51  ;;  %7351 = vmatpush3.bf16.msra.mxu0 %v7881_v37  ;;  %v1170_v36 = vsel %vm8426_vm2, %v1165_v26, %v1169_v9  ;;  %v1188_v37 = vor.u32 %v1187_v27, %v1184_v23  ;;  %v1198_v42 = vor.u32 %v1197_v32, %v1193_v29  ;;  %v6310_v55 = vrot.slane %v1594_v49, 9  ;;  %v7883_v23 = vld [vmem:[#allocation6 + $0xc8] sm:$0xff]   ;;  %v1604_v26 = vld [vmem:[%s8398_s16 + $0x34] sm:$0xf]  ;;  %v7886_v32 = vld [vmem:[%s8398_s16 + $0xa8] sm:$0xff]  }
 0x128   : > { %7352 = vmatprep.subr.bf16.mxu0 %v7885_v1  ;;  %7095 = vmatmul.mubr.bf16.gmra.mrb[24].mxu1 %v6298_v17  ;;  %v1180_v41 = vsel %vm8426_vm2, %v1175_v31, %v1179_v13  ;;  %v1693_v52 = vsel %vm8487_vm5, %v6309_v43, %v1692_v44  ;;  %v1694_v53 = vrot.slane %v1692_v44, 4  ;;  %v1699_v59 = vrot.slane %v1595_v50, 5  ;;  %v7884_v24 = vld [vmem:[%s8398_s16 + $0x9c] sm:$0xff]   ;;  %v1605_v27 = vld [vmem:[%s8398_s16 + $0x38] sm:$0x1] }
 0x129   : > { %v6299_v45 = vcombine.low %v1170_v36, %v1180_v41  ;;  %v1189_v46 = vrot.slane %v1188_v37, 4  ;;  %v1199_v51 = vrot.slane %v1198_v42, 4  ;;  %v1702_v60 = vrot.slane %v1596_v54, 5  ;;  %v1607_v36 = vld [vmem:[%s8398_s16 + $0x40] sm:$0xf]  ;;  %v7888_v49 = vld [vmem:[%s8398_s16 + $0xb4] sm:$0xff]  }
 0x12a   : > { %v1696_v62 = vsel %vm8487_vm5, %v1694_v53, %v1695_v47  ;;  %v6311_v6 = vrot.slane %v1597_v2, 9  ;;  %v1706_v7 = vrot.slane %v1598_v4, 5  ;;  %v1709_v8 = vrot.slane %v1599_v19, 5  ;;  %v1608_v37 = vld [vmem:[%s8398_s16 + $0x44] sm:$0x1]  ;;  %v7891_v53 = vld [vmem:[#allocation6 + $0xd8] sm:$0xff]  }
 0x12b   : > { %7353 = vmatpush3.bf16.msra.mxu0 %v7885_v1  ;;  %7098 = vmatprep.mubr.bf16.mxu1 %v6299_v45  ;;  %v1194_v58 = vsel %vm8426_vm2, %v1189_v46, %v1193_v29  ;;  %v1204_v61 = vsel %vm8426_vm2, %v1199_v51, %v1203_v33  ;;  %v6325_v0 = vcombine.low %v1693_v52, %v1696_v62  ;;  %v1701_v1 = vrot.slane %v1699_v59, 4  ;;  %v1606_v33 = vld [vmem:[%s8398_s16 + $0x3c] sm:$0xe]  ;;  %v7887_v41 = vld [vmem:[#allocation6 + $0xd0] sm:$0xff]   ;;  %v1611_v51 = vld [vmem:[%s8398_s16 + $0x50] sm:$0x1] }
 0x12c   : > { %7354 = vmatprep.subr.bf16.mxu0 %v7889_v16  ;;  %v6300_v63 = vcombine.low %v1194_v58, %v1204_v61  ;;  %v1700_v9 = vsel %vm8487_vm5, %v6310_v55, %v1699_v59  ;;  %v1707_v13 = vsel %vm8487_vm5, %v6311_v6, %v1706_v7  ;;  %v1708_v15 = vrot.slane %v1706_v7, 4  ;;  %v1609_v45 = vld [vmem:[%s8398_s16 + $0x48] sm:$0xe]  ;;  %v1610_v50 = vld [vmem:[%s8398_s16 + $0x4c] sm:$0xf]  ;;  %v7890_v62 = vld [vmem:[%s8398_s16 + $0xc0] sm:$0xff]  }
 0x12d   : > { %v1703_v10 = vsel %vm8487_vm5, %v1701_v1, %v1702_v60  ;;  %v6312_v17 = vrot.slane %v1600_v11, 9  ;;  %v1716_v22 = vrot.slane %v1602_v14, 5  ;;  %v1723_v31 = vrot.slane %v1605_v27, 5  ;;  %v1612_v58 = vld [vmem:[%s8398_s16 + $0x54] sm:$0xe] }
 0x12e   : > { %7323 = vmatmul.mubr.bf16.gmra.mrb[12].mxu0 %v7876_v25  ;;  %v6326_v18 = vcombine.low %v1700_v9, %v1703_v10  ;;  %v1710_v20 = vsel %vm8487_vm5, %v1708_v15, %v1709_v8  ;;  %v1603_v25 = vld [vmem:[%s8398_s16 + $0x30] sm:$0xe]  ;;  %v1727_v40 = vrot.slane %v1607_v36, 5  ;;  %v6314_v43 = vrot.slane %v1606_v33, 9  ;;  %v1613_v59 = vld [vmem:[%s8398_s16 + $0x58] sm:$0xf] }
 0x12f   : > { %7326 = vmatprep.mubr.bf16.mxu0 %v7878_v30  ;;  %7355 = vmatpush3.bf16.msra.mxu0 %v7889_v16  ;;  %v1713_v16 = vrot.slane %v1601_v12, 5  ;;  %v6327_v48 = vcombine.low %v1707_v13, %v1710_v20  ;;  %v6313_v29 = vrot.slane %v1603_v25, 9  ;;  %v1720_v30 = vrot.slane %v1604_v26, 5  ;;  %v1614_v60 = vld [vmem:[%s8398_s16 + $0x5c] sm:$0x1] }
 0x130   : > { %7356 = vmatprep.subr.bf16.mxu0 %v7893_v35  ;;  %7099 = vmatmul.mubr.bf16.gmra.mrb[28].mxu1 %v6300_v63  ;;  %v1730_v44 = vrot.slane %v1608_v37, 5  ;;  %v1729_v47 = vrot.slane %v1727_v40, 4  ;;  %v6315_v52 = vrot.slane %v1609_v45, 9  ;;  %v1734_v55 = vrot.slane %v1610_v50, 5  ;;  %v7894_v7 = vld [vmem:[#allocation6 + $0xe0] sm:$0xff]  }
 0x131   : > { %7118 = vmatprep.mubr.bf16.mxu1 %v6325_v0  ;;  %v1715_v21 = vrot.slane %v1713_v16, 4  ;;  %v1714_v38 = vsel %vm8487_vm5, %v6312_v17, %v1713_v16  ;;  %v1721_v42 = vsel %vm8487_vm5, %v6313_v29, %v1720_v30  ;;  %v6316_v63 = vrot.slane %v1612_v58, 9  ;;  %v1615_v8 = vld [vmem:[%s8398_s16 + $0x60] sm:$0xe]  ;;  %v1616_v9 = vld [vmem:[%s8398_s16 + $0x64] sm:$0xf] }
 0x132   : > { %v1736_v61 = vrot.slane %v1734_v55, 4  ;;  %v1741_v0 = vrot.slane %v1613_v59, 5  ;;  %v1728_v1 = vsel %vm8487_vm5, %v6314_v43, %v1727_v40  ;;  %v1731_v2 = vsel %vm8487_vm5, %v1729_v47, %v1730_v44  ;;  %v1617_v12 = vld [vmem:[%s8398_s16 + $0x68] sm:$0x1]  ;;  %v6621_v13 = vld [vmem:[%s8398_s16 + $0x18] sm:$0xf] }
 0x133   : > { %7357 = vmatpush3.bf16.msra.mxu0 %v7893_v35  ;;  %v1722_v35 = vrot.slane %v1720_v30, 4  ;;  %v1717_v39 = vsel %vm8487_vm5, %v1715_v21, %v1716_v22  ;;  %v1735_v4 = vsel %vm8487_vm5, %v6315_v52, %v1734_v55  ;;  %v6330_v10 = vcombine.low %v1728_v1, %v1731_v2  ;;  %v7892_v17 = vld [vmem:[%s8398_s16 + $0xcc] sm:$0xff]   ;;  %v6622_v20 = vld [vmem:[%s8398_s16 + $0x1c] sm:$0xf]  ;;  %v6623_v21 = vld [vmem:[%s8398_s16 + $0x20] sm:$0x1] }
 0x134   : > { %7390 = vmatprep.subr.bf16.mxu0 %v8753_v57  ;;  %v6328_v46 = vcombine.low %v1714_v38, %v1717_v39  ;;  %v1743_v6 = vrot.slane %v1741_v0, 4  ;;  %v8814_v11 = vsel %vm8487_vm5, %v6316_v63, %v1741_v0  ;;  %v1748_v14 = vrot.slane %v1616_v9, 5  ;;  %v1618_v27 = vld [vmem:[%s8398_s16 + $0x6c] sm:$0xe]  ;;  %v1620_v37 = vld [vmem:[%s8398_s16 + $0x74] sm:$0x1] }
 0x135   : > { %v4551_v22 = vshrl.u32 %v6621_v13, 16  ;;  %v4554_v25 = vshll.u32 %v6621_v13, 16  ;;  %v4560_v26 = vshll.u32 %v6622_v20, 16  ;;  %v4564_v30 = vshrl.u32 %v6622_v20, 16  ;;  %v6624_v47 = vld [vmem:[%s8398_s16 + $0x24] sm:$0xf] }
 0x136   : > { %7327 = vmatmul.mubr.bf16.gmra.mrb[16].mxu0 %v7880_v56  ;;  %v1737_v56 = vrot.slane %v1611_v51, 5  ;;  %v6318_v33 = vrot.slane %v1618_v27, 9  ;;  %v6625_v51 = vld [vmem:[%s8398_s16 + $0x28] sm:$0xf]  ;;  %v6626_v52 = vld [vmem:[%s8398_s16 + $0x2c] sm:$0x1] }
 0x137   : > { %7330 = vmatprep.mubr.bf16.mxu0 %v7882_v3  ;;  %v1744_v3 = vrot.slane %v1614_v60, 5  ;;  %v4553_v29 = vrot.slane %v4551_v22, 4  ;;  %v4562_v36 = vrot.slane %v4560_v26, 5  ;;  %v4584_v58 = vshll.u32 %v6625_v51, 16  ;;  %v1623_v9 = vld [vmem:[%s8398_s16 + $0x80] sm:$0x1] }
 0x138   : > { %7119 = vmatmul.mubr.bf16.vlgmr.msra.gmra.mrb[0].mxu1 %v6326_v18  ;;  %v1738_v19 = vsel %vm8487_vm5, %v1736_v61, %v1737_v56  ;;  %v6317_v18 = vrot.slane %v1615_v8, 9  ;;  %v4588_v59 = vshrl.u32 %v6625_v51, 16  ;;  %v1622_v8 = vld [vmem:[%s8398_s16 + $0x7c] sm:$0xf]  ;;  %v1765_v20 = vrot.slane %v1623_v9, 5 }
 0x139   : > { %7151 = vmatpush3.bf16.msra.mxu1 %v8667_v28  ;;  %7122 = vmatprep.mubr.bf16.mxu1 %v6327_v48  ;;  %v1724_v28 = vsel %vm8487_vm5, %v1722_v35, %v1723_v31  ;;  %v6331_v15 = vcombine.low %v1735_v4, %v1738_v19  ;;  %v8820_v16 = vsel %vm8487_vm5, %v1743_v6, %v1744_v3  ;;  %v1751_v48 = vrot.slane %v1617_v12, 5  ;;  %v1621_v4 = vld [vmem:[%s8398_s16 + $0x78] sm:$0xe]  ;;  %v1624_v27 = vld [vmem:[%s8398_s16 + $0x84] sm:$0xe] }
 0x13a   : > { %7152 = vmatprep.subr.bf16.mxu1 %v7883_v23  ;;  %v6329_v54 = vcombine.low %v1721_v42, %v1724_v28  ;;  %v4570_v31 = vshll.u32 %v6623_v21, 16  ;;  %v4556_v35 = vrot.slane %v4554_v25, 5  ;;  %v6332_v39 = vcombine.low %v8814_v11, %v8820_v16  ;;  %v7898_v28 = vld [vmem:[#allocation6 + $0xf0] sm:$0xff]   ;;  %v7900_v11 = vld [vmem:[#allocation6 + $0xf8] sm:$0xff]   ;;  %v6629_v21 = vld [vmem:[%s8398_s16 + $0x38] sm:$0x1] }
 0x13b   : > { %v1749_v40 = vsel %vm8487_vm5, %v6317_v18, %v1748_v14  ;;  %v1758_v42 = vrot.slane %v1620_v37, 5  ;;  %v4586_v1 = vrot.slane %v4584_v58, 5  ;;  %v4590_v2 = vrot.slane %v4588_v59, 4  ;;  %v6627_v16 = vld [vmem:[%s8398_s16 + $0x30] sm:$0xf] }
 0x13c   : > { %v4557_v44 = vor.u32 %v4556_v35, %v4553_v29  ;;  %v4572_v45 = vrot.slane %v4570_v31, 5  ;;  %v4594_v3 = vshll.u32 %v6626_v52, 16  ;;  %v4599_v22 = vshrl.u32 %v6627_v16, 16 }
 0x13d   : > { %7153 = vmatpush3.bf16.msra.mxu1 %v7883_v23  ;;  %v7896_v23 = vld [vmem:[#allocation6 + $0xe8] sm:$0xff]  }
 0x13e   : > { %7331 = vmatmul.mubr.bf16.gmra.mrb[20].mxu0 %v7884_v24  ;;  %7154 = vmatprep.subr.bf16.mxu1 %v7887_v41  ;;  %v1750_v24 = vrot.slane %v1748_v14, 4  ;;  %v4558_v55 = vrot.slane %v4557_v44, 4  ;;  %v4591_v14 = vor.u32 %v4590_v2, %v4586_v1  ;;  %v4596_v13 = vrot.slane %v4594_v3, 5  ;;  %v6630_v44 = vld [vmem:[%s8398_s16 + $0x3c] sm:$0xf] }
 0x13f   : > { %7334 = vmatprep.mubr.bf16.mxu0 %v7886_v32  ;;  %v1619_v32 = vld [vmem:[%s8398_s16 + $0x70] sm:$0xf] }
 0x140   : > { %7123 = vmatmul.mubr.bf16.gmra.mrb[4].mxu1 %v6328_v46  ;;  %v1755_v38 = vrot.slane %v1619_v32, 5  ;;  %v1752_v43 = vsel %vm8487_vm5, %v1750_v24, %v1751_v48  ;;  %v4563_v0 = vsel %vm8426_vm2, %v4558_v55, %v4562_v36  ;;  %v4592_v24 = vrot.slane %v4591_v14, 4  ;;  %v7901_v14 = vld [vmem:[#allocation6 + $0x218] sm:$0xff]  }
 0x141   : > { %7126 = vmatprep.mubr.bf16.mxu1 %v6329_v54  ;;  %7155 = vmatpush3.bf16.msra.mxu1 %v7887_v41  ;;  %v4566_v41 = vrot.slane %v4564_v30, 4  ;;  %v4578_v54 = vshll.u32 %v6624_v47, 16  ;;  %v6333_v60 = vcombine.low %v1749_v40, %v1752_v43  ;;  %v4601_v30 = vrot.slane %v4599_v22, 4 }
 0x142   : > { %7156 = vmatprep.subr.bf16.mxu1 %v7891_v53  ;;  %v1757_v46 = vrot.slane %v1755_v38, 4  ;;  %v8837_v50 = vsel %vm8487_vm5, %v6318_v33, %v1755_v38  ;;  %v1625_v33 = vld [vmem:[%s8398_s16 + $0x88] sm:$0xf]  ;;  %v4597_v35 = vsel %vm8426_vm2, %v4592_v24, %v4596_v13  ;;  %v4618_v38 = vshll.u32 %v6629_v21, 16 }
 0x143   : > { %v4580_v63 = vrot.slane %v4578_v54, 5  ;;  %v4623_v54 = vshrl.u32 %v6630_v44, 16  ;;  %v4626_v55 = vshll.u32 %v6630_v44, 16 }
 0x144   : > { %v8843_v56 = vsel %vm8487_vm5, %v1757_v46, %v1758_v42  ;;  %v4620_v46 = vrot.slane %v4618_v38, 5 }
 0x145   : > { %7157 = vmatpush3.bf16.msra.mxu1 %v7891_v53  ;;  %v4575_v53 = vshrl.u32 %v6624_v47, 16  ;;  %v6334_v6 = vcombine.low %v8837_v50, %v8843_v56  ;;  %v1769_v47 = vrot.slane %v1625_v33, 5  ;;  %v6631_v50 = vld [vmem:[%s8398_s16 + $0x40] sm:$0xf] }
 0x146   : > { %7335 = vmatmul.mubr.bf16.gmra.mrb[24].mxu0 %v7888_v49  ;;  %7158 = vmatprep.subr.bf16.mxu1 %v7894_v7  ;;  %v4567_v49 = vor.u32 %v4566_v41, %v4562_v36  ;;  %v4632_v59 = vshll.u32 %v6631_v50, 16 }
 0x147   : > { %7338 = vmatprep.mubr.bf16.mxu0 %v7890_v62  ;;  %v4577_v62 = vrot.slane %v4575_v53, 4  ;;  %v6632_v53 = vld [vmem:[%s8398_s16 + $0x44] sm:$0x1]  ;;  %v1771_v58 = vrot.slane %v1769_v47, 4 }
 0x148   : > { %7127 = vmatmul.mubr.bf16.gmra.mrb[8].mxu1 %v6330_v10  ;;  %v4568_v61 = vrot.slane %v4567_v49, 4  ;;  %v6319_v10 = vrot.slane %v1621_v4, 9  ;;  %v4634_v3 = vrot.slane %v4632_v59, 5 }
 0x149   : > { %7130 = vmatprep.mubr.bf16.mxu1 %v6331_v15  ;;  %7159 = vmatpush3.bf16.msra.mxu1 %v7894_v7  ;;  %v4581_v7 = vor.u32 %v4580_v63, %v4577_v62  ;;  %v1762_v15 = vrot.slane %v1622_v8, 5 }
 0x14a   : > { %7160 = vmatprep.subr.bf16.mxu1 %v7896_v23  ;;  %v4573_v19 = vsel %vm8426_vm2, %v4568_v61, %v4572_v45  ;;  %v7897_v45 = vld [vmem:[#allocation6 + $0x208] sm:$0xff]   ;;  %v8874_v61 = vld [vmem:[#allocation6 + $0x100] sm:$0xff]  }
 0x14b   : > { %v6669_v12 = vcombine.low %v4563_v0, %v4573_v19  ;;  %v4582_v18 = vrot.slane %v4581_v7, 4  ;;  %v1763_v48 = vsel %vm8487_vm5, %v6319_v10, %v1762_v15  ;;  %v1764_v25 = vrot.slane %v1762_v15, 4  ;;  %v1628_v10 = vld [vmem:[%s8398_s16 + $0x94] sm:$0xf] }
 0x14c   : > { %v4625_v0 = vrot.slane %v4623_v54, 4  ;;  %v4642_v19 = vshll.u32 %v6632_v53, 16 }
 0x14d   : > { %7161 = vmatpush3.bf16.msra.mxu1 %v7896_v23  ;;  %v4602_v23 = vshll.u32 %v6627_v16, 16  ;;  %v4587_v29 = vsel %vm8426_vm2, %v4582_v18, %v4586_v1  ;;  %v1766_v36 = vsel %vm8487_vm5, %v1764_v25, %v1765_v20  ;;  %v7899_v1 = vld [vmem:[#allocation6 + $0x210] sm:$0xff]  }
 0x14e   : > { %7339 = vmatmul.mubr.bf16.gmra.mrb[28].mxu0 %v7892_v17  ;;  %7162 = vmatprep.subr.bf16.mxu1 %v7898_v28  ;;  %v6628_v17 = vld [vmem:[%s8398_s16 + $0x34] sm:$0xf]  ;;  %v6670_v40 = vcombine.low %v4587_v29, %v4597_v35  ;;  %v6335_v41 = vcombine.low %v1763_v48, %v1766_v36  ;;  %v4644_v16 = vrot.slane %v4642_v19, 5  ;;  %v6633_v18 = vld [vmem:[%s8398_s16 + $0x48] sm:$0xf] }
 0x14f   : > { %7358 = vmatprep.mubr.bf16.mxu0 %v6669_v12  ;;  %v4608_v26 = vshll.u32 %v6628_v17, 16  ;;  %v4604_v31 = vrot.slane %v4602_v23, 5  ;;  %v4612_v32 = vshrl.u32 %v6628_v17, 16  ;;  %v1776_v17 = vrot.slane %v1628_v10, 5  ;;  %v6634_v20 = vld [vmem:[%s8398_s16 + $0x4c] sm:$0xf] }
 0x150   : > { %7131 = vmatmul.mubr.bf16.gmra.mrb[12].mxu1 %v6332_v39  ;;  %v1626_v39 = vld [vmem:[%s8398_s16 + $0x8c] sm:$0x1]  ;;  %v6635_v23 = vld [vmem:[%s8398_s16 + $0x50] sm:$0x1]  ;;  %v4647_v24 = vshrl.u32 %v6633_v18, 16  ;;  %v4650_v48 = vshll.u32 %v6633_v18, 16 }
 0x151   : > { %7134 = vmatprep.mubr.bf16.mxu1 %v6333_v60  ;;  %7163 = vmatpush3.bf16.msra.mxu1 %v7898_v28  ;;  %v4610_v37 = vrot.slane %v4608_v26, 5  ;;  %v4605_v42 = vor.u32 %v4604_v31, %v4601_v30  ;;  %v4614_v43 = vrot.slane %v4612_v32, 4  ;;  %v6320_v28 = vrot.slane %v1624_v27, 9  ;;  %v1630_v30 = vld [vmem:[%s8398_s16 + $0x9c] sm:$0xe] }
 0x152   : > { %7164 = vmatprep.subr.bf16.mxu1 %v7900_v11  ;;  %v1772_v49 = vrot.slane %v1626_v39, 5  ;;  %v4636_v60 = vshrl.u32 %v6631_v50, 16  ;;  %v1778_v27 = vrot.slane %v1776_v17, 4  ;;  %v4656_v29 = vshll.u32 %v6634_v20, 16  ;;  %v1631_v36 = vld [vmem:[%s8398_s16 + $0xa0] sm:$0xf] }
 0x153   : > { %v4606_v51 = vrot.slane %v4605_v42, 4  ;;  %v4615_v52 = vor.u32 %v4614_v43, %v4610_v37  ;;  %v1770_v56 = vsel %vm8487_vm5, %v6320_v28, %v1769_v47  ;;  %v4649_v32 = vrot.slane %v4647_v24, 4  ;;  %v7904_v28 = vld [vmem:[#allocation6 + $0x220] sm:$0xff]  }
 0x154   : > { %v1773_v2 = vsel %vm8487_vm5, %v1771_v58, %v1772_v49  ;;  %v4638_v4 = vrot.slane %v4636_v60, 4  ;;  %v4652_v33 = vrot.slane %v4650_v48, 5  ;;  %v4660_v35 = vshrl.u32 %v6634_v20, 16  ;;  %v6641_v48 = vld [vmem:[%s8398_s16 + $0x68] sm:$0x1] }
 0x155   : > { %7165 = vmatpush3.bf16.msra.mxu1 %v7900_v11  ;;  %v4611_v62 = vsel %vm8426_vm2, %v4606_v51, %v4610_v37  ;;  %v4616_v63 = vrot.slane %v4615_v52, 4  ;;  %v6336_v8 = vcombine.low %v1770_v56, %v1773_v2  ;;  %v1629_v11 = vld [vmem:[%s8398_s16 + $0x98] sm:$0x1]  ;;  %v4658_v39 = vrot.slane %v4656_v29, 5 }
 0x156   : > { %7359 = vmatmul.mubr.bf16.vlgmr.msra.gmra.mrb[0].mxu0 %v6670_v40  ;;  %7438 = vmatprep.subr.bf16.mxu1 %v8874_v61  ;;  %v4639_v15 = vor.u32 %v4638_v4, %v4634_v3  ;;  %v1779_v22 = vrot.slane %v1629_v11, 5  ;;  %v4666_v40 = vshll.u32 %v6635_v23, 16  ;;  %v4653_v44 = vor.u32 %v4652_v33, %v4649_v32  ;;  %v6637_v52 = vld [vmem:[%s8398_s16 + $0x58] sm:$0xf]  ;;  %v1636_v32 = vld [vmem:[%s8398_s16 + $0xb4] sm:$0xe] }
 0x157   : > { %7391 = vmatpush3.bf16.msra.mxu0 %v8753_v57  ;;  %v4628_v57 = vrot.slane %v4626_v55, 5  ;;  %v4621_v7 = vsel %vm8426_vm2, %v4616_v63, %v4620_v46  ;;  %v6636_v46 = vld [vmem:[%s8398_s16 + $0x54] sm:$0xf]  ;;  %v6322_v49 = vrot.slane %v1630_v30, 9  ;;  %v1783_v50 = vrot.slane %v1631_v36, 5 }
 0x158   : > { %7135 = vmatmul.mubr.bf16.gmra.mrb[16].mxu1 %v6334_v6  ;;  %7392 = vmatprep.subr.bf16.mxu0 %v7897_v45  ;;  %v1627_v6 = vld [vmem:[%s8398_s16 + $0x90] sm:$0xe]  ;;  %v6671_v13 = vcombine.low %v4611_v62, %v4621_v7  ;;  %v4640_v25 = vrot.slane %v4639_v15, 4  ;;  %v1780_v38 = vsel %vm8487_vm5, %v1778_v27, %v1779_v22  ;;  %v4668_v47 = vrot.slane %v4666_v40, 5  ;;  %v6638_v55 = vld [vmem:[%s8398_s16 + $0x5c] sm:$0x1] }
 0x159   : > { %7138 = vmatprep.mubr.bf16.mxu1 %v6335_v41  ;;  %v4629_v9 = vor.u32 %v4628_v57, %v4625_v0  ;;  %v6321_v12 = vrot.slane %v1627_v6, 9  ;;  %v1632_v41 = vld [vmem:[%s8398_s16 + $0xa4] sm:$0x1]  ;;  %v4654_v53 = vrot.slane %v4653_v44, 4  ;;  %v4671_v56 = vshrl.u32 %v6636_v46, 16 }
 0x15a   : > { %7362 = vmatprep.mubr.bf16.mxu0 %v6671_v13  ;;  %v4645_v37 = vsel %vm8426_vm2, %v4640_v25, %v4644_v16  ;;  %v1786_v51 = vrot.slane %v1632_v41, 5  ;;  %v4674_v58 = vshll.u32 %v6636_v46, 16  ;;  %v1784_v59 = vsel %vm8487_vm5, %v6322_v49, %v1783_v50  ;;  %v7910_v15 = vld [vmem:[#allocation6 + $0x230] sm:$0xff]   ;;  %v7913_v49 = vld [vmem:[#allocation6 + $0x238] sm:$0xff]  }
 0x15b   : > { %7393 = vmatpush3.bf16.msra.mxu0 %v7897_v45  ;;  %v4630_v21 = vrot.slane %v4629_v9, 4  ;;  %v1777_v26 = vsel %vm8487_vm5, %v6321_v12, %v1776_v17  ;;  %v4662_v45 = vrot.slane %v4660_v35, 4  ;;  %v1785_v60 = vrot.slane %v1783_v50, 4  ;;  %v1634_v12 = vld [vmem:[%s8398_s16 + $0xac] sm:$0xf] }
 0x15c   : > { %7394 = vmatprep.subr.bf16.mxu0 %v7899_v1  ;;  %v6337_v43 = vcombine.low %v1777_v26, %v1780_v38  ;;  %v4680_v62 = vshll.u32 %v6637_v52, 16  ;;  %v4684_v63 = vshrl.u32 %v6637_v52, 16  ;;  %v4659_v0 = vsel %vm8426_vm2, %v4654_v53, %v4658_v39  ;;  %v6640_v22 = vld [vmem:[%s8398_s16 + $0x64] sm:$0xf]  ;;  %v1637_v38 = vld [vmem:[%s8398_s16 + $0xb8] sm:$0xf] }
 0x15d   : > { %v4635_v31 = vsel %vm8426_vm2, %v4630_v21, %v4634_v3  ;;  %v4663_v54 = vor.u32 %v4662_v45, %v4658_v39  ;;  %v4676_v2 = vrot.slane %v4674_v58, 5  ;;  %v7907_v3 = vld [vmem:[#allocation6 + $0x228] sm:$0xff]   ;;  %v1787_v4 = vsel %vm8487_vm5, %v1785_v60, %v1786_v51  ;;  %v6644_v58 = vld [vmem:[%s8398_s16 + $0x74] sm:$0x1] }
 0x15e   : > { %v6672_v42 = vcombine.low %v4635_v31, %v4645_v37  ;;  %v4682_v19 = vrot.slane %v4680_v62, 5  ;;  %v4686_v6 = vrot.slane %v4684_v63, 4  ;;  %v4690_v7 = vshll.u32 %v6638_v55, 16  ;;  %v6639_v21 = vld [vmem:[%s8398_s16 + $0x60] sm:$0xf] }
 0x15f   : > { %7395 = vmatpush3.bf16.msra.mxu0 %v7899_v1  ;;  %v4664_v57 = vrot.slane %v4663_v54, 4  ;;  %v4673_v1 = vrot.slane %v4671_v56, 4  ;;  %v6338_v10 = vcombine.low %v1784_v59, %v1787_v4  ;;  %v1790_v20 = vrot.slane %v1634_v12, 5  ;;  %v6643_v54 = vld [vmem:[%s8398_s16 + $0x70] sm:$0xf] }
 0x160   : > { %7139 = vmatmul.mubr.bf16.gmra.mrb[20].mxu1 %v6336_v8  ;;  %7396 = vmatprep.subr.bf16.mxu0 %v7901_v14  ;;  %v1633_v8 = vld [vmem:[%s8398_s16 + $0xa8] sm:$0xe]  ;;  %v4687_v17 = vor.u32 %v4686_v6, %v4682_v19  ;;  %v4692_v18 = vrot.slane %v4690_v7, 5  ;;  %v4695_v25 = vshrl.u32 %v6639_v21, 16  ;;  %v4698_v26 = vshll.u32 %v6639_v21, 16 }
 0x161   : > { %7363 = vmatmul.mubr.bf16.gmra.mrb[4].mxu0 %v6672_v42  ;;  %7142 = vmatprep.mubr.bf16.mxu1 %v6337_v43  ;;  %v4669_v9 = vsel %vm8426_vm2, %v4664_v57, %v4668_v47  ;;  %v4677_v11 = vor.u32 %v4676_v2, %v4673_v1  ;;  %v6323_v13 = vrot.slane %v1633_v8, 9  ;;  %v1792_v30 = vrot.slane %v1790_v20, 4  ;;  %v1638_v43 = vld [vmem:[%s8398_s16 + $0xbc] sm:$0x1]  ;;  %v6642_v47 = vld [vmem:[%s8398_s16 + $0x6c] sm:$0xf] }
 0x162   : > { %v6673_v16 = vcombine.low %v4659_v0, %v4669_v9  ;;  %v4688_v27 = vrot.slane %v4687_v17, 4  ;;  %v4704_v31 = vshll.u32 %v6640_v22, 16  ;;  %v4697_v35 = vrot.slane %v4695_v25, 4  ;;  %v7902_v9 = vld [vmem:[%s8398_s16 + $0xc] sm:$0xff]  }
 0x163   : > { %7397 = vmatpush3.bf16.msra.mxu0 %v7901_v14  ;;  %v1635_v14 = vld [vmem:[%s8398_s16 + $0xb0] sm:$0x1]  ;;  %v4678_v23 = vrot.slane %v4677_v11, 4  ;;  %v1791_v29 = vsel %vm8487_vm5, %v6323_v13, %v1790_v20  ;;  %v4700_v36 = vrot.slane %v4698_v26, 5  ;;  %v4708_v37 = vshrl.u32 %v6640_v22, 16 }
 0x164   : > { %7398 = vmatprep.subr.bf16.mxu0 %v7904_v28  ;;  %v1793_v24 = vrot.slane %v1635_v14, 5  ;;  %7366 = vmatprep.mubr.bf16.mxu0 %v6673_v16  ;;  %v4693_v39 = vsel %vm8426_vm2, %v4688_v27, %v4692_v18  ;;  %v4706_v41 = vrot.slane %v4704_v31, 5  ;;  %v4714_v42 = vshll.u32 %v6641_v48, 16  ;;  %v6645_v14 = vld [vmem:[%s8398_s16 + $0x78] sm:$0xf] }
 0x165   : > { %v4683_v33 = vsel %vm8426_vm2, %v4678_v23, %v4682_v19  ;;  %v4701_v46 = vor.u32 %v4700_v36, %v4697_v35  ;;  %v6324_v51 = vrot.slane %v1636_v32, 9  ;;  %v1797_v52 = vrot.slane %v1637_v38, 5  ;;  %v6646_v13 = vld [vmem:[%s8398_s16 + $0x7c] sm:$0xf]  ;;  %v6647_v18 = vld [vmem:[%s8398_s16 + $0x80] sm:$0x1] }
 0x166   : > { %v1794_v40 = vsel %vm8487_vm5, %v1792_v30, %v1793_v24  ;;  %v6674_v44 = vcombine.low %v4683_v33, %v4693_v39  ;;  %v4716_v50 = vrot.slane %v4714_v42, 5  ;;  %v1800_v53 = vrot.slane %v1638_v43, 5  ;;  %v6648_v27 = vld [vmem:[%s8398_s16 + $0x84] sm:$0xf]  ;;  %v6649_v33 = vld [vmem:[%s8398_s16 + $0x88] sm:$0xf] }
 0x167   : > { %7399 = vmatpush3.bf16.msra.mxu0 %v7904_v28  ;;  %v6339_v45 = vcombine.low %v1791_v29, %v1794_v40  ;;  %v4710_v28 = vrot.slane %v4708_v37, 4  ;;  %v4702_v55 = vrot.slane %v4701_v46, 4  ;;  %v4719_v59 = vshrl.u32 %v6642_v47, 16  ;;  %v7903_v37 = vld [vmem:[%s8398_s16 + $0x18] sm:$0xff]   ;;  %v6650_v38 = vld [vmem:[%s8398_s16 + $0x8c] sm:$0x1] }
 0x168   : > { %7143 = vmatmul.mubr.bf16.gmra.mrb[24].mxu1 %v6338_v10  ;;  %7400 = vmatprep.subr.bf16.mxu0 %v7907_v3  ;;  %v4722_v60 = vshll.u32 %v6642_v47, 16  ;;  %v1798_v62 = vsel %vm8487_vm5, %v6324_v51, %v1797_v52  ;;  %v1799_v63 = vrot.slane %v1797_v52, 4  ;;  %v4728_v0 = vshll.u32 %v6643_v54, 16 }
 0x169   : > { %7367 = vmatmul.mubr.bf16.gmra.mrb[8].mxu0 %v6674_v44  ;;  %7146 = vmatprep.mubr.bf16.mxu1 %v6339_v45  ;;  %v4711_v56 = vor.u32 %v4710_v28, %v4706_v41  ;;  %v4732_v57 = vshrl.u32 %v6643_v54, 16  ;;  %v4707_v1 = vsel %vm8426_vm2, %v4702_v55, %v4706_v41  ;;  %v4738_v8 = vshll.u32 %v6644_v58, 16  ;;  %v7905_v45 = vld [vmem:[%s8398_s16 + $0x24] sm:$0xff]   ;;  %v6652_v58 = vld [vmem:[%s8398_s16 + $0x94] sm:$0xf] }
 0x16a   : > { %v4724_v4 = vrot.slane %v4722_v60, 5  ;;  %v1801_v19 = vsel %vm8487_vm5, %v1799_v63, %v1800_v53  ;;  %v4730_v6 = vrot.slane %v4728_v0, 5  ;;  %v4743_v20 = vshrl.u32 %v6645_v14, 16 }
 0x16b   : > { %7401 = vmatpush3.bf16.msra.mxu0 %v7907_v3  ;;  %v4712_v2 = vrot.slane %v4711_v56, 4  ;;  %v4721_v3 = vrot.slane %v4719_v59, 4  ;;  %v4734_v7 = vrot.slane %v4732_v57, 4  ;;  %v6340_v11 = vcombine.low %v1798_v62, %v1801_v19  ;;  %v6651_v56 = vld [vmem:[%s8398_s16 + $0x90] sm:$0xf] }
 0x16c   : > { %7402 = vmatprep.subr.bf16.mxu0 %v7910_v15  ;;  %v4740_v17 = vrot.slane %v4738_v8, 5  ;;  %v4746_v22 = vshll.u32 %v6645_v14, 16  ;;  %v4752_v23 = vshll.u32 %v6646_v13, 16  ;;  %v4756_v24 = vshrl.u32 %v6646_v13, 16  ;;  %v6653_v62 = vld [vmem:[%s8398_s16 + $0x98] sm:$0x1] }
 0x16d   : > { %v4717_v10 = vsel %vm8426_vm2, %v4712_v2, %v4716_v50  ;;  %v4725_v12 = vor.u32 %v4724_v4, %v4721_v3  ;;  %v4735_v16 = vor.u32 %v4734_v7, %v4730_v6  ;;  %v4745_v25 = vrot.slane %v4743_v20, 4  ;;  %v6654_v4 = vld [vmem:[%s8398_s16 + $0x9c] sm:$0xf]  ;;  %v6656_v13 = vld [vmem:[%s8398_s16 + $0xa4] sm:$0x1] }
 0x16e   : > { %v4762_v26 = vshll.u32 %v6647_v18, 16  ;;  %v4748_v30 = vrot.slane %v4746_v22, 5  ;;  %v4754_v31 = vrot.slane %v4752_v23, 5  ;;  %v4758_v32 = vrot.slane %v4756_v24, 4  ;;  %v7906_v18 = vld [vmem:[%s8398_s16 + $0x30] sm:$0xff]  }
 0x16f   : > { %7403 = vmatpush3.bf16.msra.mxu0 %v7910_v15  ;;  %v6675_v15 = vcombine.low %v4707_v1, %v4717_v10  ;;  %v4726_v21 = vrot.slane %v4725_v12, 4  ;;  %v4736_v48 = vrot.slane %v4735_v16, 4  ;;  %v4767_v39 = vshrl.u32 %v6648_v27, 16  ;;  %v6655_v10 = vld [vmem:[%s8398_s16 + $0xa0] sm:$0xf] }
 0x170   : > { %7404 = vmatprep.subr.bf16.mxu0 %v7913_v49  ;;  %7147 = vmatmul.mubr.bf16.gmra.mrb[28].mxu1 %v6340_v11  ;;  %v4764_v36 = vrot.slane %v4762_v26, 5  ;;  %v4770_v40 = vshll.u32 %v6648_v27, 16  ;;  %v4749_v42 = vor.u32 %v4748_v30, %v4745_v25  ;;  %v4759_v43 = vor.u32 %v4758_v32, %v4754_v31  ;;  %v7924_v30 = vld [vmem:[#allocation6 + $0x110] sm:$0xff]  }
 0x171   : > { %7370 = vmatprep.mubr.bf16.mxu0 %v6675_v15  ;;  %7166 = vmatprep.mubr.bf16.mxu1 %v7902_v9  ;;  %v4731_v29 = vsel %vm8426_vm2, %v4726_v21, %v4730_v6  ;;  %v4741_v35 = vsel %vm8426_vm2, %v4736_v48, %v4740_v17  ;;  %v4776_v44 = vshll.u32 %v6649_v33, 16  ;;  %v4769_v46 = vrot.slane %v4767_v39, 4  ;;  %v7923_v9 = vld [vmem:[#allocation6 + $0x108] sm:$0xff]   ;;  %v6658_v39 = vld [vmem:[%s8398_s16 + $0xac] sm:$0xf] }
 0x172   : > { %v6676_v41 = vcombine.low %v4731_v29, %v4741_v35  ;;  %v4772_v28 = vrot.slane %v4770_v40, 5  ;;  %v4780_v47 = vshrl.u32 %v6649_v33, 16  ;;  %v4750_v50 = vrot.slane %v4749_v42, 4  ;;  %v7908_v48 = vld [vmem:[%s8398_s16 + $0x3c] sm:$0xff]   ;;  %v6657_v35 = vld [vmem:[%s8398_s16 + $0xa8] sm:$0xf] }
 0x173   : > { %7405 = vmatpush3.bf16.msra.mxu0 %v7913_v49  ;;  %v4786_v49 = vshll.u32 %v6650_v38, 16  ;;  %v4760_v51 = vrot.slane %v4759_v43, 4  ;;  %v4778_v52 = vrot.slane %v4776_v44, 5  ;;  %v4791_v63 = vshrl.u32 %v6651_v56, 16  ;;  %v6659_v40 = vld [vmem:[%s8398_s16 + $0xb0] sm:$0x1] }
 0x174   : > { %7371 = vmatmul.mubr.bf16.gmra.mrb[12].mxu0 %v6676_v41  ;;  %v4773_v53 = vor.u32 %v4772_v28, %v4769_v46  ;;  %v4782_v54 = vrot.slane %v4780_v47, 4  ;;  %v4755_v59 = vsel %vm8426_vm2, %v4750_v50, %v4754_v31  ;;  %v4794_v0 = vshll.u32 %v6651_v56, 16  ;;  %v7909_v50 = vld [vmem:[%s8398_s16 + $0x48] sm:$0xff]   ;;  %v6660_v56 = vld [vmem:[%s8398_s16 + $0xb4] sm:$0xf] }
 0x175   : > { %v4788_v55 = vrot.slane %v4786_v49, 5  ;;  %v4765_v60 = vsel %vm8426_vm2, %v4760_v51, %v4764_v36  ;;  %v4800_v3 = vshll.u32 %v6652_v58, 16  ;;  %v4793_v19 = vrot.slane %v4791_v63, 4  ;;  %v7925_v51 = vld [vmem:[#allocation6 + $0x118] sm:$0xff]   ;;  %v6661_v63 = vld [vmem:[%s8398_s16 + $0xb8] sm:$0xf] }
 0x176   : > { %v6677_v57 = vcombine.low %v4755_v59, %v4765_v60  ;;  %v4774_v1 = vrot.slane %v4773_v53, 4  ;;  %v4783_v2 = vor.u32 %v4782_v54, %v4778_v52  ;;  %v4796_v6 = vrot.slane %v4794_v0, 5  ;;  %v6662_v0 = vld [vmem:[%s8398_s16 + $0xbc] sm:$0x1] }
 0x177   : > { %v4804_v7 = vshrl.u32 %v6652_v58, 16  ;;  %v4810_v8 = vshll.u32 %v6653_v62, 16  ;;  %v4802_v14 = vrot.slane %v4800_v3, 5  ;;  %v4818_v20 = vshll.u32 %v6654_v4, 16  ;;  %v7911_v58 = vld [vmem:[%s8398_s16 + $0x54] sm:$0xff]  }
 0x178   : > { %7167 = vmatmul.mubr.bf16.vlgmr.msra.gmra.mrb[0].mxu1 %v7903_v37  ;;  %7374 = vmatprep.mubr.bf16.mxu0 %v6677_v57  ;;  %v4779_v11 = vsel %vm8426_vm2, %v4774_v1, %v4778_v52  ;;  %v4784_v12 = vrot.slane %v4783_v2, 4  ;;  %v4797_v15 = vor.u32 %v4796_v6, %v4793_v19  ;;  %v4824_v23 = vshll.u32 %v6655_v10, 16 }
 0x179   : > { %7446 = vmatpush3.bf16.msra.mxu1 %v8874_v61  ;;  %7170 = vmatprep.mubr.bf16.mxu1 %v7905_v45  ;;  %v4815_v61 = vshrl.u32 %v6654_v4, 16  ;;  %v4806_v16 = vrot.slane %v4804_v7, 4  ;;  %v4812_v17 = vrot.slane %v4810_v8, 5  ;;  %v4828_v24 = vshrl.u32 %v6655_v10, 16  ;;  %v7926_v8 = vld [vmem:[#allocation6 + $0x120] sm:$0xff]  }
 0x17a   : > { %7439 = vmatprep.subr.bf16.mxu1 %v7923_v9  ;;  %v4789_v21 = vsel %vm8426_vm2, %v4784_v12, %v4788_v55  ;;  %v4798_v26 = vrot.slane %v4797_v15, 4  ;;  %v4820_v29 = vrot.slane %v4818_v20, 5  ;;  %v4826_v31 = vrot.slane %v4824_v23, 5 }
 0x17b   : > { %v4817_v22 = vrot.slane %v4815_v61, 4  ;;  %v6678_v25 = vcombine.low %v4779_v11, %v4789_v21  ;;  %v4807_v27 = vor.u32 %v4806_v16, %v4802_v14  ;;  %v4830_v32 = vrot.slane %v4828_v24, 4  ;;  %v6664_v16 = vld [vmem:[%s8398_s16 + $0xc4] sm:$0xf] }
 0x17c   : > { %v4834_v33 = vshll.u32 %v6656_v13, 16  ;;  %v4803_v36 = vsel %vm8426_vm2, %v4798_v26, %v4802_v14  ;;  %v4839_v41 = vshrl.u32 %v6657_v35, 16  ;;  %v4842_v44 = vshll.u32 %v6657_v35, 16  ;;  %v6663_v14 = vld [vmem:[%s8398_s16 + $0xc0] sm:$0xf] }
 0x17d   : > { %7447 = vmatpush3.bf16.msra.mxu1 %v7923_v9  ;;  %7375 = vmatmul.mubr.bf16.gmra.mrb[16].mxu0 %v6678_v25  ;;  %v4808_v37 = vrot.slane %v4807_v27, 4  ;;  %v4821_v38 = vor.u32 %v4820_v29, %v4817_v22  ;;  %v4831_v42 = vor.u32 %v4830_v32, %v4826_v31  ;;  %v4848_v45 = vshll.u32 %v6658_v39, 16  ;;  %v6665_v22 = vld [vmem:[%s8398_s16 + $0xc8] sm:$0x1]  ;;  %v7912_v27 = vld [vmem:[%s8398_s16 + $0x60] sm:$0xff]  }
 0x17e   : > { %7440 = vmatprep.subr.bf16.mxu1 %v7924_v30  ;;  %v4836_v43 = vrot.slane %v4834_v33, 5  ;;  %v4841_v47 = vrot.slane %v4839_v41, 4  ;;  %v4852_v49 = vshrl.u32 %v6658_v39, 16  ;;  %v4844_v54 = vrot.slane %v4842_v44, 5  ;;  %v7927_v29 = vld [vmem:[#allocation6 + $0x128] sm:$0xff]  }
 0x17f   : > { %v4813_v46 = vsel %vm8426_vm2, %v4808_v37, %v4812_v17  ;;  %v4822_v28 = vrot.slane %v4821_v38, 4  ;;  %v4832_v53 = vrot.slane %v4831_v42, 4  ;;  %v4850_v55 = vrot.slane %v4848_v45, 5  ;;  %v6666_v35 = vld [vmem:[%s8398_s16 + $0xcc] sm:$0xf] }
 0x180   : > { %7171 = vmatmul.mubr.bf16.gmra.mrb[4].mxu1 %v7906_v18  ;;  %v6679_v52 = vcombine.low %v4803_v36, %v4813_v46  ;;  %v4854_v60 = vrot.slane %v4852_v49, 4  ;;  %v4858_v62 = vshll.u32 %v6659_v40, 16  ;;  %v4845_v1 = vor.u32 %v4844_v54, %v4841_v47  ;;  %v6667_v36 = vld [vmem:[%s8398_s16 + $0xd0] sm:$0xf]  ;;  %v6668_v41 = vld [vmem:[%s8398_s16 + $0xd4] sm:$0x1] }
 0x181   : > { %7174 = vmatprep.mubr.bf16.mxu1 %v7908_v48  ;;  %7448 = vmatpush3.bf16.msra.mxu1 %v7924_v30  ;;  %v4827_v59 = vsel %vm8426_vm2, %v4822_v28, %v4826_v31  ;;  %v4837_v57 = vsel %vm8426_vm2, %v4832_v53, %v4836_v43  ;;  %v4863_v2 = vshrl.u32 %v6660_v56, 16  ;;  %v4866_v3 = vshll.u32 %v6660_v56, 16  ;;  %v7914_v37 = vld [vmem:[%s8398_s16 + $0x6c] sm:$0xff]  }
 0x182   : > { %7441 = vmatprep.subr.bf16.mxu1 %v7925_v51  ;;  %7378 = vmatprep.mubr.bf16.mxu0 %v6679_v52  ;;  %v6680_v4 = vcombine.low %v4827_v59, %v4837_v57  ;;  %v4855_v19 = vor.u32 %v4854_v60, %v4850_v55  ;;  %v4860_v6 = vrot.slane %v4858_v62, 5  ;;  %v4872_v7 = vshll.u32 %v6661_v63, 16  ;;  %v6693_v62 = vld [vmem:[%s8398_s16 + $0x18] sm:$0xe] }
 0x183   : > { %v4846_v9 = vrot.slane %v4845_v1, 4  ;;  %v4865_v10 = vrot.slane %v4863_v2, 4  ;;  %v4868_v11 = vrot.slane %v4866_v3, 5  ;;  %v4876_v12 = vshrl.u32 %v6661_v63, 16  ;;  %v6694_v63 = vld [vmem:[%s8398_s16 + $0x1c] sm:$0xf] }
 0x184   : > { %v4856_v13 = vrot.slane %v4855_v19, 4  ;;  %v4874_v61 = vrot.slane %v4872_v7, 5  ;;  %v4882_v15 = vshll.u32 %v6662_v0, 16  ;;  %v4887_v17 = vshrl.u32 %v6663_v14, 16  ;;  %v6695_v1 = vld [vmem:[%s8398_s16 + $0x20] sm:$0x1] }
 0x185   : > { %7449 = vmatpush3.bf16.msra.mxu1 %v7925_v51  ;;  %7379 = vmatmul.mubr.bf16.gmra.mrb[20].mxu0 %v6680_v4  ;;  %v4851_v18 = vsel %vm8426_vm2, %v4846_v9, %v4850_v55  ;;  %v4869_v20 = vor.u32 %v4868_v11, %v4865_v10  ;;  %v4878_v21 = vrot.slane %v4876_v12, 4  ;;  %v4890_v23 = vshll.u32 %v6663_v14, 16  ;;  %v7928_v51 = vld [vmem:[#allocation6 + $0x130] sm:$0xff]   ;;  %v7915_v7 = vld [vmem:[%s8398_s16 + $0x78] sm:$0xff]  }
 0x186   : > { %7442 = vmatprep.subr.bf16.mxu1 %v7926_v8  ;;  %v4861_v24 = vsel %vm8426_vm2, %v4856_v13, %v4860_v6  ;;  %v4884_v48 = vrot.slane %v4882_v15, 5  ;;  %v4889_v25 = vrot.slane %v4887_v17, 4  ;;  %v4896_v26 = vshll.u32 %v6664_v16, 16  ;;  %v6696_v12 = vld [vmem:[%s8398_s16 + $0x24] sm:$0xe] }
 0x187   : > { %v6681_v30 = vcombine.low %v4851_v18, %v4861_v24  ;;  %v4870_v31 = vrot.slane %v4869_v20, 4  ;;  %v4879_v32 = vor.u32 %v4878_v21, %v4874_v61  ;;  %v4892_v33 = vrot.slane %v4890_v23, 5  ;;  %v6697_v14 = vld [vmem:[%s8398_s16 + $0x28] sm:$0xf]  ;;  %v6699_v23 = vld [vmem:[%s8398_s16 + $0x30] sm:$0xe] }
 0x188   : > { %7175 = vmatmul.mubr.bf16.gmra.mrb[8].mxu1 %v7909_v50  ;;  %v4898_v38 = vrot.slane %v4896_v26, 5  ;;  %v4900_v39 = vshrl.u32 %v6664_v16, 16  ;;  %v4906_v40 = vshll.u32 %v6665_v22, 16  ;;  %v4911_v42 = vshrl.u32 %v6666_v35, 16  ;;  %v6698_v16 = vld [vmem:[%s8398_s16 + $0x2c] sm:$0x1] }
 0x189   : > { %7178 = vmatprep.mubr.bf16.mxu1 %v7911_v58  ;;  %7450 = vmatpush3.bf16.msra.mxu1 %v7926_v8  ;;  %v4875_v43 = vsel %vm8426_vm2, %v4870_v31, %v4874_v61  ;;  %v4880_v44 = vrot.slane %v4879_v32, 4  ;;  %v4893_v45 = vor.u32 %v4892_v33, %v4889_v25  ;;  %v4914_v46 = vshll.u32 %v6666_v35, 16  ;;  %v7929_v8 = vld [vmem:[#allocation6 + $0x138] sm:$0xff]  }
 0x18a   : > { %7443 = vmatprep.subr.bf16.mxu1 %v7927_v29  ;;  %7382 = vmatprep.mubr.bf16.mxu0 %v6681_v30  ;;  %v4902_v28 = vrot.slane %v4900_v39, 4  ;;  %v4908_v47 = vrot.slane %v4906_v40, 5  ;;  %v4913_v49 = vrot.slane %v4911_v42, 4  ;;  %v4920_v50 = vshll.u32 %v6667_v36, 16  ;;  %v7916_v17 = vld [vmem:[%s8398_s16 + $0x84] sm:$0xff]  }
 0x18b   : > { %v4885_v52 = vsel %vm8426_vm2, %v4880_v44, %v4884_v48  ;;  %v4894_v53 = vrot.slane %v4893_v45, 4  ;;  %v4916_v54 = vrot.slane %v4914_v46, 5  ;;  %v4924_v55 = vshrl.u32 %v6667_v36, 16  ;;  %v6700_v26 = vld [vmem:[%s8398_s16 + $0x34] sm:$0xf] }
 0x18c   : > { %v6682_v56 = vcombine.low %v4875_v43, %v4885_v52  ;;  %v4903_v58 = vor.u32 %v4902_v28, %v4898_v38  ;;  %v4922_v59 = vrot.slane %v4920_v50, 5  ;;  %v4930_v60 = vshll.u32 %v6668_v41, 16  ;;  %v6704_v39 = vld [vmem:[%s8398_s16 + $0x44] sm:$0x1]  ;;  %v7917_v43 = vld [vmem:[%s8398_s16 + $0x90] sm:$0xff]  }
 0x18d   : > { %7451 = vmatpush3.bf16.msra.mxu1 %v7927_v29  ;;  %v4917_v0 = vor.u32 %v4916_v54, %v4913_v49  ;;  %v4926_v57 = vrot.slane %v4924_v55, 4  ;;  %v6741_v2 = vrot.slane %v6693_v62, 9  ;;  %v4899_v3 = vsel %vm8426_vm2, %v4894_v53, %v4898_v38  ;;  %v6703_v38 = vld [vmem:[%s8398_s16 + $0x40] sm:$0xf]  ;;  %v6705_v45 = vld [vmem:[%s8398_s16 + $0x48] sm:$0xe] }
 0x18e   : > { %7444 = vmatprep.subr.bf16.mxu1 %v7928_v51  ;;  %7383 = vmatmul.mubr.bf16.gmra.mrb[24].mxu0 %v6682_v56  ;;  %v4904_v4 = vrot.slane %v4903_v58, 4  ;;  %v5418_v19 = vrot.slane %v6694_v63, 5  ;;  %v5421_v6 = vrot.slane %v6695_v1, 5  ;;  %v4932_v11 = vrot.slane %v4930_v60, 5  ;;  %v7918_v49 = vld [vmem:[%s8398_s16 + $0x9c] sm:$0xff]  }
 0x18f   : > { %v4918_v9 = vrot.slane %v4917_v0, 4  ;;  %v4927_v10 = vor.u32 %v4926_v57, %v4922_v59  ;;  %v5425_v22 = vrot.slane %v6697_v14, 5  ;;  %v6742_v48 = vrot.slane %v6696_v12, 9  ;;  %v6706_v50 = vld [vmem:[%s8398_s16 + $0x4c] sm:$0xf] }
 0x190   : > { %7179 = vmatmul.mubr.bf16.gmra.mrb[12].mxu1 %v7912_v27  ;;  %v4909_v13 = vsel %vm8426_vm2, %v4904_v4, %v4908_v47  ;;  %v5419_v61 = vsel %vm8487_vm5, %v6741_v2, %v5418_v19  ;;  %v5420_v15 = vrot.slane %v5418_v19, 4  ;;  %v5428_v25 = vrot.slane %v6698_v16, 5  ;;  %v6701_v27 = vld [vmem:[%s8398_s16 + $0x38] sm:$0x1]  ;;  %v6708_v58 = vld [vmem:[%s8398_s16 + $0x54] sm:$0xe] }
 0x191   : > { %7182 = vmatprep.mubr.bf16.mxu1 %v7914_v37  ;;  %7452 = vmatpush3.bf16.msra.mxu1 %v7928_v51  ;;  %v6683_v18 = vcombine.low %v4899_v3, %v4909_v13  ;;  %v4923_v20 = vsel %vm8426_vm2, %v4918_v9, %v4922_v59  ;;  %v4928_v21 = vrot.slane %v4927_v10, 4  ;;  %v5427_v31 = vrot.slane %v5425_v22, 4  ;;  %v6702_v37 = vld [vmem:[%s8398_s16 + $0x3c] sm:$0xe]  ;;  %v6707_v51 = vld [vmem:[%s8398_s16 + $0x50] sm:$0x1] }
 0x192   : > { %7445 = vmatprep.subr.bf16.mxu1 %v7929_v8  ;;  %v5422_v24 = vsel %vm8487_vm5, %v5420_v15, %v5421_v6  ;;  %v6743_v32 = vrot.slane %v6699_v23, 9  ;;  %v5432_v35 = vrot.slane %v6700_v26, 5  ;;  %v5435_v36 = vrot.slane %v6701_v27, 5  ;;  %v6709_v59 = vld [vmem:[%s8398_s16 + $0x58] sm:$0xf]  ;;  %v7919_v16 = vld [vmem:[%s8398_s16 + $0xa8] sm:$0xff]  }
 0x193   : > { %7386 = vmatprep.mubr.bf16.mxu0 %v6683_v18  ;;  %v4933_v29 = vsel %vm8426_vm2, %v4928_v21, %v4932_v11  ;;  %v6757_v30 = vcombine.low %v5419_v61, %v5422_v24  ;;  %v6744_v40 = vrot.slane %v6702_v37, 9  ;;  %v5439_v41 = vrot.slane %v6703_v38, 5  ;;  %v6710_v60 = vld [vmem:[%s8398_s16 + $0x5c] sm:$0x1]  ;;  %v6711_v19 = vld [vmem:[%s8398_s16 + $0x60] sm:$0xe] }
 0x194   : > { %v6684_v33 = vcombine.low %v4923_v20, %v4933_v29  ;;  %v5434_v42 = vrot.slane %v5432_v35, 4  ;;  %v5442_v44 = vrot.slane %v6704_v39, 5  ;;  %v5426_v46 = vsel %vm8487_vm5, %v6742_v48, %v5425_v22  ;;  %v6712_v6 = vld [vmem:[%s8398_s16 + $0x64] sm:$0xf]  ;;  %v6713_v9 = vld [vmem:[%s8398_s16 + $0x68] sm:$0x1] }
 0x195   : > { %7453 = vmatpush3.bf16.msra.mxu1 %v7929_v8  ;;  %v5429_v28 = vsel %vm8487_vm5, %v5427_v31, %v5428_v25  ;;  %v5441_v47 = vrot.slane %v5439_v41, 4  ;;  %v6745_v52 = vrot.slane %v6705_v45, 9  ;;  %v5433_v53 = vsel %vm8487_vm5, %v6743_v32, %v5432_v35  ;;  %v6714_v61 = vld [vmem:[%s8398_s16 + $0x6c] sm:$0xe]  ;;  %v6715_v20 = vld [vmem:[%s8398_s16 + $0x70] sm:$0xf] }
 0x196   : > { %7387 = vmatmul.mubr.bf16.gmra.mrb[28].mxu0 %v6684_v33  ;;  %v5436_v54 = vsel %vm8487_vm5, %v5434_v42, %v5435_v36  ;;  %v5446_v55 = vrot.slane %v6706_v50, 5  ;;  %v5449_v56 = vrot.slane %v6707_v51, 5  ;;  %v6758_v62 = vcombine.low %v5426_v46, %v5429_v28  ;;  %v6716_v21 = vld [vmem:[%s8398_s16 + $0x74] sm:$0x1]  ;;  %v6429_v27 = vld [vmem:[%s8398_s16 + $0x6c] sm:$0xf] }
 0x197   : > { %7406 = vmatprep.mubr.bf16.mxu0 %v6757_v30  ;;  %v9045_v63 = vsel %vm8487_vm5, %v6744_v40, %v5439_v41  ;;  %v6746_v57 = vrot.slane %v6708_v58, 9  ;;  %v6759_v1 = vcombine.low %v5433_v53, %v5436_v54  ;;  %v9049_v2 = vsel %vm8487_vm5, %v5441_v47, %v5442_v44  ;;  %v7920_v48 = vld [vmem:[%s8398_s16 + $0xb4] sm:$0xff]   ;;  %v6430_v29 = vld [vmem:[%s8398_s16 + $0x70] sm:$0xf]  ;;  %v6718_v41 = vld [vmem:[%s8398_s16 + $0x7c] sm:$0xf] }
 0x198   : > { %7183 = vmatmul.mubr.bf16.gmra.mrb[16].mxu1 %v7915_v7  ;;  %v5448_v0 = vrot.slane %v5446_v55, 4  ;;  %v5453_v3 = vrot.slane %v6709_v59, 5  ;;  %v5456_v4 = vrot.slane %v6710_v60, 5  ;;  %v9055_v7 = vsel %vm8487_vm5, %v6745_v52, %v5446_v55  ;;  %v6431_v32 = vld [vmem:[%s8398_s16 + $0x74] sm:$0x1] }
 0x199   : > { %7186 = vmatprep.mubr.bf16.mxu1 %v7916_v17  ;;  %v6747_v10 = vrot.slane %v6711_v19, 9  ;;  %v5460_v11 = vrot.slane %v6712_v6, 5  ;;  %v5463_v13 = vrot.slane %v6713_v9, 5  ;;  %v6760_v15 = vcombine.low %v9045_v63, %v9049_v2  ;;  %v6717_v36 = vld [vmem:[%s8398_s16 + $0x78] sm:$0xe] }
 0x19a   : > { %v9059_v8 = vsel %vm8487_vm5, %v5448_v0, %v5449_v56  ;;  %v9064_v12 = vsel %vm8487_vm5, %v6746_v57, %v5453_v3  ;;  %v5455_v14 = vrot.slane %v5453_v3, 4  ;;  %v6748_v22 = vrot.slane %v6714_v61, 9  ;;  %v6719_v42 = vld [vmem:[%s8398_s16 + $0x80] sm:$0x1]  ;;  %v6432_v28 = vld [vmem:[%s8398_s16 + $0x78] sm:$0xf] }
 0x19b   : > { %v9072_v17 = vsel %vm8487_vm5, %v6747_v10, %v5460_v11  ;;  %v5462_v18 = vrot.slane %v5460_v11, 4  ;;  %v6761_v23 = vcombine.low %v9055_v7, %v9059_v8  ;;  %v5467_v25 = vrot.slane %v6715_v20, 5  ;;  %v6433_v52 = vld [vmem:[%s8398_s16 + $0x7c] sm:$0xf]  ;;  %v6434_v58 = vld [vmem:[%s8398_s16 + $0x80] sm:$0x1] }
 0x19c   : > { %v9080_v24 = vsel %vm8487_vm5, %v5455_v14, %v5456_v4  ;;  %v5470_v26 = vrot.slane %v6716_v21, 5  ;;  %v2880_v33 = vshrl.u32 %v6429_v27, 16  ;;  %v2883_v35 = vshll.u32 %v6429_v27, 16  ;;  %v6720_v0 = vld [vmem:[%s8398_s16 + $0x84] sm:$0xe] }
 0x19d   : > { %v6762_v30 = vcombine.low %v9064_v12, %v9080_v24  ;;  %v9089_v31 = vsel %vm8487_vm5, %v5462_v18, %v5463_v13  ;;  %v9097_v38 = vsel %vm8487_vm5, %v6748_v22, %v5467_v25  ;;  %v5469_v39 = vrot.slane %v5467_v25, 4  ;;  %v6721_v4 = vld [vmem:[%s8398_s16 + $0x88] sm:$0xf]  ;;  %v6722_v9 = vld [vmem:[%s8398_s16 + $0x8c] sm:$0x1]  ;;  %v7921_v10 = vld [vmem:[%s8398_s16 + $0xc0] sm:$0xff]  }
 0x19e   : > { %7407 = vmatmul.mubr.bf16.vlgmr.msra.gmra.mrb[0].mxu0 %v6758_v62  ;;  %v6763_v37 = vcombine.low %v9072_v17, %v9089_v31  ;;  %v2889_v40 = vshll.u32 %v6430_v29, 16  ;;  %v2885_v44 = vrot.slane %v2883_v35, 5  ;;  %v2893_v45 = vshrl.u32 %v6430_v29, 16  ;;  %v6436_v22 = vld [vmem:[%s8398_s16 + $0x88] sm:$0xf] }
 0x19f   : > { %7410 = vmatprep.mubr.bf16.mxu0 %v6759_v1  ;;  %v2899_v46 = vshll.u32 %v6431_v32, 16  ;;  %v9104_v47 = vsel %vm8487_vm5, %v5469_v39, %v5470_v26  ;;  %v6749_v50 = vrot.slane %v6717_v36, 9  ;;  %v5474_v51 = vrot.slane %v6718_v41, 5  ;;  %v6437_v32 = vld [vmem:[%s8398_s16 + $0x8c] sm:$0x1] }
 0x1a0   : > { %7187 = vmatmul.mubr.bf16.gmra.mrb[20].mxu1 %v7917_v43  ;;  %v2882_v43 = vrot.slane %v2880_v33, 4  ;;  %v6764_v53 = vcombine.low %v9097_v38, %v9104_v47  ;;  %v2895_v55 = vrot.slane %v2893_v45, 4  ;;  %v5477_v62 = vrot.slane %v6719_v42, 5  ;;  %v6723_v42 = vld [vmem:[%s8398_s16 + $0x90] sm:$0xe] }
 0x1a1   : > { %7190 = vmatprep.mubr.bf16.mxu1 %v7918_v49  ;;  %v2891_v49 = vrot.slane %v2889_v40, 5  ;;  %v2901_v56 = vrot.slane %v2899_v46, 5  ;;  %v9112_v59 = vsel %vm8487_vm5, %v6749_v50, %v5474_v51  ;;  %v5476_v60 = vrot.slane %v5474_v51, 4 }
 0x1a2   : > { %v2886_v54 = vor.u32 %v2885_v44, %v2882_v43  ;;  %v2904_v63 = vshrl.u32 %v6432_v28, 16  ;;  %v2907_v2 = vshll.u32 %v6432_v28, 16  ;;  %v2913_v3 = vshll.u32 %v6433_v52, 16  ;;  %v6724_v28 = vld [vmem:[%s8398_s16 + $0x94] sm:$0xf] }
 0x1a3   : > { %v2896_v1 = vor.u32 %v2895_v55, %v2891_v49  ;;  %v9118_v19 = vsel %vm8487_vm5, %v5476_v60, %v5477_v62  ;;  %v2917_v7 = vshrl.u32 %v6433_v52, 16  ;;  %v2923_v8 = vshll.u32 %v6434_v58, 16  ;;  %v6438_v55 = vld [vmem:[%s8398_s16 + $0x90] sm:$0xf]  ;;  %v6439_v58 = vld [vmem:[%s8398_s16 + $0x94] sm:$0xf] }
 0x1a4   : > { %v2887_v57 = vrot.slane %v2886_v54, 4  ;;  %v2906_v6 = vrot.slane %v2904_v63, 4  ;;  %v6765_v13 = vcombine.low %v9112_v59, %v9118_v19  ;;  %v2909_v61 = vrot.slane %v2907_v2, 5  ;;  %v6725_v54 = vld [vmem:[%s8398_s16 + $0x98] sm:$0x1] }
 0x1a5   : > { %v2897_v14 = vrot.slane %v2896_v1, 4  ;;  %v2919_v18 = vrot.slane %v2917_v7, 4  ;;  %v2925_v20 = vrot.slane %v2923_v8, 5  ;;  %v6750_v21 = vrot.slane %v6720_v0, 9  ;;  %v6726_v2 = vld [vmem:[%s8398_s16 + $0x9c] sm:$0xe] }
 0x1a6   : > { %7411 = vmatmul.mubr.bf16.gmra.mrb[4].mxu0 %v6760_v15  ;;  %v2892_v11 = vsel %vm8426_vm2, %v2887_v57, %v2891_v49  ;;  %v6435_v15 = vld [vmem:[%s8398_s16 + $0x84] sm:$0xf]  ;;  %v5481_v25 = vrot.slane %v6721_v4, 5  ;;  %v5484_v26 = vrot.slane %v6722_v9, 5  ;;  %v2937_v41 = vshll.u32 %v6436_v22, 16 }
 0x1a7   : > { %7414 = vmatprep.mubr.bf16.mxu0 %v6761_v23  ;;  %v2902_v23 = vsel %vm8426_vm2, %v2897_v14, %v2901_v56  ;;  %v2928_v33 = vshrl.u32 %v6435_v15, 16  ;;  %v2931_v35 = vshll.u32 %v6435_v15, 16  ;;  %v2941_v46 = vshrl.u32 %v6436_v22, 16  ;;  %v6440_v57 = vld [vmem:[%s8398_s16 + $0x98] sm:$0x1] }
 0x1a8   : > { %7191 = vmatmul.mubr.bf16.gmra.mrb[24].mxu1 %v7919_v16  ;;  %v2915_v16 = vrot.slane %v2913_v3, 5  ;;  %v6461_v27 = vcombine.low %v2892_v11, %v2902_v23  ;;  %v9133_v39 = vsel %vm8487_vm5, %v6750_v21, %v5481_v25  ;;  %v5483_v40 = vrot.slane %v5481_v25, 4  ;;  %v6727_v8 = vld [vmem:[%s8398_s16 + $0xa0] sm:$0xf]  ;;  %v6441_v21 = vld [vmem:[%s8398_s16 + $0x9c] sm:$0xf] }
 0x1a9   : > { %7194 = vmatprep.mubr.bf16.mxu1 %v7920_v48  ;;  %v2910_v48 = vor.u32 %v2909_v61, %v2906_v6  ;;  %v2930_v44 = vrot.slane %v2928_v33, 4  ;;  %v2933_v45 = vrot.slane %v2931_v35, 5  ;;  %v2939_v51 = vrot.slane %v2937_v41, 5  ;;  %v6728_v61 = vld [vmem:[%s8398_s16 + $0xa4] sm:$0x1] }
 0x1aa   : > { %v2920_v29 = vor.u32 %v2919_v18, %v2915_v16  ;;  %v9144_v50 = vsel %vm8487_vm5, %v5483_v40, %v5484_v26  ;;  %v2947_v52 = vshll.u32 %v6437_v32, 16  ;;  %v2943_v56 = vrot.slane %v2941_v46, 4  ;;  %v6442_v26 = vld [vmem:[%s8398_s16 + $0xa0] sm:$0xf]  ;;  %v6443_v40 = vld [vmem:[%s8398_s16 + $0xa4] sm:$0x1] }
 0x1ab   : > { %v2911_v36 = vrot.slane %v2910_v48, 4  ;;  %v6766_v24 = vcombine.low %v9133_v39, %v9144_v50  ;;  %v6751_v63 = vrot.slane %v6723_v42, 9  ;;  %v5488_v0 = vrot.slane %v6724_v28, 5  ;;  %v6730_v46 = vld [vmem:[%s8398_s16 + $0xac] sm:$0xf] }
 0x1ac   : > { %v2921_v43 = vrot.slane %v2920_v29, 4  ;;  %v2949_v62 = vrot.slane %v2947_v52, 5  ;;  %v2944_v17 = vor.u32 %v2943_v56, %v2939_v51  ;;  %v5491_v31 = vrot.slane %v6725_v54, 5  ;;  %v6731_v54 = vld [vmem:[%s8398_s16 + $0xb0] sm:$0x1] }
 0x1ad   : > { %v2916_v49 = vsel %vm8426_vm2, %v2911_v36, %v2915_v16  ;;  %v9160_v3 = vsel %vm8487_vm5, %v6751_v63, %v5488_v0  ;;  %v5490_v4 = vrot.slane %v5488_v0, 4  ;;  %v2955_v6 = vshll.u32 %v6438_v55, 16 }
 0x1ae   : > { %7415 = vmatmul.mubr.bf16.gmra.mrb[8].mxu0 %v6762_v30  ;;  %v2926_v12 = vsel %vm8426_vm2, %v2921_v43, %v2925_v20  ;;  %v2934_v30 = vor.u32 %v2933_v45, %v2930_v44  ;;  %v2961_v7 = vshll.u32 %v6439_v58, 16  ;;  %v2965_v14 = vshrl.u32 %v6439_v58, 16  ;;  %v6729_v44 = vld [vmem:[%s8398_s16 + $0xa8] sm:$0xe] }
 0x1af   : > { %7418 = vmatprep.mubr.bf16.mxu0 %v6763_v37  ;;  %v6462_v60 = vcombine.low %v2916_v49, %v2926_v12  ;;  %v2952_v37 = vshrl.u32 %v6438_v55, 16  ;;  %v5492_v15 = vsel %vm8487_vm5, %v5490_v4, %v5491_v31  ;;  %v2957_v16 = vrot.slane %v2955_v6, 5  ;;  %v6444_v55 = vld [vmem:[%s8398_s16 + $0xa8] sm:$0xf] }
 0x1b0   : > { %7195 = vmatmul.mubr.bf16.gmra.mrb[28].mxu1 %v7921_v10  ;;  %v2935_v1 = vrot.slane %v2934_v30, 4  ;;  %v2945_v10 = vrot.slane %v2944_v17, 4  ;;  %v2963_v18 = vrot.slane %v2961_v7, 5  ;;  %v2971_v20 = vshll.u32 %v6440_v57, 16 }
 0x1b1   : > { %7230 = vmatprep.mubr.bf16.mxu1 %v6461_v27  ;;  %v2954_v11 = vrot.slane %v2952_v37, 4  ;;  %v6767_v23 = vcombine.low %v9160_v3, %v5492_v15  ;;  %v2967_v48 = vrot.slane %v2965_v14, 4  ;;  %v6752_v25 = vrot.slane %v6726_v2, 9  ;;  %v6732_v3 = vld [vmem:[%s8398_s16 + $0xb4] sm:$0xe] }
 0x1b2   : > { %v2940_v9 = vsel %vm8426_vm2, %v2935_v1, %v2939_v51  ;;  %v2950_v22 = vsel %vm8426_vm2, %v2945_v10, %v2949_v62  ;;  %v2973_v32 = vrot.slane %v2971_v20, 5  ;;  %v5495_v33 = vrot.slane %v6727_v8, 5  ;;  %v6446_v1 = vld [vmem:[%s8398_s16 + $0xb0] sm:$0x1]  ;;  %v6734_v15 = vld [vmem:[%s8398_s16 + $0xbc] sm:$0x1] }
 0x1b3   : > { %v6463_v27 = vcombine.low %v2940_v9, %v2950_v22  ;;  %v2958_v29 = vor.u32 %v2957_v16, %v2954_v11  ;;  %v2968_v35 = vor.u32 %v2967_v48, %v2963_v18  ;;  %v5498_v36 = vrot.slane %v6728_v61, 5  ;;  %v6733_v9 = vld [vmem:[%s8398_s16 + $0xb8] sm:$0xf] }
 0x1b4   : > { %v2976_v41 = vshrl.u32 %v6441_v21, 16  ;;  %v2979_v42 = vshll.u32 %v6441_v21, 16  ;;  %v9182_v47 = vsel %vm8487_vm5, %v6752_v25, %v5495_v33  ;;  %v2985_v43 = vshll.u32 %v6442_v26, 16  ;;  %v6448_v48 = vld [vmem:[%s8398_s16 + $0xb8] sm:$0xf] }
 0x1b5   : > { %v2959_v38 = vrot.slane %v2958_v29, 4  ;;  %v2969_v59 = vrot.slane %v2968_v35, 4  ;;  %v2989_v45 = vshrl.u32 %v6442_v26, 16  ;;  %v2995_v52 = vshll.u32 %v6443_v40, 16  ;;  %v6449_v35 = vld [vmem:[%s8398_s16 + $0xbc] sm:$0x1] }
 0x1b6   : > { %7419 = vmatmul.mubr.bf16.gmra.mrb[12].mxu0 %v6764_v53  ;;  %v5497_v53 = vrot.slane %v5495_v33, 4  ;;  %v2978_v19 = vrot.slane %v2976_v41, 4  ;;  %v2987_v51 = vrot.slane %v2985_v43, 5  ;;  %v6753_v0 = vrot.slane %v6729_v44, 9 }
 0x1b7   : > { %7422 = vmatprep.mubr.bf16.mxu0 %v6765_v13  ;;  %v2981_v13 = vrot.slane %v2979_v42, 5  ;;  %v2964_v28 = vsel %vm8426_vm2, %v2959_v38, %v2963_v18  ;;  %v2974_v12 = vsel %vm8426_vm2, %v2969_v59, %v2973_v32  ;;  %v2991_v58 = vrot.slane %v2989_v45, 4  ;;  %v6447_v18 = vld [vmem:[%s8398_s16 + $0xb4] sm:$0xf] }
 0x1b8   : > { %7231 = vmatmul.mubr.bf16.vlgmr.msra.gmra.mrb[16].mxu1 %v6462_v60  ;;  %v9190_v49 = vsel %vm8487_vm5, %v5497_v53, %v5498_v36  ;;  %v6445_v60 = vld [vmem:[%s8398_s16 + $0xac] sm:$0xf]  ;;  %v6464_v62 = vcombine.low %v2964_v28, %v2974_v12  ;;  %v2997_v63 = vrot.slane %v2995_v52, 5  ;;  %v5502_v57 = vrot.slane %v6730_v46, 5  ;;  %v6735_v53 = vld [vmem:[%s8398_s16 + $0xc0] sm:$0xe] }
 0x1b9   : > { %7234 = vmatprep.mubr.bf16.mxu1 %v6463_v27  ;;  %v6768_v30 = vcombine.low %v9182_v47, %v9190_v49  ;;  %v2982_v56 = vor.u32 %v2981_v13, %v2978_v19  ;;  %v2992_v31 = vor.u32 %v2991_v58, %v2987_v51  ;;  %v5505_v37 = vrot.slane %v6731_v54, 5  ;;  %v6736_v13 = vld [vmem:[%s8398_s16 + $0xc4] sm:$0xf]  ;;  %v6450_v52 = vld [vmem:[%s8398_s16 + $0xc0] sm:$0xf] }
 0x1ba   : > { %v3000_v2 = vshrl.u32 %v6444_v55, 16  ;;  %v5503_v4 = vsel %vm8487_vm5, %v6753_v0, %v5502_v57  ;;  %v5504_v6 = vrot.slane %v5502_v57, 4  ;;  %v3003_v7 = vshll.u32 %v6444_v55, 16 }
 0x1bb   : > { %v2983_v17 = vrot.slane %v2982_v56, 4  ;;  %v3009_v8 = vshll.u32 %v6445_v60, 16  ;;  %v2993_v11 = vrot.slane %v2992_v31, 4  ;;  %v3013_v61 = vshrl.u32 %v6445_v60, 16 }
 0x1bc   : > { %v3002_v14 = vrot.slane %v3000_v2, 4  ;;  %v5506_v39 = vsel %vm8487_vm5, %v5504_v6, %v5505_v37  ;;  %v3005_v50 = vrot.slane %v3003_v7, 5  ;;  %v3019_v16 = vshll.u32 %v6446_v1, 16  ;;  %v6738_v6 = vld [vmem:[%s8398_s16 + $0xcc] sm:$0xe] }
 0x1bd   : > { %v2988_v10 = vsel %vm8426_vm2, %v2983_v17, %v2987_v51  ;;  %v2998_v20 = vsel %vm8426_vm2, %v2993_v11, %v2997_v63  ;;  %v6769_v21 = vcombine.low %v5503_v4, %v5506_v39  ;;  %v3015_v22 = vrot.slane %v3013_v61, 4  ;;  %v6737_v51 = vld [vmem:[%s8398_s16 + $0xc8] sm:$0x1]  ;;  %v6739_v11 = vld [vmem:[%s8398_s16 + $0xd0] sm:$0xf] }
 0x1be   : > { %7423 = vmatmul.mubr.bf16.gmra.mrb[16].mxu0 %v6766_v24  ;;  %v3011_v24 = vrot.slane %v3009_v8, 5  ;;  %v6465_v25 = vcombine.low %v2988_v10, %v2998_v20  ;;  %v3006_v26 = vor.u32 %v3005_v50, %v3002_v14  ;;  %v3021_v27 = vrot.slane %v3019_v16, 5  ;;  %v6452_v17 = vld [vmem:[%s8398_s16 + $0xc8] sm:$0x1]  ;;  %v6740_v50 = vld [vmem:[%s8398_s16 + $0xd4] sm:$0x1] }
 0x1bf   : > { %7426 = vmatprep.mubr.bf16.mxu0 %v6767_v23  ;;  %v6754_v23 = vrot.slane %v6732_v3, 9  ;;  %v5509_v29 = vrot.slane %v6733_v9, 5  ;;  %v5512_v33 = vrot.slane %v6734_v15, 5  ;;  %v3024_v36 = vshrl.u32 %v6447_v18, 16 }
 0x1c0   : > { %7235 = vmatmul.mubr.bf16.gmra.mrb[20].mxu1 %v6464_v62  ;;  %v3016_v32 = vor.u32 %v3015_v22, %v3011_v24  ;;  %v3027_v40 = vshll.u32 %v6447_v18, 16  ;;  %v3007_v41 = vrot.slane %v3006_v26, 4  ;;  %v3033_v47 = vshll.u32 %v6448_v48, 16 }
 0x1c1   : > { %7238 = vmatprep.mubr.bf16.mxu1 %v6465_v25  ;;  %v5510_v42 = vsel %vm8487_vm5, %v6754_v23, %v5509_v29  ;;  %v5511_v38 = vrot.slane %v5509_v29, 4  ;;  %v3026_v44 = vrot.slane %v3024_v36, 4  ;;  %v3037_v19 = vshrl.u32 %v6448_v48, 16 }
 0x1c2   : > { %v3017_v43 = vrot.slane %v3016_v32, 4  ;;  %v3029_v59 = vrot.slane %v3027_v40, 5  ;;  %v3012_v45 = vsel %vm8426_vm2, %v3007_v41, %v3011_v24  ;;  %v3035_v28 = vrot.slane %v3033_v47, 5 }
 0x1c3   : > { %v5513_v46 = vsel %vm8487_vm5, %v5511_v38, %v5512_v33  ;;  %v3043_v49 = vshll.u32 %v6449_v35, 16  ;;  %v3039_v56 = vrot.slane %v3037_v19, 4  ;;  %v6755_v62 = vrot.slane %v6735_v53, 9 }
 0x1c4   : > { %v3022_v54 = vsel %vm8426_vm2, %v3017_v43, %v3021_v27  ;;  %v6770_v55 = vcombine.low %v5510_v42, %v5513_v46  ;;  %v3030_v12 = vor.u32 %v3029_v59, %v3026_v44  ;;  %v5516_v63 = vrot.slane %v6736_v13, 5 }
 0x1c5   : > { %v6466_v58 = vcombine.low %v3012_v45, %v3022_v54  ;;  %v3045_v60 = vrot.slane %v3043_v49, 5  ;;  %v3040_v57 = vor.u32 %v3039_v56, %v3035_v28  ;;  %v5519_v1 = vrot.slane %v6737_v51, 5 }
 0x1c6   : > { %7427 = vmatmul.mubr.bf16.gmra.mrb[20].mxu0 %v6768_v30  ;;  %v6451_v30 = vld [vmem:[%s8398_s16 + $0xc4] sm:$0xf]  ;;  %v3031_v0 = vrot.slane %v3030_v12, 4  ;;  %v3048_v31 = vshrl.u32 %v6450_v52, 16  ;;  %v5517_v37 = vsel %vm8487_vm5, %v6755_v62, %v5516_v63  ;;  %v5518_v2 = vrot.slane %v5516_v63, 4 }
 0x1c7   : > { %7430 = vmatprep.mubr.bf16.mxu0 %v6769_v21  ;;  %v3051_v3 = vshll.u32 %v6450_v52, 16  ;;  %v3057_v4 = vshll.u32 %v6451_v30, 16  ;;  %v3041_v8 = vrot.slane %v3040_v57, 4  ;;  %v3061_v10 = vshrl.u32 %v6451_v30, 16 }
 0x1c8   : > { %7239 = vmatmul.mubr.bf16.gmra.mrb[24].mxu1 %v6466_v58  ;;  %v3036_v7 = vsel %vm8426_vm2, %v3031_v0, %v3035_v28  ;;  %v3050_v9 = vrot.slane %v3048_v31, 4  ;;  %v5520_v14 = vsel %vm8487_vm5, %v5518_v2, %v5519_v1  ;;  %v3067_v39 = vshll.u32 %v6452_v17, 16 }
 0x1c9   : > { %v3053_v61 = vrot.slane %v3051_v3, 5  ;;  %v3059_v15 = vrot.slane %v3057_v4, 5  ;;  %v3046_v24 = vsel %vm8426_vm2, %v3041_v8, %v3045_v60  ;;  %v6771_v16 = vcombine.low %v5517_v37, %v5520_v14 }
 0x1ca   : > { %v3063_v18 = vrot.slane %v3061_v10, 4  ;;  %v6756_v20 = vrot.slane %v6738_v6, 9  ;;  %v6467_v21 = vcombine.low %v3036_v7, %v3046_v24  ;;  %v5523_v23 = vrot.slane %v6739_v11, 5 }
 0x1cb   : > { %v3054_v22 = vor.u32 %v3053_v61, %v3050_v9  ;;  %v3069_v25 = vrot.slane %v3067_v39, 5  ;;  %v5526_v26 = vrot.slane %v6740_v50, 5 }
 0x1cc   : > { %v3064_v48 = vor.u32 %v3063_v18, %v3059_v15  ;;  %7242 = vmatprep.mubr.bf16.mxu1 %v6467_v21  ;;  %v5524_v29 = vsel %vm8487_vm5, %v6756_v20, %v5523_v23  ;;  %v5525_v32 = vrot.slane %v5523_v23, 4 }
 0x1cd   : > { %v3055_v27 = vrot.slane %v3054_v22, 4 }
 0x1ce   : > { %7431 = vmatmul.mubr.bf16.gmra.mrb[24].mxu0 %v6770_v55  ;;  %v3065_v33 = vrot.slane %v3064_v48, 4  ;;  %v5527_v36 = vsel %vm8487_vm5, %v5525_v32, %v5526_v26 }
 0x1cf   : > { %7434 = vmatprep.mubr.bf16.mxu0 %v6771_v16  ;;  %v3060_v35 = vsel %vm8426_vm2, %v3055_v27, %v3059_v15  ;;  %v6772_v41 = vcombine.low %v5524_v29, %v5527_v36 }
 0x1d0   : > { %v3070_v40 = vsel %vm8426_vm2, %v3065_v33, %v3069_v25 }
 0x1d1   : > { %v6468_v42 = vcombine.low %v3060_v35, %v3070_v40 }
 0x1d3   : > { %7243 = vmatmul.mubr.bf16.gmra.mrb[28].mxu1 %v6468_v42 }
 0x1d6   : > { %7435 = vmatmul.mubr.bf16.gmra.mrb[28].mxu0 %v6772_v41 }
 0x24b   : > { %v7168_v38 = vpop.f32.mrb[0].mxu1 }
 0x24c   : > { %v2448_v47 = vpop.f32.mrb[1].mxu1 }
 0x24d   : > { %v7169_v53 = vpop.f32.mrb[2].mxu1 }
 0x24e   : > { %v2451_v43 = vpop.f32.mrb[3].mxu1 }
 0x253   : > { %v7172_v44 = vpop.f32.mrb[4].mxu1 }
 0x254   : > { %v2464_v59 = vpop.f32.mrb[5].mxu1 }
 0x255   : > { %v7173_v19 = vpop.f32.mrb[6].mxu1 }
 0x256   : > { %v2467_v13 = vpop.f32.mrb[7].mxu1 }
 0x25b   : > { %v7176_v45 = vpop.f32.mrb[8].mxu1 }
 0x25c   : > { %v2480_v5 = vpop.f32.mrb[9].mxu1 }
 0x25d   : > { %v7177_v46 = vpop.f32.mrb[10].mxu1 }
 0x25e   : > { %v2483_v34 = vpop.f32.mrb[11].mxu1 }
 0x263   : > { %v9250_v28 = vpop.f32.mrb[12].mxu1 }
 0x264   : > { %v9252_v49 = vpop.f32.mrb[13].mxu1 }
 0x265   : > { %v9254_v51 = vpop.f32.mrb[14].mxu1 }
 0x266   : > { %v9256_v52 = vpop.f32.mrb[15].mxu1 }
 0x271   : > { %v7408_v54 = vpop.f32.mrb[0].mxu0 }
 0x272   : > { %v7454_v55 = vadd.f32 %v7408_v54, %v7168_v38  ;;  %v5723_v12 = vpop.f32.mrb[1].mxu0 }
 0x273   : > { %v7455_v56 = vadd.f32 %v5723_v12, %v2448_v47  ;;  %v7409_v30 = vpop.f32.mrb[2].mxu0 }
 0x274   : > { %5948 = vst [vmem:[%s8413_s27 + $0x10] sm:$0xff] %v7454_v55  ;;  %v7456_v58 = vadd.f32 %v7409_v30, %v7169_v53  ;;  %v5726_v60 = vpop.f32.mrb[3].mxu0  ;;  %v6021_v1 = vmul.f32 %v7454_v55, %v7454_v55 }
 0x275   : > { %5946 = vst [vmem:[%s8413_s27] sm:$0xff] %v7455_v56  ;;  %v7457_v62 = vadd.f32 %v5726_v60, %v2451_v43  ;;  %v6019_v63 = vmul.f32 %v7455_v56, %v7455_v56 }
 0x276   : > { %5949 = vst [vmem:[%s8413_s27 + $0x18] sm:$0xff] %v7456_v58  ;;  %v6022_v4 = vmul.f32 %v7456_v58, %v7456_v58 }
 0x277   : > { %5947 = vst [vmem:[%s8413_s27 + $0x8] sm:$0xff] %v7457_v62  ;;  %v5979_v0 = vadd.f32 %v7457_v62, %v7455_v56  ;;  %v6020_v57 = vmul.f32 %v7457_v62, %v7457_v62 }
 0x279   : > { %v5980_v17 = vadd.f32 %v7454_v55, %v5979_v0  ;;  %v6051_v31 = vadd.f32 %v6020_v57, %v6019_v63  ;;  %v7412_v37 = vpop.f32.mrb[4].mxu0 }
 0x27a   : > { %v7458_v2 = vadd.f32 %v7412_v37, %v7172_v44  ;;  %v5739_v3 = vpop.f32.mrb[5].mxu0 }
 0x27b   : > { %v6052_v6 = vadd.f32 %v6051_v31, %v6021_v1  ;;  %v7459_v7 = vadd.f32 %v5739_v3, %v2464_v59  ;;  %v5981_v8 = vadd.f32 %v7456_v58, %v5980_v17  ;;  %v7413_v9 = vpop.f32.mrb[6].mxu0 }
 0x27c   : > { %5952 = vst [vmem:[%s8413_s27 + $0x30] sm:$0xff] %v7458_v2  ;;  %v7460_v10 = vadd.f32 %v7413_v9, %v7173_v19  ;;  %v5742_v11 = vpop.f32.mrb[7].mxu0  ;;  %v6025_v18 = vmul.f32 %v7458_v2, %v7458_v2 }
 0x27d   : > { %5950 = vst [vmem:[%s8413_s27 + $0x20] sm:$0xff] %v7459_v7  ;;  %v5982_v14 = vadd.f32 %v7459_v7, %v5981_v8  ;;  %v6023_v61 = vmul.f32 %v7459_v7, %v7459_v7  ;;  %v6053_v15 = vadd.f32 %v6052_v6, %v6022_v4  ;;  %v7461_v39 = vadd.f32 %v5742_v11, %v2467_v13 }
 0x27e   : > { %5953 = vst [vmem:[%s8413_s27 + $0x38] sm:$0xff] %v7460_v10  ;;  %v6026_v25 = vmul.f32 %v7460_v10, %v7460_v10 }
 0x27f   : > { %v6054_v50 = vadd.f32 %v6053_v15, %v6023_v61  ;;  %5951 = vst [vmem:[%s8413_s27 + $0x28] sm:$0xff] %v7461_v39  ;;  %v5983_v24 = vadd.f32 %v7461_v39, %v5982_v14  ;;  %v6024_v16 = vmul.f32 %v7461_v39, %v7461_v39 }
 0x281   : > { %v5984_v20 = vadd.f32 %v7458_v2, %v5983_v24  ;;  %v6055_v21 = vadd.f32 %v6054_v50, %v6024_v16  ;;  %v7416_v22 = vpop.f32.mrb[8].mxu0 }
 0x282   : > { %v7462_v23 = vadd.f32 %v7416_v22, %v7176_v45  ;;  %v5755_v48 = vpop.f32.mrb[9].mxu0 }
 0x283   : > { %v6056_v26 = vadd.f32 %v6055_v21, %v6025_v18  ;;  %v7463_v27 = vadd.f32 %v5755_v48, %v2480_v5  ;;  %v5985_v29 = vadd.f32 %v7460_v10, %v5984_v20  ;;  %v7417_v32 = vpop.f32.mrb[10].mxu0 }
 0x284   : > { %5956 = vst [vmem:[%s8413_s27 + $0x50] sm:$0xff] %v7462_v23  ;;  %v7464_v33 = vadd.f32 %v7417_v32, %v7177_v46  ;;  %v5758_v35 = vpop.f32.mrb[11].mxu0  ;;  %v6029_v59 = vmul.f32 %v7462_v23, %v7462_v23 }
 0x285   : > { %5954 = vst [vmem:[%s8413_s27 + $0x40] sm:$0xff] %v7463_v27  ;;  %v5986_v36 = vadd.f32 %v7463_v27, %v5985_v29  ;;  %v6027_v40 = vmul.f32 %v7463_v27, %v7463_v27  ;;  %v6057_v41 = vadd.f32 %v6056_v26, %v6026_v25  ;;  %v7465_v42 = vadd.f32 %v5758_v35, %v2483_v34 }
 0x286   : > { %5957 = vst [vmem:[%s8413_s27 + $0x58] sm:$0xff] %v7464_v33  ;;  %v6030_v34 = vmul.f32 %v7464_v33, %v7464_v33 }
 0x287   : > { %v6058_v38 = vadd.f32 %v6057_v41, %v6027_v40  ;;  %5955 = vst [vmem:[%s8413_s27 + $0x48] sm:$0xff] %v7465_v42  ;;  %v5987_v47 = vadd.f32 %v7465_v42, %v5986_v36  ;;  %v6028_v53 = vmul.f32 %v7465_v42, %v7465_v42 }
 0x289   : > { %v5988_v19 = vadd.f32 %v7462_v23, %v5987_v47  ;;  %v6059_v13 = vadd.f32 %v6058_v38, %v6028_v53  ;;  %v7420_v45 = vpop.f32.mrb[12].mxu0 }
 0x28a   : > { %v7466_v46 = vadd.f32 %v7420_v45, %v9250_v28  ;;  %v5771_v54 = vpop.f32.mrb[13].mxu0 }
 0x28b   : > { %v7232_v43 = vpop.f32.mrb[16].mxu1  ;;  %v6060_v12 = vadd.f32 %v6059_v13, %v6029_v59  ;;  %v7467_v56 = vadd.f32 %v5771_v54, %v9252_v49  ;;  %v5989_v30 = vadd.f32 %v7464_v33, %v5988_v19  ;;  %v7421_v58 = vpop.f32.mrb[14].mxu0 }
 0x28c   : > { %v3330_v44 = vpop.f32.mrb[17].mxu1  ;;  %5960 = vst [vmem:[%s8413_s27 + $0x70] sm:$0xff] %v7466_v46  ;;  %v7468_v60 = vadd.f32 %v7421_v58, %v9254_v51  ;;  %v5774_v62 = vpop.f32.mrb[15].mxu0  ;;  %v6033_v37 = vmul.f32 %v7466_v46, %v7466_v46 }
 0x28d   : > { %v7233_v5 = vpop.f32.mrb[18].mxu1  ;;  %5958 = vst [vmem:[%s8413_s27 + $0x60] sm:$0xff] %v7467_v56  ;;  %v5990_v63 = vadd.f32 %v7467_v56, %v5989_v30  ;;  %v6031_v0 = vmul.f32 %v7467_v56, %v7467_v56  ;;  %v6061_v57 = vadd.f32 %v6060_v12, %v6030_v34  ;;  %v7469_v28 = vadd.f32 %v5774_v62, %v9256_v52 }
 0x28e   : > { %v3333_v55 = vpop.f32.mrb[19].mxu1  ;;  %5961 = vst [vmem:[%s8413_s27 + $0x78] sm:$0xff] %v7468_v60  ;;  %v6034_v8 = vmul.f32 %v7468_v60, %v7468_v60 }
 0x28f   : > { %v6062_v1 = vadd.f32 %v6061_v57, %v6031_v0  ;;  %5959 = vst [vmem:[%s8413_s27 + $0x68] sm:$0xff] %v7469_v28  ;;  %v5991_v17 = vadd.f32 %v7469_v28, %v5990_v63  ;;  %v6032_v31 = vmul.f32 %v7469_v28, %v7469_v28 }
 0x291   : > { %v5992_v49 = vadd.f32 %v7466_v46, %v5991_v17  ;;  %v6063_v2 = vadd.f32 %v6062_v1, %v6032_v31  ;;  %v7424_v3 = vpop.f32.mrb[16].mxu0 }
 0x292   : > { %v7470_v51 = vadd.f32 %v7424_v3, %v7232_v43  ;;  %v5787_v6 = vpop.f32.mrb[17].mxu0 }
 0x293   : > { %v7236_v4 = vpop.f32.mrb[20].mxu1  ;;  %v6064_v9 = vadd.f32 %v6063_v2, %v6033_v37  ;;  %v7471_v52 = vadd.f32 %v5787_v6, %v3330_v44  ;;  %v5993_v10 = vadd.f32 %v7468_v60, %v5992_v49  ;;  %v7425_v11 = vpop.f32.mrb[18].mxu0 }
 0x294   : > { %v3346_v7 = vpop.f32.mrb[21].mxu1  ;;  %5964 = vst [vmem:[%s8413_s27 + $0x90] sm:$0xff] %v7470_v51  ;;  %v7472_v61 = vadd.f32 %v7425_v11, %v7233_v5  ;;  %v5790_v15 = vpop.f32.mrb[19].mxu0  ;;  %v6037_v23 = vmul.f32 %v7470_v51, %v7470_v51 }
 0x295   : > { %v7237_v14 = vpop.f32.mrb[22].mxu1  ;;  %5962 = vst [vmem:[%s8413_s27 + $0x80] sm:$0xff] %v7471_v52  ;;  %v5994_v50 = vadd.f32 %v7471_v52, %v5993_v10  ;;  %v6035_v24 = vmul.f32 %v7471_v52, %v7471_v52  ;;  %v6065_v16 = vadd.f32 %v6064_v9, %v6034_v8  ;;  %v7473_v18 = vadd.f32 %v5790_v15, %v3333_v55 }
 0x296   : > { %v3349_v39 = vpop.f32.mrb[23].mxu1  ;;  %5965 = vst [vmem:[%s8413_s27 + $0x98] sm:$0xff] %v7472_v61  ;;  %v6038_v32 = vmul.f32 %v7472_v61, %v7472_v61 }
 0x297   : > { %v6066_v20 = vadd.f32 %v6065_v16, %v6035_v24  ;;  %5963 = vst [vmem:[%s8413_s27 + $0x88] sm:$0xff] %v7473_v18  ;;  %v5995_v21 = vadd.f32 %v7473_v18, %v5994_v50  ;;  %v6036_v22 = vmul.f32 %v7473_v18, %v7473_v18 }
 0x299   : > { %v5996_v48 = vadd.f32 %v7470_v51, %v5995_v21  ;;  %v6067_v25 = vadd.f32 %v6066_v20, %v6036_v22  ;;  %v7428_v26 = vpop.f32.mrb[20].mxu0 }
 0x29a   : > { %v7474_v27 = vadd.f32 %v7428_v26, %v7236_v4  ;;  %v5803_v29 = vpop.f32.mrb[21].mxu0 }
 0x29b   : > { %v6068_v33 = vadd.f32 %v6067_v25, %v6037_v23  ;;  %v7475_v35 = vadd.f32 %v5803_v29, %v3346_v7  ;;  %v5997_v36 = vadd.f32 %v7472_v61, %v5996_v48  ;;  %v7429_v40 = vpop.f32.mrb[22].mxu0  ;;  %v7240_v44 = vpop.f32.mrb[24].mxu1 }
 0x29c   : > { %5968 = vst [vmem:[%s8413_s27 + $0xb0] sm:$0xff] %v7474_v27  ;;  %v7476_v41 = vadd.f32 %v7429_v40, %v7237_v14  ;;  %v5806_v42 = vpop.f32.mrb[23].mxu0  ;;  %v3362_v59 = vpop.f32.mrb[25].mxu1  ;;  %v6041_v54 = vmul.f32 %v7474_v27, %v7474_v27 }
 0x29d   : > { %5966 = vst [vmem:[%s8413_s27 + $0xa0] sm:$0xff] %v7475_v35  ;;  %v5998_v38 = vadd.f32 %v7475_v35, %v5997_v36  ;;  %v6039_v47 = vmul.f32 %v7475_v35, %v7475_v35  ;;  %v6069_v53 = vadd.f32 %v6068_v33, %v6038_v32  ;;  %v7477_v43 = vadd.f32 %v5806_v42, %v3349_v39  ;;  %v7241_v5 = vpop.f32.mrb[26].mxu1 }
 0x29e   : > { %5969 = vst [vmem:[%s8413_s27 + $0xb8] sm:$0xff] %v7476_v41  ;;  %v3365_v46 = vpop.f32.mrb[27].mxu1  ;;  %v6042_v58 = vmul.f32 %v7476_v41, %v7476_v41 }
 0x29f   : > { %v6070_v19 = vadd.f32 %v6069_v53, %v6039_v47  ;;  %5967 = vst [vmem:[%s8413_s27 + $0xa8] sm:$0xff] %v7477_v43  ;;  %v5999_v13 = vadd.f32 %v7477_v43, %v5998_v38  ;;  %v6040_v45 = vmul.f32 %v7477_v43, %v7477_v43 }
 0x2a1   : > { %v6000_v55 = vadd.f32 %v7474_v27, %v5999_v13  ;;  %v6071_v34 = vadd.f32 %v6070_v19, %v6040_v45  ;;  %v7432_v12 = vpop.f32.mrb[24].mxu0  ;;  %v5978_v13 = vld [vmem:[#allocation12] sm:$0x1] }
 0x2a2   : > { %v7478_v56 = vadd.f32 %v7432_v12, %v7240_v44  ;;  %v5819_v30 = vpop.f32.mrb[25].mxu0 }
 0x2a3   : > { %v6072_v60 = vadd.f32 %v6071_v34, %v6041_v54  ;;  %v7479_v62 = vadd.f32 %v5819_v30, %v3362_v59  ;;  %v6001_v63 = vadd.f32 %v7476_v41, %v6000_v55  ;;  %v7433_v0 = vpop.f32.mrb[26].mxu0 }
 0x2a4   : > { %5972 = vst [vmem:[%s8413_s27 + $0xd0] sm:$0xff] %v7478_v56  ;;  %v7480_v57 = vadd.f32 %v7433_v0, %v7241_v5  ;;  %v5822_v28 = vpop.f32.mrb[27].mxu0  ;;  %v6045_v4 = vmul.f32 %v7478_v56, %v7478_v56 }
 0x2a5   : > { %5970 = vst [vmem:[%s8413_s27 + $0xc0] sm:$0xff] %v7479_v62  ;;  %v6002_v1 = vadd.f32 %v7479_v62, %v6001_v63  ;;  %v6043_v17 = vmul.f32 %v7479_v62, %v7479_v62  ;;  %v6073_v31 = vadd.f32 %v6072_v60, %v6042_v58  ;;  %v7481_v37 = vadd.f32 %v5822_v28, %v3365_v46  ;;  %v6018_v46 = vld [vmem:[#allocation12 + $0x1] sm:$0x1] }
 0x2a6   : > { %5973 = vst [vmem:[%s8413_s27 + $0xd8] sm:$0xff] %v7480_v57  ;;  %v7244_v7 = vpop.f32.mrb[28].mxu1  ;;  %v6046_v11 = vmul.f32 %v7480_v57, %v7480_v57 }
 0x2a7   : > { %v6074_v49 = vadd.f32 %v6073_v31, %v6043_v17  ;;  %5971 = vst [vmem:[%s8413_s27 + $0xc8] sm:$0xff] %v7481_v37  ;;  %v6003_v2 = vadd.f32 %v7481_v37, %v6002_v1  ;;  %v6044_v3 = vmul.f32 %v7481_v37, %v7481_v37  ;;  %v3378_v52 = vpop.f32.mrb[29].mxu1  ;;  %v6105_v17 = vld [vmem:[#allocation9] sm:$0x1] (!%p6781_p11) }
 0x2a8   : > { %v7245_v39 = vpop.f32.mrb[30].mxu1 }
 0x2a9   : > { %v6004_v51 = vadd.f32 %v7478_v56, %v6003_v2  ;;  %v6075_v6 = vadd.f32 %v6074_v49, %v6044_v3  ;;  %v7436_v8 = vpop.f32.mrb[28].mxu0  ;;  %v3381_v16 = vpop.f32.mrb[31].mxu1 }
 0x2aa   : > { %v7482_v9 = vadd.f32 %v7436_v8, %v7244_v7  ;;  %v5835_v10 = vpop.f32.mrb[29].mxu0 }
 0x2ab   : > { %v6076_v14 = vadd.f32 %v6075_v6, %v6045_v4  ;;  %v7483_v61 = vadd.f32 %v5835_v10, %v3378_v52  ;;  %v6005_v15 = vadd.f32 %v7480_v57, %v6004_v51  ;;  %v7437_v50 = vpop.f32.mrb[30].mxu0  ;;  %v6101_v57 = vld [vmem:[#allocation8] sm:$0x1] (!%p6781_p11) }
 0x2ac   : > { %5976 = vst [vmem:[%s8413_s27 + $0xf0] sm:$0xff] %v7482_v9  ;;  %v7484_v24 = vadd.f32 %v7437_v50, %v7245_v39  ;;  %v5838_v18 = vpop.f32.mrb[31].mxu0  ;;  %v6049_v27 = vmul.f32 %v7482_v9, %v7482_v9 }
 0x2ad   : > { %5974 = vst [vmem:[%s8413_s27 + $0xe0] sm:$0xff] %v7483_v61  ;;  %v6006_v20 = vadd.f32 %v7483_v61, %v6005_v15  ;;  %v6047_v21 = vmul.f32 %v7483_v61, %v7483_v61  ;;  %v6077_v22 = vadd.f32 %v6076_v14, %v6046_v11  ;;  %v7485_v23 = vadd.f32 %v5838_v18, %v3381_v16 }
 0x2ae   : > { %5977 = vst [vmem:[%s8413_s27 + $0xf8] sm:$0xff] %v7484_v24  ;;  %v6050_v33 = vmul.f32 %v7484_v24, %v7484_v24 }
 0x2af   : > { %v6078_v48 = vadd.f32 %v6077_v22, %v6047_v21  ;;  %5975 = vst [vmem:[%s8413_s27 + $0xe8] sm:$0xff] %v7485_v23  ;;  %v6007_v25 = vadd.f32 %v7485_v23, %v6006_v20  ;;  %v6048_v26 = vmul.f32 %v7485_v23, %v7485_v23 }
 0x2b1   : > { %v6008_v29 = vadd.f32 %v7482_v9, %v6007_v25  ;;  %v6079_v32 = vadd.f32 %v6078_v48, %v6048_v26 }
 0x2b3   : > { %v6009_v35 = vadd.f32 %v7484_v24, %v6008_v29  ;;  %v6080_v36 = vadd.f32 %v6079_v32, %v6049_v27 }
 0x2b5   : > { %v6010_v40 = vrot.slane %v6009_v35, 4  ;;  %v6081_v41 = vadd.f32 %v6080_v36, %v6050_v33 }
 0x2b7   : > { %v6011_v42 = vadd.f32 %v6010_v40, %v6009_v35  ;;  %v6082_v38 = vrot.slane %v6081_v41, 4 }
 0x2b9   : > { %v6012_v47 = vrot.slane %v6011_v42, 2  ;;  %v6083_v53 = vadd.f32 %v6082_v38, %v6081_v41 }
 0x2bb   : > { %v6013_v43 = vadd.f32 %v6012_v47, %v6011_v42  ;;  %v6084_v44 = vrot.slane %v6083_v53, 2 }
 0x2bd   : > { %v6014_v59 = vrot.slane %v6013_v43, 1  ;;  %v6085_v19 = vadd.f32 %v6084_v44, %v6083_v53 }
 0x2bf   : > { %v6015_v45 = vadd.f32 %v6014_v59, %v6013_v43  ;;  %v6086_v5 = vrot.slane %v6085_v19, 1  ;;  %6093 = sbr.rel (%p6781_p11) target bundleno = 743 (0x2e7), region = 60 }
 0x2c1   : > { %v6016_v54 = vadd.f32 %v6015_v45, %v5978_v13  ;;  %v6087_v55 = vadd.f32 %v6086_v5, %v6085_v19 }
 0x2c3   : > { %6017 = vst [vmem:[#allocation12] sm:$0x1] %v6016_v54  ;;  %v6088_v34 = vadd.f32 %v6087_v55, %v6018_v46 }
 0x2c5   : > { %6089 = vst [vmem:[#allocation12 + $0x1] sm:$0x1] %v6088_v34 }
 0x2ca   : > { %v6094_v12 = vld [vmem:[#allocation12] sm:$0x1] }
 0x2cb   : > { %v6095_v30 = vmul.f32 0.001953125, %v6094_v12 }
 0x2cc   : > { %v6096_v56 = vld [vmem:[#allocation12 + $0x1] sm:$0x1] }
 0x2cd   : > { %v6097_v58 = vmul.f32 0.001953125, %v6096_v56  ;;  %v6098_v60 = vmul.f32 %v6095_v30, %v6095_v30 }
 0x2cf   : > { %v6099_v62 = vsub.f32 %v6097_v58, %v6098_v60 }
 0x2d1   : > { %v6100_v63 = vmax.f32 %v6099_v62, 0.0 }
 0x2d3   : > { %v6102_v0 = vadd.f32 1e-05, %v6100_v63 }
 0x2d5   : > { %7930 = vrsqrt.f32 %v6102_v0 }
 0x2df   : > { %v7931_v28 = vpop.eup %7930 }
 0x2e0   : > { %v6104_v1 = vmul.f32 %v7931_v28, %v6101_v57 }
 0x2e2   : > { %6108 = vst [vmem:[#allocation12] sm:$0x1] %v6104_v1  ;;  %v6106_v31 = vmul.f32 %v6104_v1, %v6095_v30 }
 0x2e4   : > { %v6107_v37 = vsub.f32 %v6105_v17, %v6106_v31 }
 0x2e6   : > { %6109 = vst [vmem:[#allocation12 + $0x1] sm:$0x1] %v6107_v37 }
 0x2e7 PF: > { %s6789_s24 = sshll.u32 %s8214_s22, 12  ;;  %s6124_s30 = sshll.u32 %s8413_s27, 4  ;;  %s9302_s30 = int_to_ptr.vmem [resolvable:$true] %s6124_s30 }
 0x2e8   : > { %s9299_s17 = scalar_lea.hbm %s9372_s4, %s6789_s24  ;;  %s6111_s11 = scalar_lea.sflag [#allocation5], %s8394_s29 }
 0x2e9   : > { %s8046_s8 = scalar_lea.vmem %s9302_s30, 4096  ;;  %s8159_s6 = smov [#allocation11]  }
 0x2ea   : > { %p8047_p7 = scmp.ne.s32.totalorder %s9302_s30, %s8046_s8  ;;  %s8050_s23 = sshll.u32 %s8159_s6, 4  ;;  %s8051_s23 = int_to_ptr.vmem [resolvable:$false] %s8050_s23 }
 0x2eb   : > { %s8052_s7 = scalar_lea.vmem %s8051_s23, 8192  ;;  %p8053_p2 = scmp.lt.s32.totalorder %s9302_s30, %s8051_s23 }
 0x2ec   : > { %p8048_p13 = pnand %p8047_p7, %p8343_p5  ;;  %p8054_p4 = scmp.lt.s32.totalorder %s8052_s7, %s8046_s8 }
 0x2ee   : > { %p8049_p1 = pneg %p8048_p13  ;;  %p8055_p10 = por %p8054_p4, %p8053_p2 }
 0x2f0   : > { %p8056_p3 = pnand %p8055_p10, %p8049_p1 }
 0x2f2   : > { %8059 = shalt.err (!%p8056_p3)
}
 0x2f3   : > { %s8060_s12 = scalar_lea.hbm %s9299_s17, 4096  ;;  %s8064_s26 = scalar_lea.hbm %s9372_s4, 8192 }
 0x2f4   : > { %p8061_p12 = scmp.ne.s32.totalorder %s9299_s17, %s8060_s12  ;;  %p8065_p6 = scmp.lt.u32.totalorder %s9299_s17, %s9372_s4 }
 0x2f5   : > { %p8066_p8 = scmp.lt.u32.totalorder %s8064_s26, %s8060_s12  ;;  %p8068_p7 = scmp.lt.u32.totalorder %s8060_s12, %s9299_s17 }
 0x2f6   : > { %p8062_p9 = pnand %p8061_p12, %p8343_p5 }
 0x2f7   : > { %p8067_p11 = por %p8066_p8, %p8065_p6 }
 0x2f8   : > { %p8063_p0 = pneg %p8062_p9 }
 0x2f9   : > { %p8069_p13 = por %p8068_p7, %p8067_p11 }
 0x2fb   : > { %p8070_p1 = pnand %p8069_p13, %p8063_p0 }
 0x2fd   : > { %8073 = shalt.err (!%p8070_p1)
}
 0x2fe   : > { %s8160_s13 = smov 128   ;;  %s8161_s28 = smov 8  }
 0x2ff   : > { %7727 = dma.vmem_to_hbm [thread:$0]  (%p8343_p5), %s9302_s30, 4096, %s9299_s17, %s6111_s11, %s8160_s13, %s8160_s13, %s8161_s28  }
 0x300   : > { %s8162_s8 = smov [#allocation12]   ;;  %p9398_p4 = scmp.eq.s32.totalorder %s8214_s22, 1 }
 0x301   : > { %s6138_s6 = sshll.u32 %s8162_s8, 4  ;;  %s6139_s6 = int_to_ptr.vmem [resolvable:$true] %s6138_s6 }
 0x302   : > { %s8074_s23 = scalar_lea.vmem %s6139_s6, 32  ;;  %p8081_p12 = scmp.lt.s32.totalorder %s6139_s6, %s6139_s6 }
 0x303   : > { %p8075_p2 = scmp.ne.s32.totalorder %s6139_s6, %s8074_s23  ;;  %p8082_p9 = scmp.lt.s32.totalorder %s8074_s23, %s8074_s23 }
 0x305   : > { %p8076_p10 = pnand %p8075_p2, %p9398_p4  ;;  %p8083_p0 = por %p8082_p9, %p8081_p12 }
 0x307   : > { %p8077_p3 = pneg %p8076_p10 }
 0x309   : > { %p8084_p6 = pnand %p8083_p0, %p8077_p3 }
 0x30b   : > { %8087 = shalt.err (!%p8084_p6)
}
 0x30c   : > { %s8088_s10 = scalar_lea.hbm %s9373_s5, 32  ;;  %p9399_p8 = pmov %p9398_p4 }
 0x30d   : > { %p8089_p5 = scmp.ne.s32.totalorder %s9373_s5, %s8088_s10  ;;  %p8094_p13 = scmp.lt.u32.totalorder %s8088_s10, %s9373_s5 }
 0x30f   : > { %p8090_p11 = pnand %p8089_p5, %p9399_p8 }
 0x311   : > { %p8091_p7 = pneg %p8090_p11 }
 0x313   : > { %p8096_p1 = pnand %p8094_p13, %p8091_p7 }
 0x315   : > { %8099 = shalt.err (!%p8096_p1)
}
 0x316   : > { %p9400_p2 = pmov %p9398_p4 }
 0x318   : > { %7729 = dma.vmem_to_hbm [thread:$0]  (%p9400_p2), %s6139_s6, 32, %s9373_s5, [#allocation13]  }
 0x319   : > { %p9401_p4 = pmov %p9400_p2 }
 0x31a   : > { %p9402_p10 = pmov %p9400_p2 }
 0x31b   : > { %8129 = dma.done.wait (%p9401_p4), [#allocation13], 32  }
 0x31c   : > { %8131 = vsyncadd (%p9402_p10), [#allocation13], 4294967264 }
 0x31d PF: > { %s6154_s26 = sand.u32 1, %s8138_s18   ;;  %p9403_p3 = scmp.ne.s32.totalorder %s9379_s25, 0 }
 0x31e   : > { %p9404_p12 = scmp.ge.s32.totalorder %s8150_s21, 2  ;;  %s6155_s27 = scalar_lea.sflag [#allocation5], %s6154_s26 }
 0x320   : > { %p7748_p9 = pnand %p9404_p12, %p9403_p3 }
 0x322   : > { %8133 = dma.done.wait (!%p7748_p9), %s6155_s27, 4096  }
 0x323   : > { %8135 = vsyncadd (!%p7748_p9), %s6155_s27, 4294963200  ;;  %p22_p0 = scmp.ge.s32.totalorder %s8329_s14, 4   ;;  %s9405_s18 = smov %s8142_s19 }
 0x324   : > { %s9406_s19 = smov %s8146_s20  ;;  %s9407_s20 = smov %s8339_s9 }
 0x325   : > { %s9408_s21 = smov %s8329_s14  ;;  %24 = sbr.rel (!%p22_p0) target bundleno = 8 (0x8), region = 119 }
 0x32c   :  { %6160 = vsyncpa [#allocation4], 1 }
 0x32d   :  { %6162 = vsyncpa [#allocation4 + $0x1], 1 }
 0x32e   :  { %6163 = vsyncpa [#allocation7], 1 }
 0x32f   :  { %6164 = vsyncpa [#allocation10], 1 }
 0x330   :  { %6165 = vsyncpa [#allocation5], 1 }
 0x331   :  { %6167 = vsyncpa [#allocation5 + $0x1], 1 }
 0x332   :  { %6168 = vsyncpa [#allocation13], 1 }

</bundles_post_ra>
